<compile_context>
chip_gen: v5e
topology: v5e:2x2
jax: 0.10.0
libtpu: 0.0.40
codegen_flags: <defaults>
</compile_context>

<pallas_src>
import jax
import jax.numpy as jnp
import numpy as np
from jax.experimental import pallas as pl
from jax.experimental.pallas import tpu as pltpu

BN_EPS = 1e-5
VMEM = pltpu.MemorySpace.VMEM


# ----------------------------- math helpers ----------------------------------
def _softplus(x):
    # matches torch.nn.Softplus(beta=1, threshold=20)
    return jnp.where(x > 20.0, x, jnp.log(1.0 + jnp.exp(jnp.minimum(x, 20.0))))


def _sigmoid(x):
    # single-EUP-op sigmoid: sigmoid(x) == 0.5*tanh(0.5*x) + 0.5 (exact identity)
    return 0.5 * jnp.tanh(0.5 * x) + 0.5


# ----------------------------------- kernel ----------------------------------
def _make_cgcnn_kernel(N, M, A, n_conv):
    NM = N * M

    def kernel(atom_fea_ref, idx_ref, bond_ref,
               emb_w_ref, emb_b_ref,
               w_self_ref, w_nbr_ref, w_bond_ref, b1_ref, s2_ref, t2_ref,
               crys_pool_ref, fc_w_ref, fc_b_ref, out_w_ref, out_b_ref,
               out_ref):
        f32 = jnp.float32
        bf16 = jnp.bfloat16

        # ---- atom embedding (bf16 MXU operands, f32 accumulation) ----
        atom = jnp.dot(atom_fea_ref[...], emb_w_ref[...],
                       preferred_element_type=f32) + emb_b_ref[...]      # (N, A) f32

        # ---- one-hot neighbor-gather matrix built in-kernel (exact in bf16) ----
        # TODO(synk): padded neighbor lists with sentinel idx >= N would gather
        # zeros here (the reference would index a real atom) — clamp upstream.
        idx = idx_ref[...]                                               # (N*M, 1) i32
        iota = jax.lax.broadcasted_iota(jnp.int32, (NM, N), 1)
        onehot = (idx == iota).astype(bf16)                              # (N*M, N)
        bond = bond_ref[...]                                             # (N*M, B) bf16

        # ---- n_conv graph conv layers; `atom` stays resident in f32 ----
        for l in range(n_conv):
            atom_b = atom.astype(bf16)                                   # (N, A)
            atom_g = jnp.dot(onehot, atom_b,
                             preferred_element_type=f32).astype(bf16)    # (N*M, A)

            def gated(k):
                # k = 0 -> filter half, k = 1 -> core half.  Leading-axis ref
                # views only — no sub-128-lane slicing anywhere in the layer.
                h_self = jnp.dot(atom_b, w_self_ref[l, k],
                                 preferred_element_type=f32) + b1_ref[l, k]   # (N, A)
                h_nbr = jnp.dot(atom_g, w_nbr_ref[l, k],
                                preferred_element_type=f32)                   # (N*M, A)
                h_bond = jnp.dot(bond, w_bond_ref[l, k],
                                 preferred_element_type=f32)                  # (N*M, A)
                return (h_self.reshape(N, 1, A)
                        + (h_nbr + h_bond).reshape(N, M, A))                  # (N, M, A)

            filt = _sigmoid(gated(0))                                    # f32 transcend.
            core = _softplus(gated(1))
            summed = jnp.sum(filt * core, axis=1)                        # (N, A) seg. reduce
            summed = summed * s2_ref[l] + t2_ref[l]                      # folded bn2
            atom = _softplus(atom + summed)                              # residual

        # ---- crystal mean pooling + MLP head ----
        crys = jnp.dot(crys_pool_ref[...], atom.astype(bf16),
                       preferred_element_type=f32)                       # (N0, A)
        crys = _softplus(crys)
        h = _softplus(jnp.dot(crys.astype(bf16), fc_w_ref[...],
                              preferred_element_type=f32) + fc_b_ref[...])
        # TODO(synk): Dropout is eval-mode identity; classification/evidential
        # heads are not implemented (regression path, n_h=1 only).
        out_ref[...] = jnp.dot(h.astype(bf16), out_w_ref[...],
                               preferred_element_type=f32) + out_b_ref[...]

    return kernel


# ------------------------------ parameters -----------------------------------
def init_params(key, orig_atom_fea_len, nbr_fea_len, atom_fea_len,
                n_conv, h_fea_len):
    def linear_init(k, fan_in, fan_out):
        bound = 1.0 / np.sqrt(fan_in)
        kw, kb = jax.random.split(k)
        w = jax.random.uniform(kw, (fan_in, fan_out), jnp.float32, -bound, bound)
        b = jax.random.uniform(kb, (1, fan_out), jnp.float32, -bound, bound)
        return w, b

    def bn_init(k, f):
        kg, kb, km, kv = jax.random.split(k, 4)
        gamma = jax.random.uniform(kg, (f,), jnp.float32, 0.5, 1.5)
        beta = 0.1 * jax.random.normal(kb, (f,), jnp.float32)
        mean = 0.1 * jax.random.normal(km, (f,), jnp.float32)
        var = jax.random.uniform(kv, (f,), jnp.float32, 0.5, 1.5)
        return jnp.stack([gamma, beta, mean, var])      # (4, f)

    A, B = atom_fea_len, nbr_fea_len
    keys = jax.random.split(key, 3 * n_conv + 3)
    emb_w, emb_b = linear_init(keys[0], orig_atom_fea_len, A)
    convs = []
    for i in range(n_conv):
        w, b = linear_init(keys[1 + 3 * i], 2 * A + B, 2 * A)   # fc_full (W^T layout)
        convs.append(dict(w_full=w, b_full=b,
                          bn1=bn_init(keys[2 + 3 * i], 2 * A),
                          bn2=bn_init(keys[3 + 3 * i], A)))
    fc_w, fc_b = linear_init(keys[-2], A, h_fea_len)            # conv_to_fc
    out_w, out_b = linear_init(keys[-1], h_fea_len, 1)          # fc_out (regression)
    return dict(emb_w=emb_w, emb_b=emb_b, convs=convs,
                fc_w=fc_w, fc_b=fc_b, out_w=out_w, out_b=out_b)


def _bn_scale_shift(bn):
    gamma, beta, mean, var = bn[0], bn[1], bn[2], bn[3]
    s = gamma / jnp.sqrt(var + BN_EPS)
    return s, beta - mean * s


def prepare_fused_params(params):
    """Fold eval-mode BN into the linear weights; split fc_full into
    {self, nbr, bond} x {filter, core} blocks, stack per layer, cast to bf16."""
    A = params['emb_w'].shape[1]
    bf16 = jnp.bfloat16
    w_self_l, w_nbr_l, w_bond_l, b1_l, s2_l, t2_l = [], [], [], [], [], []
    for cp in params['convs']:
        s1, t1 = _bn_scale_shift(cp['bn1'])
        w_f = cp['w_full'] * s1[None, :]                                 # bn1 folded
        b_f = cp['b_full'] * s1[None, :] + t1[None, :]
        w_self_l.append(jnp.stack([w_f[:A, :A], w_f[:A, A:]]))           # (2, A, A)
        w_nbr_l.append(jnp.stack([w_f[A:2 * A, :A], w_f[A:2 * A, A:]]))  # (2, A, A)
        w_bond_l.append(jnp.stack([w_f[2 * A:, :A], w_f[2 * A:, A:]]))   # (2, B, A)
        b1_l.append(jnp.stack([b_f[:, :A], b_f[:, A:]]))                 # (2, 1, A)
        s2, t2 = _bn_scale_shift(cp['bn2'])
        s2_l.append(s2[None, :])
        t2_l.append(t2[None, :])
    return (jnp.stack(w_self_l).astype(bf16), jnp.stack(w_nbr_l).astype(bf16),
            jnp.stack(w_bond_l).astype(bf16),
            jnp.stack(b1_l), jnp.stack(s2_l), jnp.stack(t2_l))


# ------------------------------- forward --------------------------------------
def cgcnn_forward(params, atom_fea, nbr_fea, nbr_fea_idx, crys_pool):
    N, M = nbr_fea_idx.shape
    F0 = atom_fea.shape[1]
    A = params['emb_w'].shape[1]
    B = nbr_fea.shape[-1]
    H = params['fc_w'].shape[1]
    N0 = crys_pool.shape[0]
    n_conv = len(params['convs'])
    NM = N * M
    bf16 = jnp.bfloat16

    bond = nbr_fea.reshape(NM, B).astype(bf16)
    idx2d = nbr_fea_idx.reshape(NM, 1).astype(jnp.int32)
    (w_self_all, w_nbr_all, w_bond_all,
     b1_all, s2_all, t2_all) = prepare_fused_params(params)

    operands = [atom_fea.astype(bf16), idx2d, bond,
                params['emb_w'].astype(bf16), params['emb_b'],
                w_self_all, w_nbr_all, w_bond_all, b1_all, s2_all, t2_all,
                crys_pool.astype(bf16), params['fc_w'].astype(bf16), params['fc_b'],
                params['out_w'].astype(bf16), params['out_b']]

    flops = 2 * N * F0 * A
    flops += n_conv * (2 * NM * N * A             # one-hot gather
                       + 2 * (2 * N * A * A)      # self  filter/core
                       + 2 * (2 * NM * A * A)     # nbr   filter/core
                       + 2 * (2 * NM * B * A))    # bond  filter/core
    flops += 2 * N0 * N * A + 2 * N0 * A * H + 2 * N0 * H
    transcend = n_conv * (3 * NM * A + 2 * N * A) + N0 * (2 * A + 2 * H)
    bytes_accessed = sum(int(np.prod(x.shape)) * x.dtype.itemsize
                         for x in operands) + N0 * 4

    # TODO(synk): for large N, grid over atom-row tiles ("parallel" to use both
    # v7x TensorCores), stream (NM, B) bond blocks via BlockSpec index_maps, and
    # replace the O(N^2*M) one-hot gather with a scalar-prefetch DMA gather.
    kernel = _make_cgcnn_kernel(N, M, A, n_conv)
    out = pl.pallas_call(
        kernel,
        out_shape=jax.ShapeDtypeStruct((N0, 1), jnp.float32),
        in_specs=[pl.BlockSpec(memory_space=VMEM)] * len(operands),
        out_specs=pl.BlockSpec(memory_space=VMEM),
        compiler_params=pltpu.CompilerParams(vmem_limit_bytes=32 * 1024 * 1024),
        cost_estimate=pl.CostEstimate(flops=int(flops),
                                      transcendentals=int(transcend),
                                      bytes_accessed=int(bytes_accessed)),
    )(*operands)
    return jnp.squeeze(out)


# ---------------------------- pure-JAX reference ------------------------------
def _bn_ref(x, bn):
    gamma, beta, mean, var = bn[0], bn[1], bn[2], bn[3]
    return (x - mean) / jnp.sqrt(var + BN_EPS) * gamma + beta


def cgcnn_reference(params, atom_fea, nbr_fea, nbr_fea_idx, crystal_atom_idx):
    hi = jax.lax.Precision.HIGHEST
    N, M = nbr_fea_idx.shape
    A = params['emb_w'].shape[1]
    atom = jnp.dot(atom_fea, params['emb_w'], precision=hi) + params['emb_b']
    for cp in params['convs']:
        atom_nbr = atom[nbr_fea_idx]                                   # (N, M, A)
        total = jnp.concatenate(
            [jnp.broadcast_to(atom[:, None, :], (N, M, A)), atom_nbr, nbr_fea],
            axis=2)
        g = jnp.dot(total.reshape(N * M, -1), cp['w_full'],
                    precision=hi) + cp['b_full']
        g = _bn_ref(g, cp['bn1']).reshape(N, M, 2 * A)
        filt, core = g[..., :A], g[..., A:]
        summed = jnp.sum(jax.nn.sigmoid(filt) * _softplus(core), axis=1)
        summed = _bn_ref(summed, cp['bn2'])
        atom = _softplus(atom + summed)
    crys = jnp.stack([jnp.mean(atom[idx], axis=0) for idx in crystal_atom_idx])
    crys = _softplus(crys)
    h = _softplus(jnp.dot(crys, params['fc_w'], precision=hi) + params['fc_b'])
    out = jnp.dot(h, params['out_w'], precision=hi) + params['out_b']
    return jnp.squeeze(out)


# ----------------------------------- main --------------------------------------
if __name__ == "__main__":
    key = jax.random.PRNGKey(0)
    N, M = 16, 8                          # atoms, max neighbors
    orig_atom_fea_len, nbr_fea_len = 24, 16
    atom_fea_len, n_conv, h_fea_len = 32, 3, 64

    k_param, k_af, k_nf, k_idx = jax.random.split(key, 4)
    params = init_params(k_param, orig_atom_fea_len, nbr_fea_len,
                         atom_fea_len, n_conv, h_fea_len)

    # Round inputs to bf16-representable values so the f32 reference and the
    # bf16-MXU kernel start from identical operands.
    atom_fea = jax.random.normal(k_af, (N, orig_atom_fea_len), jnp.float32)
    atom_fea = atom_fea.astype(jnp.bfloat16).astype(jnp.float32)
    nbr_fea = jax.random.normal(k_nf, (N, M, nbr_fea_len), jnp.float32)
    nbr_fea = nbr_fea.astype(jnp.bfloat16).astype(jnp.float32)
    nbr_fea_idx = jax.random.randint(k_idx, (N, M), 0, N, jnp.int32)
    crystal_atom_idx = [jnp.arange(0, 10), jnp.arange(10, 16)]   # 2 crystals

    # per-crystal mean-pooling matrix (N0, N)
    crys_pool = np.zeros((len(crystal_atom_idx), N), np.float32)
    for i, idx in enumerate(crystal_atom_idx):
        crys_pool[i, np.asarray(idx)] = 1.0 / len(idx)
    crys_pool = jnp.asarray(crys_pool)

    out = cgcnn_forward(params, atom_fea, nbr_fea, nbr_fea_idx, crys_pool)
    out = jax.block_until_ready(out)

    ref = cgcnn_reference(params, atom_fea, nbr_fea, nbr_fea_idx,
                          crystal_atom_idx)
    # Kernel uses bf16 MXU operands with f32 accumulation; the reference is
    # full f32, so the tolerance accounts for bf16 operand rounding.
    np.testing.assert_allclose(np.asarray(out), np.asarray(ref),
                               rtol=3e-2, atol=3e-2)
    print("KERNEL_OK")
</pallas_src>

<mosaic_0001>
module attributes {stable_mosaic.version = 11 : i64} {
  func.func @kernel(%arg0: memref<16x24xbf16, #tpu.memory_space<vmem>>, %arg1: memref<128x1xi32, #tpu.memory_space<vmem>>, %arg2: memref<128x16xbf16, #tpu.memory_space<vmem>>, %arg3: memref<24x32xbf16, #tpu.memory_space<vmem>>, %arg4: memref<1x32xf32, #tpu.memory_space<vmem>>, %arg5: memref<3x2x32x32xbf16, #tpu.memory_space<vmem>>, %arg6: memref<3x2x32x32xbf16, #tpu.memory_space<vmem>>, %arg7: memref<3x2x16x32xbf16, #tpu.memory_space<vmem>>, %arg8: memref<3x2x1x32xf32, #tpu.memory_space<vmem>>, %arg9: memref<3x1x32xf32, #tpu.memory_space<vmem>>, %arg10: memref<3x1x32xf32, #tpu.memory_space<vmem>>, %arg11: memref<2x16xbf16, #tpu.memory_space<vmem>>, %arg12: memref<32x64xbf16, #tpu.memory_space<vmem>>, %arg13: memref<1x64xf32, #tpu.memory_space<vmem>>, %arg14: memref<64x1xbf16, #tpu.memory_space<vmem>>, %arg15: memref<1x1xf32, #tpu.memory_space<vmem>>, %arg16: memref<2x1xf32, #tpu.memory_space<vmem>>) attributes {dimension_semantics = [], scalar_prefetch = 0 : i64, scratch_operands = 0 : i64, tpu.core_type = #tpu.core_type<tc>} {
    %c0 = arith.constant 0 : index
    %c0_0 = arith.constant 0 : index
    %0 = vector.load %arg0[%c0, %c0_0] : memref<16x24xbf16, #tpu.memory_space<vmem>>, vector<16x24xbf16>
    %c0_1 = arith.constant 0 : index
    %c0_2 = arith.constant 0 : index
    %1 = vector.load %arg3[%c0_1, %c0_2] : memref<24x32xbf16, #tpu.memory_space<vmem>>, vector<24x32xbf16>
    %cst = arith.constant dense<0.000000e+00> : vector<16x32xf32>
    %2 = tpu.matmul %0, %1, %cst {dimension_numbers = #tpu.dot_dimension_numbers<[1], [0], [0], [1], [0, 0, 1, 1], [], []>} : vector<16x24xbf16>, vector<24x32xbf16>, vector<16x32xf32> -> vector<16x32xf32>
    %c0_3 = arith.constant 0 : index
    %c0_4 = arith.constant 0 : index
    %3 = vector.load %arg4[%c0_3, %c0_4] : memref<1x32xf32, #tpu.memory_space<vmem>>, vector<1x32xf32>
    %4 = vector.broadcast %3 : vector<1x32xf32> to vector<16x32xf32>
    %5 = arith.addf %2, %4 : vector<16x32xf32>
    %c0_5 = arith.constant 0 : index
    %c0_6 = arith.constant 0 : index
    %6 = vector.load %arg1[%c0_5, %c0_6] : memref<128x1xi32, #tpu.memory_space<vmem>>, vector<128x1xi32>
    %7 = tpu.iota {dimensions = array<i32: 1>} : vector<128x16xi32>
    %8 = vector.broadcast %6 : vector<128x1xi32> to vector<128x16xi32>
    %9 = arith.cmpi eq, %8, %7 : vector<128x16xi32>
    %10 = arith.extui %9 : vector<128x16xi1> to vector<128x16xi32>
    %11 = arith.sitofp %10 : vector<128x16xi32> to vector<128x16xf32>
    %12 = arith.truncf %11 : vector<128x16xf32> to vector<128x16xbf16>
    %c0_7 = arith.constant 0 : index
    %c0_8 = arith.constant 0 : index
    %13 = vector.load %arg2[%c0_7, %c0_8] : memref<128x16xbf16, #tpu.memory_space<vmem>>, vector<128x16xbf16>
    %14 = arith.truncf %5 : vector<16x32xf32> to vector<16x32xbf16>
    %cst_9 = arith.constant dense<0.000000e+00> : vector<128x32xf32>
    %15 = tpu.matmul %12, %14, %cst_9 {dimension_numbers = #tpu.dot_dimension_numbers<[1], [0], [0], [1], [0, 0, 1, 1], [], []>} : vector<128x16xbf16>, vector<16x32xbf16>, vector<128x32xf32> -> vector<128x32xf32>
    %16 = arith.truncf %15 : vector<128x32xf32> to vector<128x32xbf16>
    %c0_10 = arith.constant 0 : index
    %c0_11 = arith.constant 0 : index
    %c0_12 = arith.constant 0 : index
    %c0_13 = arith.constant 0 : index
    %17 = vector.load %arg5[%c0_10, %c0_11, %c0_12, %c0_13] : memref<3x2x32x32xbf16, #tpu.memory_space<vmem>>, vector<1x1x32x32xbf16>
    %18 = vector.shape_cast %17 : vector<1x1x32x32xbf16> to vector<32x32xbf16>
    %cst_14 = arith.constant dense<0.000000e+00> : vector<16x32xf32>
    %19 = tpu.matmul %14, %18, %cst_14 {dimension_numbers = #tpu.dot_dimension_numbers<[1], [0], [0], [1], [0, 0, 1, 1], [], []>} : vector<16x32xbf16>, vector<32x32xbf16>, vector<16x32xf32> -> vector<16x32xf32>
    %c0_15 = arith.constant 0 : index
    %c0_16 = arith.constant 0 : index
    %c0_17 = arith.constant 0 : index
    %c0_18 = arith.constant 0 : index
    %20 = vector.load %arg8[%c0_15, %c0_16, %c0_17, %c0_18] : memref<3x2x1x32xf32, #tpu.memory_space<vmem>>, vector<1x1x1x32xf32>
    %21 = vector.shape_cast %20 : vector<1x1x1x32xf32> to vector<1x32xf32>
    %22 = vector.broadcast %21 : vector<1x32xf32> to vector<16x32xf32>
    %23 = arith.addf %19, %22 : vector<16x32xf32>
    %c0_19 = arith.constant 0 : index
    %c0_20 = arith.constant 0 : index
    %c0_21 = arith.constant 0 : index
    %c0_22 = arith.constant 0 : index
    %24 = vector.load %arg6[%c0_19, %c0_20, %c0_21, %c0_22] : memref<3x2x32x32xbf16, #tpu.memory_space<vmem>>, vector<1x1x32x32xbf16>
    %25 = vector.shape_cast %24 : vector<1x1x32x32xbf16> to vector<32x32xbf16>
    %cst_23 = arith.constant dense<0.000000e+00> : vector<128x32xf32>
    %26 = tpu.matmul %16, %25, %cst_23 {dimension_numbers = #tpu.dot_dimension_numbers<[1], [0], [0], [1], [0, 0, 1, 1], [], []>} : vector<128x32xbf16>, vector<32x32xbf16>, vector<128x32xf32> -> vector<128x32xf32>
    %c0_24 = arith.constant 0 : index
    %c0_25 = arith.constant 0 : index
    %c0_26 = arith.constant 0 : index
    %c0_27 = arith.constant 0 : index
    %27 = vector.load %arg7[%c0_24, %c0_25, %c0_26, %c0_27] : memref<3x2x16x32xbf16, #tpu.memory_space<vmem>>, vector<1x1x16x32xbf16>
    %28 = vector.shape_cast %27 : vector<1x1x16x32xbf16> to vector<16x32xbf16>
    %cst_28 = arith.constant dense<0.000000e+00> : vector<128x32xf32>
    %29 = tpu.matmul %13, %28, %cst_28 {dimension_numbers = #tpu.dot_dimension_numbers<[1], [0], [0], [1], [0, 0, 1, 1], [], []>} : vector<128x16xbf16>, vector<16x32xbf16>, vector<128x32xf32> -> vector<128x32xf32>
    %30 = vector.shape_cast %23 : vector<16x32xf32> to vector<16x1x32xf32>
    %31 = arith.addf %26, %29 : vector<128x32xf32>
    %32 = vector.shape_cast %31 : vector<128x32xf32> to vector<16x8x32xf32>
    %33 = vector.broadcast %30 : vector<16x1x32xf32> to vector<16x8x32xf32>
    %34 = arith.addf %33, %32 : vector<16x8x32xf32>
    %cst_29 = arith.constant 5.000000e-01 : f32
    %35 = vector.broadcast %cst_29 : f32 to vector<16x8x32xf32>
    %36 = arith.mulf %35, %34 : vector<16x8x32xf32>
    %37 = math.tanh %36 : vector<16x8x32xf32>
    %cst_30 = arith.constant 5.000000e-01 : f32
    %38 = vector.broadcast %cst_30 : f32 to vector<16x8x32xf32>
    %39 = arith.mulf %38, %37 : vector<16x8x32xf32>
    %cst_31 = arith.constant 5.000000e-01 : f32
    %40 = vector.broadcast %cst_31 : f32 to vector<16x8x32xf32>
    %41 = arith.addf %39, %40 : vector<16x8x32xf32>
    %c0_32 = arith.constant 0 : index
    %c1 = arith.constant 1 : index
    %c0_33 = arith.constant 0 : index
    %c0_34 = arith.constant 0 : index
    %42 = vector.load %arg5[%c0_32, %c1, %c0_33, %c0_34] : memref<3x2x32x32xbf16, #tpu.memory_space<vmem>>, vector<1x1x32x32xbf16>
    %43 = vector.shape_cast %42 : vector<1x1x32x32xbf16> to vector<32x32xbf16>
    %cst_35 = arith.constant dense<0.000000e+00> : vector<16x32xf32>
    %44 = tpu.matmul %14, %43, %cst_35 {dimension_numbers = #tpu.dot_dimension_numbers<[1], [0], [0], [1], [0, 0, 1, 1], [], []>} : vector<16x32xbf16>, vector<32x32xbf16>, vector<16x32xf32> -> vector<16x32xf32>
    %c0_36 = arith.constant 0 : index
    %c1_37 = arith.constant 1 : index
    %c0_38 = arith.constant 0 : index
    %c0_39 = arith.constant 0 : index
    %45 = vector.load %arg8[%c0_36, %c1_37, %c0_38, %c0_39] : memref<3x2x1x32xf32, #tpu.memory_space<vmem>>, vector<1x1x1x32xf32>
    %46 = vector.shape_cast %45 : vector<1x1x1x32xf32> to vector<1x32xf32>
    %47 = vector.broadcast %46 : vector<1x32xf32> to vector<16x32xf32>
    %48 = arith.addf %44, %47 : vector<16x32xf32>
    %c0_40 = arith.constant 0 : index
    %c1_41 = arith.constant 1 : index
    %c0_42 = arith.constant 0 : index
    %c0_43 = arith.constant 0 : index
    %49 = vector.load %arg6[%c0_40, %c1_41, %c0_42, %c0_43] : memref<3x2x32x32xbf16, #tpu.memory_space<vmem>>, vector<1x1x32x32xbf16>
    %50 = vector.shape_cast %49 : vector<1x1x32x32xbf16> to vector<32x32xbf16>
    %cst_44 = arith.constant dense<0.000000e+00> : vector<128x32xf32>
    %51 = tpu.matmul %16, %50, %cst_44 {dimension_numbers = #tpu.dot_dimension_numbers<[1], [0], [0], [1], [0, 0, 1, 1], [], []>} : vector<128x32xbf16>, vector<32x32xbf16>, vector<128x32xf32> -> vector<128x32xf32>
    %c0_45 = arith.constant 0 : index
    %c1_46 = arith.constant 1 : index
    %c0_47 = arith.constant 0 : index
    %c0_48 = arith.constant 0 : index
    %52 = vector.load %arg7[%c0_45, %c1_46, %c0_47, %c0_48] : memref<3x2x16x32xbf16, #tpu.memory_space<vmem>>, vector<1x1x16x32xbf16>
    %53 = vector.shape_cast %52 : vector<1x1x16x32xbf16> to vector<16x32xbf16>
    %cst_49 = arith.constant dense<0.000000e+00> : vector<128x32xf32>
    %54 = tpu.matmul %13, %53, %cst_49 {dimension_numbers = #tpu.dot_dimension_numbers<[1], [0], [0], [1], [0, 0, 1, 1], [], []>} : vector<128x16xbf16>, vector<16x32xbf16>, vector<128x32xf32> -> vector<128x32xf32>
    %55 = vector.shape_cast %48 : vector<16x32xf32> to vector<16x1x32xf32>
    %56 = arith.addf %51, %54 : vector<128x32xf32>
    %57 = vector.shape_cast %56 : vector<128x32xf32> to vector<16x8x32xf32>
    %58 = vector.broadcast %55 : vector<16x1x32xf32> to vector<16x8x32xf32>
    %59 = arith.addf %58, %57 : vector<16x8x32xf32>
    %cst_50 = arith.constant 2.000000e+01 : f32
    %60 = vector.broadcast %cst_50 : f32 to vector<16x8x32xf32>
    %61 = arith.cmpf ogt, %59, %60 : vector<16x8x32xf32>
    %cst_51 = arith.constant 2.000000e+01 : f32
    %62 = vector.broadcast %cst_51 : f32 to vector<16x8x32xf32>
    %63 = arith.minimumf %59, %62 : vector<16x8x32xf32>
    %64 = math.exp %63 : vector<16x8x32xf32>
    %cst_52 = arith.constant 1.000000e+00 : f32
    %65 = vector.broadcast %cst_52 : f32 to vector<16x8x32xf32>
    %66 = arith.addf %65, %64 : vector<16x8x32xf32>
    %67 = math.log %66 : vector<16x8x32xf32>
    %68 = arith.select %61, %59, %67 : vector<16x8x32xi1>, vector<16x8x32xf32>
    %69 = arith.mulf %41, %68 : vector<16x8x32xf32>
    %cst_53 = arith.constant dense<0.000000e+00> : vector<16x32xf32>
    %70 = vector.multi_reduction <add>, %69, %cst_53 [1] : vector<16x8x32xf32> to vector<16x32xf32>
    %c0_54 = arith.constant 0 : index
    %c0_55 = arith.constant 0 : index
    %c0_56 = arith.constant 0 : index
    %71 = vector.load %arg9[%c0_54, %c0_55, %c0_56] : memref<3x1x32xf32, #tpu.memory_space<vmem>>, vector<1x1x32xf32>
    %72 = vector.shape_cast %71 : vector<1x1x32xf32> to vector<1x32xf32>
    %73 = vector.broadcast %72 : vector<1x32xf32> to vector<16x32xf32>
    %74 = arith.mulf %70, %73 : vector<16x32xf32>
    %c0_57 = arith.constant 0 : index
    %c0_58 = arith.constant 0 : index
    %c0_59 = arith.constant 0 : index
    %75 = vector.load %arg10[%c0_57, %c0_58, %c0_59] : memref<3x1x32xf32, #tpu.memory_space<vmem>>, vector<1x1x32xf32>
    %76 = vector.shape_cast %75 : vector<1x1x32xf32> to vector<1x32xf32>
    %77 = vector.broadcast %76 : vector<1x32xf32> to vector<16x32xf32>
    %78 = arith.addf %74, %77 : vector<16x32xf32>
    %79 = arith.addf %5, %78 : vector<16x32xf32>
    %cst_60 = arith.constant 2.000000e+01 : f32
    %80 = vector.broadcast %cst_60 : f32 to vector<16x32xf32>
    %81 = arith.cmpf ogt, %79, %80 : vector<16x32xf32>
    %cst_61 = arith.constant 2.000000e+01 : f32
    %82 = vector.broadcast %cst_61 : f32 to vector<16x32xf32>
    %83 = arith.minimumf %79, %82 : vector<16x32xf32>
    %84 = math.exp %83 : vector<16x32xf32>
    %cst_62 = arith.constant 1.000000e+00 : f32
    %85 = vector.broadcast %cst_62 : f32 to vector<16x32xf32>
    %86 = arith.addf %85, %84 : vector<16x32xf32>
    %87 = math.log %86 : vector<16x32xf32>
    %88 = arith.select %81, %79, %87 : vector<16x32xi1>, vector<16x32xf32>
    %89 = arith.truncf %88 : vector<16x32xf32> to vector<16x32xbf16>
    %cst_63 = arith.constant dense<0.000000e+00> : vector<128x32xf32>
    %90 = tpu.matmul %12, %89, %cst_63 {dimension_numbers = #tpu.dot_dimension_numbers<[1], [0], [0], [1], [0, 0, 1, 1], [], []>} : vector<128x16xbf16>, vector<16x32xbf16>, vector<128x32xf32> -> vector<128x32xf32>
    %91 = arith.truncf %90 : vector<128x32xf32> to vector<128x32xbf16>
    %c1_64 = arith.constant 1 : index
    %c0_65 = arith.constant 0 : index
    %c0_66 = arith.constant 0 : index
    %c0_67 = arith.constant 0 : index
    %92 = vector.load %arg5[%c1_64, %c0_65, %c0_66, %c0_67] : memref<3x2x32x32xbf16, #tpu.memory_space<vmem>>, vector<1x1x32x32xbf16>
    %93 = vector.shape_cast %92 : vector<1x1x32x32xbf16> to vector<32x32xbf16>
    %cst_68 = arith.constant dense<0.000000e+00> : vector<16x32xf32>
    %94 = tpu.matmul %89, %93, %cst_68 {dimension_numbers = #tpu.dot_dimension_numbers<[1], [0], [0], [1], [0, 0, 1, 1], [], []>} : vector<16x32xbf16>, vector<32x32xbf16>, vector<16x32xf32> -> vector<16x32xf32>
    %c1_69 = arith.constant 1 : index
    %c0_70 = arith.constant 0 : index
    %c0_71 = arith.constant 0 : index
    %c0_72 = arith.constant 0 : index
    %95 = vector.load %arg8[%c1_69, %c0_70, %c0_71, %c0_72] : memref<3x2x1x32xf32, #tpu.memory_space<vmem>>, vector<1x1x1x32xf32>
    %96 = vector.shape_cast %95 : vector<1x1x1x32xf32> to vector<1x32xf32>
    %97 = vector.broadcast %96 : vector<1x32xf32> to vector<16x32xf32>
    %98 = arith.addf %94, %97 : vector<16x32xf32>
    %c1_73 = arith.constant 1 : index
    %c0_74 = arith.constant 0 : index
    %c0_75 = arith.constant 0 : index
    %c0_76 = arith.constant 0 : index
    %99 = vector.load %arg6[%c1_73, %c0_74, %c0_75, %c0_76] : memref<3x2x32x32xbf16, #tpu.memory_space<vmem>>, vector<1x1x32x32xbf16>
    %100 = vector.shape_cast %99 : vector<1x1x32x32xbf16> to vector<32x32xbf16>
    %cst_77 = arith.constant dense<0.000000e+00> : vector<128x32xf32>
    %101 = tpu.matmul %91, %100, %cst_77 {dimension_numbers = #tpu.dot_dimension_numbers<[1], [0], [0], [1], [0, 0, 1, 1], [], []>} : vector<128x32xbf16>, vector<32x32xbf16>, vector<128x32xf32> -> vector<128x32xf32>
    %c1_78 = arith.constant 1 : index
    %c0_79 = arith.constant 0 : index
    %c0_80 = arith.constant 0 : index
    %c0_81 = arith.constant 0 : index
    %102 = vector.load %arg7[%c1_78, %c0_79, %c0_80, %c0_81] : memref<3x2x16x32xbf16, #tpu.memory_space<vmem>>, vector<1x1x16x32xbf16>
    %103 = vector.shape_cast %102 : vector<1x1x16x32xbf16> to vector<16x32xbf16>
    %cst_82 = arith.constant dense<0.000000e+00> : vector<128x32xf32>
    %104 = tpu.matmul %13, %103, %cst_82 {dimension_numbers = #tpu.dot_dimension_numbers<[1], [0], [0], [1], [0, 0, 1, 1], [], []>} : vector<128x16xbf16>, vector<16x32xbf16>, vector<128x32xf32> -> vector<128x32xf32>
    %105 = vector.shape_cast %98 : vector<16x32xf32> to vector<16x1x32xf32>
    %106 = arith.addf %101, %104 : vector<128x32xf32>
    %107 = vector.shape_cast %106 : vector<128x32xf32> to vector<16x8x32xf32>
    %108 = vector.broadcast %105 : vector<16x1x32xf32> to vector<16x8x32xf32>
    %109 = arith.addf %108, %107 : vector<16x8x32xf32>
    %cst_83 = arith.constant 5.000000e-01 : f32
    %110 = vector.broadcast %cst_83 : f32 to vector<16x8x32xf32>
    %111 = arith.mulf %110, %109 : vector<16x8x32xf32>
    %112 = math.tanh %111 : vector<16x8x32xf32>
    %cst_84 = arith.constant 5.000000e-01 : f32
    %113 = vector.broadcast %cst_84 : f32 to vector<16x8x32xf32>
    %114 = arith.mulf %113, %112 : vector<16x8x32xf32>
    %cst_85 = arith.constant 5.000000e-01 : f32
    %115 = vector.broadcast %cst_85 : f32 to vector<16x8x32xf32>
    %116 = arith.addf %114, %115 : vector<16x8x32xf32>
    %c1_86 = arith.constant 1 : index
    %c1_87 = arith.constant 1 : index
    %c0_88 = arith.constant 0 : index
    %c0_89 = arith.constant 0 : index
    %117 = vector.load %arg5[%c1_86, %c1_87, %c0_88, %c0_89] : memref<3x2x32x32xbf16, #tpu.memory_space<vmem>>, vector<1x1x32x32xbf16>
    %118 = vector.shape_cast %117 : vector<1x1x32x32xbf16> to vector<32x32xbf16>
    %cst_90 = arith.constant dense<0.000000e+00> : vector<16x32xf32>
    %119 = tpu.matmul %89, %118, %cst_90 {dimension_numbers = #tpu.dot_dimension_numbers<[1], [0], [0], [1], [0, 0, 1, 1], [], []>} : vector<16x32xbf16>, vector<32x32xbf16>, vector<16x32xf32> -> vector<16x32xf32>
    %c1_91 = arith.constant 1 : index
    %c1_92 = arith.constant 1 : index
    %c0_93 = arith.constant 0 : index
    %c0_94 = arith.constant 0 : index
    %120 = vector.load %arg8[%c1_91, %c1_92, %c0_93, %c0_94] : memref<3x2x1x32xf32, #tpu.memory_space<vmem>>, vector<1x1x1x32xf32>
    %121 = vector.shape_cast %120 : vector<1x1x1x32xf32> to vector<1x32xf32>
    %122 = vector.broadcast %121 : vector<1x32xf32> to vector<16x32xf32>
    %123 = arith.addf %119, %122 : vector<16x32xf32>
    %c1_95 = arith.constant 1 : index
    %c1_96 = arith.constant 1 : index
    %c0_97 = arith.constant 0 : index
    %c0_98 = arith.constant 0 : index
    %124 = vector.load %arg6[%c1_95, %c1_96, %c0_97, %c0_98] : memref<3x2x32x32xbf16, #tpu.memory_space<vmem>>, vector<1x1x32x32xbf16>
    %125 = vector.shape_cast %124 : vector<1x1x32x32xbf16> to vector<32x32xbf16>
    %cst_99 = arith.constant dense<0.000000e+00> : vector<128x32xf32>
    %126 = tpu.matmul %91, %125, %cst_99 {dimension_numbers = #tpu.dot_dimension_numbers<[1], [0], [0], [1], [0, 0, 1, 1], [], []>} : vector<128x32xbf16>, vector<32x32xbf16>, vector<128x32xf32> -> vector<128x32xf32>
    %c1_100 = arith.constant 1 : index
    %c1_101 = arith.constant 1 : index
    %c0_102 = arith.constant 0 : index
    %c0_103 = arith.constant 0 : index
    %127 = vector.load %arg7[%c1_100, %c1_101, %c0_102, %c0_103] : memref<3x2x16x32xbf16, #tpu.memory_space<vmem>>, vector<1x1x16x32xbf16>
    %128 = vector.shape_cast %127 : vector<1x1x16x32xbf16> to vector<16x32xbf16>
    %cst_104 = arith.constant dense<0.000000e+00> : vector<128x32xf32>
    %129 = tpu.matmul %13, %128, %cst_104 {dimension_numbers = #tpu.dot_dimension_numbers<[1], [0], [0], [1], [0, 0, 1, 1], [], []>} : vector<128x16xbf16>, vector<16x32xbf16>, vector<128x32xf32> -> vector<128x32xf32>
    %130 = vector.shape_cast %123 : vector<16x32xf32> to vector<16x1x32xf32>
    %131 = arith.addf %126, %129 : vector<128x32xf32>
    %132 = vector.shape_cast %131 : vector<128x32xf32> to vector<16x8x32xf32>
    %133 = vector.broadcast %130 : vector<16x1x32xf32> to vector<16x8x32xf32>
    %134 = arith.addf %133, %132 : vector<16x8x32xf32>
    %cst_105 = arith.constant 2.000000e+01 : f32
    %135 = vector.broadcast %cst_105 : f32 to vector<16x8x32xf32>
    %136 = arith.cmpf ogt, %134, %135 : vector<16x8x32xf32>
    %cst_106 = arith.constant 2.000000e+01 : f32
    %137 = vector.broadcast %cst_106 : f32 to vector<16x8x32xf32>
    %138 = arith.minimumf %134, %137 : vector<16x8x32xf32>
    %139 = math.exp %138 : vector<16x8x32xf32>
    %cst_107 = arith.constant 1.000000e+00 : f32
    %140 = vector.broadcast %cst_107 : f32 to vector<16x8x32xf32>
    %141 = arith.addf %140, %139 : vector<16x8x32xf32>
    %142 = math.log %141 : vector<16x8x32xf32>
    %143 = arith.select %136, %134, %142 : vector<16x8x32xi1>, vector<16x8x32xf32>
    %144 = arith.mulf %116, %143 : vector<16x8x32xf32>
    %cst_108 = arith.constant dense<0.000000e+00> : vector<16x32xf32>
    %145 = vector.multi_reduction <add>, %144, %cst_108 [1] : vector<16x8x32xf32> to vector<16x32xf32>
    %c1_109 = arith.constant 1 : index
    %c0_110 = arith.constant 0 : index
    %c0_111 = arith.constant 0 : index
    %146 = vector.load %arg9[%c1_109, %c0_110, %c0_111] : memref<3x1x32xf32, #tpu.memory_space<vmem>>, vector<1x1x32xf32>
    %147 = vector.shape_cast %146 : vector<1x1x32xf32> to vector<1x32xf32>
    %148 = vector.broadcast %147 : vector<1x32xf32> to vector<16x32xf32>
    %149 = arith.mulf %145, %148 : vector<16x32xf32>
    %c1_112 = arith.constant 1 : index
    %c0_113 = arith.constant 0 : index
    %c0_114 = arith.constant 0 : index
    %150 = vector.load %arg10[%c1_112, %c0_113, %c0_114] : memref<3x1x32xf32, #tpu.memory_space<vmem>>, vector<1x1x32xf32>
    %151 = vector.shape_cast %150 : vector<1x1x32xf32> to vector<1x32xf32>
    %152 = vector.broadcast %151 : vector<1x32xf32> to vector<16x32xf32>
    %153 = arith.addf %149, %152 : vector<16x32xf32>
    %154 = arith.addf %88, %153 : vector<16x32xf32>
    %cst_115 = arith.constant 2.000000e+01 : f32
    %155 = vector.broadcast %cst_115 : f32 to vector<16x32xf32>
    %156 = arith.cmpf ogt, %154, %155 : vector<16x32xf32>
    %cst_116 = arith.constant 2.000000e+01 : f32
    %157 = vector.broadcast %cst_116 : f32 to vector<16x32xf32>
    %158 = arith.minimumf %154, %157 : vector<16x32xf32>
    %159 = math.exp %158 : vector<16x32xf32>
    %cst_117 = arith.constant 1.000000e+00 : f32
    %160 = vector.broadcast %cst_117 : f32 to vector<16x32xf32>
    %161 = arith.addf %160, %159 : vector<16x32xf32>
    %162 = math.log %161 : vector<16x32xf32>
    %163 = arith.select %156, %154, %162 : vector<16x32xi1>, vector<16x32xf32>
    %164 = arith.truncf %163 : vector<16x32xf32> to vector<16x32xbf16>
    %cst_118 = arith.constant dense<0.000000e+00> : vector<128x32xf32>
    %165 = tpu.matmul %12, %164, %cst_118 {dimension_numbers = #tpu.dot_dimension_numbers<[1], [0], [0], [1], [0, 0, 1, 1], [], []>} : vector<128x16xbf16>, vector<16x32xbf16>, vector<128x32xf32> -> vector<128x32xf32>
    %166 = arith.truncf %165 : vector<128x32xf32> to vector<128x32xbf16>
    %c2 = arith.constant 2 : index
    %c0_119 = arith.constant 0 : index
    %c0_120 = arith.constant 0 : index
    %c0_121 = arith.constant 0 : index
    %167 = vector.load %arg5[%c2, %c0_119, %c0_120, %c0_121] : memref<3x2x32x32xbf16, #tpu.memory_space<vmem>>, vector<1x1x32x32xbf16>
    %168 = vector.shape_cast %167 : vector<1x1x32x32xbf16> to vector<32x32xbf16>
    %cst_122 = arith.constant dense<0.000000e+00> : vector<16x32xf32>
    %169 = tpu.matmul %164, %168, %cst_122 {dimension_numbers = #tpu.dot_dimension_numbers<[1], [0], [0], [1], [0, 0, 1, 1], [], []>} : vector<16x32xbf16>, vector<32x32xbf16>, vector<16x32xf32> -> vector<16x32xf32>
    %c2_123 = arith.constant 2 : index
    %c0_124 = arith.constant 0 : index
    %c0_125 = arith.constant 0 : index
    %c0_126 = arith.constant 0 : index
    %170 = vector.load %arg8[%c2_123, %c0_124, %c0_125, %c0_126] : memref<3x2x1x32xf32, #tpu.memory_space<vmem>>, vector<1x1x1x32xf32>
    %171 = vector.shape_cast %170 : vector<1x1x1x32xf32> to vector<1x32xf32>
    %172 = vector.broadcast %171 : vector<1x32xf32> to vector<16x32xf32>
    %173 = arith.addf %169, %172 : vector<16x32xf32>
    %c2_127 = arith.constant 2 : index
    %c0_128 = arith.constant 0 : index
    %c0_129 = arith.constant 0 : index
    %c0_130 = arith.constant 0 : index
    %174 = vector.load %arg6[%c2_127, %c0_128, %c0_129, %c0_130] : memref<3x2x32x32xbf16, #tpu.memory_space<vmem>>, vector<1x1x32x32xbf16>
    %175 = vector.shape_cast %174 : vector<1x1x32x32xbf16> to vector<32x32xbf16>
    %cst_131 = arith.constant dense<0.000000e+00> : vector<128x32xf32>
    %176 = tpu.matmul %166, %175, %cst_131 {dimension_numbers = #tpu.dot_dimension_numbers<[1], [0], [0], [1], [0, 0, 1, 1], [], []>} : vector<128x32xbf16>, vector<32x32xbf16>, vector<128x32xf32> -> vector<128x32xf32>
    %c2_132 = arith.constant 2 : index
    %c0_133 = arith.constant 0 : index
    %c0_134 = arith.constant 0 : index
    %c0_135 = arith.constant 0 : index
    %177 = vector.load %arg7[%c2_132, %c0_133, %c0_134, %c0_135] : memref<3x2x16x32xbf16, #tpu.memory_space<vmem>>, vector<1x1x16x32xbf16>
    %178 = vector.shape_cast %177 : vector<1x1x16x32xbf16> to vector<16x32xbf16>
    %cst_136 = arith.constant dense<0.000000e+00> : vector<128x32xf32>
    %179 = tpu.matmul %13, %178, %cst_136 {dimension_numbers = #tpu.dot_dimension_numbers<[1], [0], [0], [1], [0, 0, 1, 1], [], []>} : vector<128x16xbf16>, vector<16x32xbf16>, vector<128x32xf32> -> vector<128x32xf32>
    %180 = vector.shape_cast %173 : vector<16x32xf32> to vector<16x1x32xf32>
    %181 = arith.addf %176, %179 : vector<128x32xf32>
    %182 = vector.shape_cast %181 : vector<128x32xf32> to vector<16x8x32xf32>
    %183 = vector.broadcast %180 : vector<16x1x32xf32> to vector<16x8x32xf32>
    %184 = arith.addf %183, %182 : vector<16x8x32xf32>
    %cst_137 = arith.constant 5.000000e-01 : f32
    %185 = vector.broadcast %cst_137 : f32 to vector<16x8x32xf32>
    %186 = arith.mulf %185, %184 : vector<16x8x32xf32>
    %187 = math.tanh %186 : vector<16x8x32xf32>
    %cst_138 = arith.constant 5.000000e-01 : f32
    %188 = vector.broadcast %cst_138 : f32 to vector<16x8x32xf32>
    %189 = arith.mulf %188, %187 : vector<16x8x32xf32>
    %cst_139 = arith.constant 5.000000e-01 : f32
    %190 = vector.broadcast %cst_139 : f32 to vector<16x8x32xf32>
    %191 = arith.addf %189, %190 : vector<16x8x32xf32>
    %c2_140 = arith.constant 2 : index
    %c1_141 = arith.constant 1 : index
    %c0_142 = arith.constant 0 : index
    %c0_143 = arith.constant 0 : index
    %192 = vector.load %arg5[%c2_140, %c1_141, %c0_142, %c0_143] : memref<3x2x32x32xbf16, #tpu.memory_space<vmem>>, vector<1x1x32x32xbf16>
    %193 = vector.shape_cast %192 : vector<1x1x32x32xbf16> to vector<32x32xbf16>
    %cst_144 = arith.constant dense<0.000000e+00> : vector<16x32xf32>
    %194 = tpu.matmul %164, %193, %cst_144 {dimension_numbers = #tpu.dot_dimension_numbers<[1], [0], [0], [1], [0, 0, 1, 1], [], []>} : vector<16x32xbf16>, vector<32x32xbf16>, vector<16x32xf32> -> vector<16x32xf32>
    %c2_145 = arith.constant 2 : index
    %c1_146 = arith.constant 1 : index
    %c0_147 = arith.constant 0 : index
    %c0_148 = arith.constant 0 : index
    %195 = vector.load %arg8[%c2_145, %c1_146, %c0_147, %c0_148] : memref<3x2x1x32xf32, #tpu.memory_space<vmem>>, vector<1x1x1x32xf32>
    %196 = vector.shape_cast %195 : vector<1x1x1x32xf32> to vector<1x32xf32>
    %197 = vector.broadcast %196 : vector<1x32xf32> to vector<16x32xf32>
    %198 = arith.addf %194, %197 : vector<16x32xf32>
    %c2_149 = arith.constant 2 : index
    %c1_150 = arith.constant 1 : index
    %c0_151 = arith.constant 0 : index
    %c0_152 = arith.constant 0 : index
    %199 = vector.load %arg6[%c2_149, %c1_150, %c0_151, %c0_152] : memref<3x2x32x32xbf16, #tpu.memory_space<vmem>>, vector<1x1x32x32xbf16>
    %200 = vector.shape_cast %199 : vector<1x1x32x32xbf16> to vector<32x32xbf16>
    %cst_153 = arith.constant dense<0.000000e+00> : vector<128x32xf32>
    %201 = tpu.matmul %166, %200, %cst_153 {dimension_numbers = #tpu.dot_dimension_numbers<[1], [0], [0], [1], [0, 0, 1, 1], [], []>} : vector<128x32xbf16>, vector<32x32xbf16>, vector<128x32xf32> -> vector<128x32xf32>
    %c2_154 = arith.constant 2 : index
    %c1_155 = arith.constant 1 : index
    %c0_156 = arith.constant 0 : index
    %c0_157 = arith.constant 0 : index
    %202 = vector.load %arg7[%c2_154, %c1_155, %c0_156, %c0_157] : memref<3x2x16x32xbf16, #tpu.memory_space<vmem>>, vector<1x1x16x32xbf16>
    %203 = vector.shape_cast %202 : vector<1x1x16x32xbf16> to vector<16x32xbf16>
    %cst_158 = arith.constant dense<0.000000e+00> : vector<128x32xf32>
    %204 = tpu.matmul %13, %203, %cst_158 {dimension_numbers = #tpu.dot_dimension_numbers<[1], [0], [0], [1], [0, 0, 1, 1], [], []>} : vector<128x16xbf16>, vector<16x32xbf16>, vector<128x32xf32> -> vector<128x32xf32>
    %205 = vector.shape_cast %198 : vector<16x32xf32> to vector<16x1x32xf32>
    %206 = arith.addf %201, %204 : vector<128x32xf32>
    %207 = vector.shape_cast %206 : vector<128x32xf32> to vector<16x8x32xf32>
    %208 = vector.broadcast %205 : vector<16x1x32xf32> to vector<16x8x32xf32>
    %209 = arith.addf %208, %207 : vector<16x8x32xf32>
    %cst_159 = arith.constant 2.000000e+01 : f32
    %210 = vector.broadcast %cst_159 : f32 to vector<16x8x32xf32>
    %211 = arith.cmpf ogt, %209, %210 : vector<16x8x32xf32>
    %cst_160 = arith.constant 2.000000e+01 : f32
    %212 = vector.broadcast %cst_160 : f32 to vector<16x8x32xf32>
    %213 = arith.minimumf %209, %212 : vector<16x8x32xf32>
    %214 = math.exp %213 : vector<16x8x32xf32>
    %cst_161 = arith.constant 1.000000e+00 : f32
    %215 = vector.broadcast %cst_161 : f32 to vector<16x8x32xf32>
    %216 = arith.addf %215, %214 : vector<16x8x32xf32>
    %217 = math.log %216 : vector<16x8x32xf32>
    %218 = arith.select %211, %209, %217 : vector<16x8x32xi1>, vector<16x8x32xf32>
    %219 = arith.mulf %191, %218 : vector<16x8x32xf32>
    %cst_162 = arith.constant dense<0.000000e+00> : vector<16x32xf32>
    %220 = vector.multi_reduction <add>, %219, %cst_162 [1] : vector<16x8x32xf32> to vector<16x32xf32>
    %c2_163 = arith.constant 2 : index
    %c0_164 = arith.constant 0 : index
    %c0_165 = arith.constant 0 : index
    %221 = vector.load %arg9[%c2_163, %c0_164, %c0_165] : memref<3x1x32xf32, #tpu.memory_space<vmem>>, vector<1x1x32xf32>
    %222 = vector.shape_cast %221 : vector<1x1x32xf32> to vector<1x32xf32>
    %223 = vector.broadcast %222 : vector<1x32xf32> to vector<16x32xf32>
    %224 = arith.mulf %220, %223 : vector<16x32xf32>
    %c2_166 = arith.constant 2 : index
    %c0_167 = arith.constant 0 : index
    %c0_168 = arith.constant 0 : index
    %225 = vector.load %arg10[%c2_166, %c0_167, %c0_168] : memref<3x1x32xf32, #tpu.memory_space<vmem>>, vector<1x1x32xf32>
    %226 = vector.shape_cast %225 : vector<1x1x32xf32> to vector<1x32xf32>
    %227 = vector.broadcast %226 : vector<1x32xf32> to vector<16x32xf32>
    %228 = arith.addf %224, %227 : vector<16x32xf32>
    %229 = arith.addf %163, %228 : vector<16x32xf32>
    %cst_169 = arith.constant 2.000000e+01 : f32
    %230 = vector.broadcast %cst_169 : f32 to vector<16x32xf32>
    %231 = arith.cmpf ogt, %229, %230 : vector<16x32xf32>
    %cst_170 = arith.constant 2.000000e+01 : f32
    %232 = vector.broadcast %cst_170 : f32 to vector<16x32xf32>
    %233 = arith.minimumf %229, %232 : vector<16x32xf32>
    %234 = math.exp %233 : vector<16x32xf32>
    %cst_171 = arith.constant 1.000000e+00 : f32
    %235 = vector.broadcast %cst_171 : f32 to vector<16x32xf32>
    %236 = arith.addf %235, %234 : vector<16x32xf32>
    %237 = math.log %236 : vector<16x32xf32>
    %238 = arith.select %231, %229, %237 : vector<16x32xi1>, vector<16x32xf32>
    %c0_172 = arith.constant 0 : index
    %c0_173 = arith.constant 0 : index
    %239 = vector.load %arg11[%c0_172, %c0_173] : memref<2x16xbf16, #tpu.memory_space<vmem>>, vector<2x16xbf16>
    %240 = arith.truncf %238 : vector<16x32xf32> to vector<16x32xbf16>
    %cst_174 = arith.constant dense<0.000000e+00> : vector<2x32xf32>
    %241 = tpu.matmul %239, %240, %cst_174 {dimension_numbers = #tpu.dot_dimension_numbers<[1], [0], [0], [1], [0, 0, 1, 1], [], []>} : vector<2x16xbf16>, vector<16x32xbf16>, vector<2x32xf32> -> vector<2x32xf32>
    %cst_175 = arith.constant 2.000000e+01 : f32
    %242 = vector.broadcast %cst_175 : f32 to vector<2x32xf32>
    %243 = arith.cmpf ogt, %241, %242 : vector<2x32xf32>
    %cst_176 = arith.constant 2.000000e+01 : f32
    %244 = vector.broadcast %cst_176 : f32 to vector<2x32xf32>
    %245 = arith.minimumf %241, %244 : vector<2x32xf32>
    %246 = math.exp %245 : vector<2x32xf32>
    %cst_177 = arith.constant 1.000000e+00 : f32
    %247 = vector.broadcast %cst_177 : f32 to vector<2x32xf32>
    %248 = arith.addf %247, %246 : vector<2x32xf32>
    %249 = math.log %248 : vector<2x32xf32>
    %250 = arith.select %243, %241, %249 : vector<2x32xi1>, vector<2x32xf32>
    %251 = arith.truncf %250 : vector<2x32xf32> to vector<2x32xbf16>
    %c0_178 = arith.constant 0 : index
    %c0_179 = arith.constant 0 : index
    %252 = vector.load %arg12[%c0_178, %c0_179] : memref<32x64xbf16, #tpu.memory_space<vmem>>, vector<32x64xbf16>
    %cst_180 = arith.constant dense<0.000000e+00> : vector<2x64xf32>
    %253 = tpu.matmul %251, %252, %cst_180 {dimension_numbers = #tpu.dot_dimension_numbers<[1], [0], [0], [1], [0, 0, 1, 1], [], []>} : vector<2x32xbf16>, vector<32x64xbf16>, vector<2x64xf32> -> vector<2x64xf32>
    %c0_181 = arith.constant 0 : index
    %c0_182 = arith.constant 0 : index
    %254 = vector.load %arg13[%c0_181, %c0_182] : memref<1x64xf32, #tpu.memory_space<vmem>>, vector<1x64xf32>
    %255 = vector.broadcast %254 : vector<1x64xf32> to vector<2x64xf32>
    %256 = arith.addf %253, %255 : vector<2x64xf32>
    %cst_183 = arith.constant 2.000000e+01 : f32
    %257 = vector.broadcast %cst_183 : f32 to vector<2x64xf32>
    %258 = arith.cmpf ogt, %256, %257 : vector<2x64xf32>
    %cst_184 = arith.constant 2.000000e+01 : f32
    %259 = vector.broadcast %cst_184 : f32 to vector<2x64xf32>
    %260 = arith.minimumf %256, %259 : vector<2x64xf32>
    %261 = math.exp %260 : vector<2x64xf32>
    %cst_185 = arith.constant 1.000000e+00 : f32
    %262 = vector.broadcast %cst_185 : f32 to vector<2x64xf32>
    %263 = arith.addf %262, %261 : vector<2x64xf32>
    %264 = math.log %263 : vector<2x64xf32>
    %265 = arith.select %258, %256, %264 : vector<2x64xi1>, vector<2x64xf32>
    %266 = arith.truncf %265 : vector<2x64xf32> to vector<2x64xbf16>
    %c0_186 = arith.constant 0 : index
    %c0_187 = arith.constant 0 : index
    %267 = vector.load %arg14[%c0_186, %c0_187] : memref<64x1xbf16, #tpu.memory_space<vmem>>, vector<64x1xbf16>
    %cst_188 = arith.constant dense<0.000000e+00> : vector<2x1xf32>
    %268 = tpu.matmul %266, %267, %cst_188 {dimension_numbers = #tpu.dot_dimension_numbers<[1], [0], [0], [1], [0, 0, 1, 1], [], []>} : vector<2x64xbf16>, vector<64x1xbf16>, vector<2x1xf32> -> vector<2x1xf32>
    %c0_189 = arith.constant 0 : index
    %c0_190 = arith.constant 0 : index
    %269 = vector.load %arg15[%c0_189, %c0_190] : memref<1x1xf32, #tpu.memory_space<vmem>>, vector<1x1xf32>
    %270 = vector.broadcast %269 : vector<1x1xf32> to vector<2x1xf32>
    %271 = arith.addf %268, %270 : vector<2x1xf32>
    %c0_191 = arith.constant 0 : index
    %c0_192 = arith.constant 0 : index
    %272 = vector.load %arg16[%c0_191, %c0_192] : memref<2x1xf32, #tpu.memory_space<vmem>>, vector<2x1xf32>
    tpu.vector_store %arg16[%c0_191, %c0_192], %271 {strides = array<i32>} : memref<2x1xf32, #tpu.memory_space<vmem>>, vector<2x1xf32>,
    return
  }
}

</mosaic_0001>

<bundles_post_ra>
// kernel: tpu_custom_call.1
= control target key start
LH: loop header
LB: loop body
LE: loop exit
PB: predicated region body
PF: predicated region fallthrough
CT: control target
= control target key end

     0   :  { %s5720_s0 = inlined_call_operand.hbm [shape: bf16[16,24], index: 0, kind: input, shape index: {}]   ;;  %s5721_s1 = inlined_call_operand.vmem [shape: s32[128,1], index: 1, kind: input, shape index: {}]   ;;  %s5722_s2 = inlined_call_operand.vmem [shape: bf16[128,16], index: 2, kind: input, shape index: {}]   ;;  %s5723_s3 = inlined_call_operand.hbm [shape: bf16[24,32], index: 3, kind: input, shape index: {}]   ;;  %s5724_s4 = inlined_call_operand.vmem [shape: f32[1,32], index: 4, kind: input, shape index: {}]   ;;  %s5725_s5 = inlined_call_operand.vmem [shape: bf16[3,2,32,32], index: 5, kind: input, shape index: {}]   ;;  %s5726_s6 = inlined_call_operand.vmem [shape: bf16[3,2,32,32], index: 6, kind: input, shape index: {}]   ;;  %s5727_s7 = inlined_call_operand.vmem [shape: bf16[3,2,16,32], index: 7, kind: input, shape index: {}]   ;;  %s5728_s8 = inlined_call_operand.hbm [shape: f32[3,2,1,32], index: 8, kind: input, shape index: {}]   ;;  %s5729_s9 = inlined_call_operand.hbm [shape: f32[3,1,32], index: 9, kind: input, shape index: {}]   ;;  %s5730_s10 = inlined_call_operand.vmem [shape: f32[3,1,32], index: 10, kind: input, shape index: {}]   ;;  %s5731_s11 = inlined_call_operand.hbm [shape: bf16[2,16], index: 11, kind: input, shape index: {}]   ;;  %s5732_s12 = inlined_call_operand.hbm [shape: bf16[32,64], index: 12, kind: input, shape index: {}]   ;;  %s5733_s13 = inlined_call_operand.vmem [shape: f32[1,64], index: 13, kind: input, shape index: {}]   ;;  %s5734_s14 = inlined_call_operand.vmem [shape: bf16[64,1], index: 14, kind: input, shape index: {}]   ;;  %s5735_s15 = inlined_call_operand.<no memory space> [shape: f32[1,1], index: 15, kind: input, shape index: {}]   ;;  %s5736_s16 = inlined_call_operand.vmem [shape: f32[2,1], index: 16, kind: output, shape index: {}]  }
   0x1   :  { %5739 = sst [smem:[#allocation17_spill]] %s5720_s0  ;;  %v21_v0 = vstv %s5735_s15 }
   0x2   :  { %22 = vst [vmem:[#allocation2] sm:$0x1] %v21_v0 }
   0x3   :  { %23 = vsyncpa [#allocation4], 0 }
   0x4   :  { %24 = vsyncpa [#allocation6], 0 }
   0x5   :  { %25 = vsyncpa [#allocation9], 0 }
   0x6   :  { %26 = vsyncpa [#allocation12], 0  ;;  %s48_s25 = sshll.u32 %s5723_s3, 4  ;;  %s4381_s26 = smov [#allocation5]   ;;  %s49_s25 = int_to_ptr.hbm [resolvable:$true] %s48_s25 }
   0x7   :  { %s50_s27 = sshll.u32 %s4381_s26, 4  ;;  %s5737_s28 = smov 64   ;;  %s51_s27 = int_to_ptr.vmem [resolvable:$true] %s50_s27 }
   0x8   :  { %s4383_s29 = smov 4   ;;  %s82_s0 = sshll.u32 %s5729_s9, 4  ;;  %s83_s0 = int_to_ptr.hbm [resolvable:$true] %s82_s0 }
   0x9   :  { %56 = dma.hbm_to_vmem [thread:$0]  %s49_s25, 192, %s51_s27, [#allocation6], %s5737_s28, %s5737_s28, %s4383_s29  }
   0xa   :  { %s4384_s17 = smov [#allocation8]   ;;  %s5740_s3 = sld [smem:[#allocation17_spill]] }
   0xb   :  { %s84_s18 = sshll.u32 %s4384_s17, 4  ;;  %s4385_s22 = smov 16   ;;  %s85_s18 = int_to_ptr.vmem [resolvable:$true] %s84_s18 }
   0xc   :  { %s4386_s23 = smov 1   ;;  %s69_s25 = sshll.u32 %s5728_s8, 4  ;;  %s70_s25 = int_to_ptr.hbm [resolvable:$true] %s69_s25 }
   0xd   :  { %90 = dma.hbm_to_vmem [thread:$0]  %s83_s0, 48, %s85_s18, [#allocation9], %s4385_s22, %s4385_s22, %s4386_s23  }
   0xe   :  { %s4387_s27 = smov [#allocation3]   ;;  %s5741_s9 = smov 64  }
   0xf   :  { %s33_s28 = sshll.u32 %s4387_s27, 4  ;;  %s4388_s15 = smov [#allocation7]   ;;  %s34_s28 = int_to_ptr.vmem [resolvable:$true] %s33_s28 }
  0x10   :  { %s31_s21 = sshll.u32 %s5740_s3, 4  ;;  %s71_s30 = sshll.u32 %s4388_s15, 4  ;;  %s32_s21 = int_to_ptr.hbm [resolvable:$true] %s31_s21  ;;  %s72_s30 = int_to_ptr.vmem [resolvable:$true] %s71_s30 }
  0x11   :  { %39 = dma.hbm_to_vmem [thread:$0]  %s32_s21, 128, %s34_s28, [#allocation4], %s5741_s9, %s5741_s9, %s4383_s29  }
  0x12   :  { %s98_s20 = sshll.u32 %s5731_s11, 4  ;;  %s108_s8 = sshll.u32 %s5732_s12, 4  ;;  %s99_s20 = int_to_ptr.hbm [resolvable:$true] %s98_s20  ;;  %s109_s8 = int_to_ptr.hbm [resolvable:$true] %s108_s8 }
  0x13   :  { %77 = dma.hbm_to_vmem [thread:$0]  %s70_s25, 96, %s72_s30, [#allocation6], %s4385_s22, %s4385_s22, %s4386_s23  }
  0x14   :  { %s4389_s3 = smov [#allocation10]   ;;  %s4390_s26 = smov [#allocation11]  }
  0x15   :  { %s100_s24 = sshll.u32 %s4389_s3, 4  ;;  %s110_s28 = sshll.u32 %s4390_s26, 4  ;;  %s101_s24 = int_to_ptr.vmem [resolvable:$true] %s100_s24  ;;  %s111_s28 = int_to_ptr.vmem [resolvable:$true] %s110_s28 }
  0x16   :  { %103 = dma.hbm_to_vmem [thread:$0]  %s99_s20, 16, %s101_s24, [#allocation9]  }
  0x17   :  { %116 = dma.hbm_to_vmem [thread:$0]  %s109_s8, 256, %s111_s28, [#allocation12], %s5741_s9, %s5741_s9, %s4383_s29  }
  0x18   :  { %4373 = dma.done.wait [#allocation4], 128  }
  0x19   :  { %4374 = vsyncadd [#allocation4], 4294967168 }
  0x1a   :  { %4375 = dma.done.wait [#allocation6], 288  }
  0x1b   :  { %4376 = vsyncadd [#allocation6], 4294967008 }
  0x1c   :  { %4377 = dma.done.wait [#allocation9], 64  }
  0x1d   :  { %4378 = vsyncadd [#allocation9], 4294967232 }
  0x1e   :  { %4379 = dma.done.wait [#allocation12], 256  }
  0x1f   :  { %4380 = vsyncadd [#allocation12], 4294967040  ;;  %v4391_v1 = vmov 0   ;;  %v195_v2 = vld [vmem:[%s5721_s1 + $0x10] sm:$0xff]  ;;  %v193_v3 = vld [vmem:[%s5721_s1] sm:$0xff]  ;;  %vm175_vm0 = vcmask 1043456   ;;  %v209_v26 = vlaneseq }
  0x20   :  { %3876 = vset.pattern.permute.xlu1 %v4391_v1  ;;  %3875 = vset.pattern.permute.xlu0 %v4391_v1  ;;  %v152_v4 = vld [vmem:[#allocation5 + $0x8] sm:$0xf]  ;;  %v197_v7 = vld [vmem:[%s5721_s1 + $0x20] sm:$0xff]  ;;  %v196_v8 = vld [vmem:[%s5721_s1 + $0x18] sm:$0xff]  ;;  %vm171_vm1 = vcmask 195584   ;;  %v4392_v29 = vmov 0.0  }
  0x21   :  { %3877 = vset.pattern.permute.xlu2 %v4391_v1  ;;  %218 = vperm.xlu1 %3876, %v195_v2   ;;  %v167_v5 = vunpack.c.l.b16 %v152_v4  ;;  %v194_v9 = vld [vmem:[%s5721_s1 + $0x8] sm:$0xff]  ;;  %v200_v14 = vld [vmem:[%s5721_s1 + $0x38] sm:$0xff]  ;;  %v199_v15 = vld [vmem:[%s5721_s1 + $0x30] sm:$0xff]  ;;  %v4560_v27 = vand.u32 127, %v209_v26  ;;  %vm332_vm14 = vcmask 130048  }
  0x22   :  { %212 = vperm.xlu0 %3875, %v193_v3   ;;  %224 = vperm.xlu2 %3877, %v197_v7   ;;  %v3817_v11 = vld [vmem:[#allocation5] sm:$0xff]  ;;  %v3816_v12 = vld [vmem:[#allocation3] sm:$0xff]  ;;  %v204_v19 = vld [vmem:[%s5721_s1 + $0x58] sm:$0xff] }
  0x23   :  { %v169_v6 = vpack.c.b16 %v167_v5, %v167_v5  ;;  %v198_v13 = vld [vmem:[%s5721_s1 + $0x28] sm:$0xff]  ;;  %v201_v16 = vld [vmem:[%s5721_s1 + $0x40] sm:$0xff]  ;;  %v203_v17 = vld [vmem:[%s5721_s1 + $0x50] sm:$0xff] }
  0x24   :  { %v202_v18 = vld [vmem:[%s5721_s1 + $0x48] sm:$0xff]  ;;  %v208_v20 = vld [vmem:[%s5721_s1 + $0x78] sm:$0xff]  ;;  %v207_v21 = vld [vmem:[%s5721_s1 + $0x70] sm:$0xff] }
  0x25   :  { %v177_v10 = vsel %vm175_vm0, %v169_v6, 0  ;;  %v205_v22 = vld [vmem:[%s5721_s1 + $0x60] sm:$0xff]  ;;  %v206_v23 = vld [vmem:[%s5721_s1 + $0x68] sm:$0xff]  ;;  %v3832_v5 = vld [vmem:[%s5725_s5 + $0x18] sm:$0xff] }
  0x26   :  { %185 = vmatpush.bf16.msra.mxu2 %v177_v10  ;;  %v3878_v52 = vld [vmem:[%s5724_s4] ss:$0 sm:$0xff]  ;;  %v3827_v58 = vld [vmem:[%s5725_s5 + $0x8] sm:$0xff]  ;;  %v3831_v6 = vld [vmem:[%s5725_s5 + $0x10] sm:$0xff] }
  0x27   :  { %v3826_v4 = vld [vmem:[%s5725_s5] sm:$0xff] }
  0x29   :  { %221 = vperm.xlu1 %3876, %v196_v8  }
  0x2a   :  { %215 = vperm.xlu0 %3875, %v194_v9   ;;  %186 = vmatpush.bf16.msra.mxu2 %v3817_v11 }
  0x2b   :  { %227 = vperm.xlu2 %3877, %v198_v13   ;;  %v3835_v13 = vld [vmem:[%s5727_s7 + $0x8] sm:$0xff] }
  0x2d   :  { %3442 = vmatmul.msk.bf16.vlgmr.msra.gmra.mxu2 %vm171_vm1, %v3816_v12  ;;  %vm434_vm1 = vcmask 261120  }
  0x31   :  { %233 = vperm.xlu1 %3876, %v200_v14   ;;  %v3818_v14 = vld [vmem:[%s5722_s2] sm:$0xff] }
  0x32   :  { %230 = vperm.xlu0 %3875, %v199_v15   ;;  %v3830_v15 = vld [vmem:[%s5727_s7] sm:$0xff] }
  0x33   :  { %236 = vperm.xlu2 %3877, %v201_v16   ;;  %v3829_v16 = vld [vmem:[%s5726_s6 + $0x8] sm:$0xff]  ;;  %535 = vmatpush.bf16.msra.mxu3 %v3830_v15 }
  0x34   :  { %635 = vmatpush.bf16.msra.mxu0 %v3829_v16 }
  0x36   :  { %3512 = vmatmul.msk.bf16.vlgmr.msra.gmra.mxu3 %vm332_vm14, %v3818_v14 }
  0x39   :  { %242 = vperm.xlu1 %3876, %v203_v17   ;;  %v3834_v17 = vld [vmem:[%s5726_s6 + $0x18] sm:$0xff] }
  0x3a   :  { %239 = vperm.xlu0 %3875, %v202_v18   ;;  %v3828_v18 = vld [vmem:[%s5726_s6] sm:$0xff] }
  0x3b   :  { %245 = vperm.xlu2 %3877, %v204_v19   ;;  %v3833_v19 = vld [vmem:[%s5726_s6 + $0x10] sm:$0xff]  ;;  %636 = vmatpush.bf16.msra.mxu0 %v3828_v18 }
  0x41   :  { %257 = vperm.xlu1 %3876, %v208_v20   ;;  %v3819_v20 = vld [vmem:[%s5722_s2 + $0x8] sm:$0xff] }
  0x42   :  { %254 = vperm.xlu0 %3875, %v207_v21   ;;  %v3820_v21 = vld [vmem:[%s5722_s2 + $0x10] sm:$0xff] }
  0x43   :  { %248 = vperm.xlu2 %3877, %v205_v22  }
  0x46   :  { %3513 = vmatmul.msk.bf16.gmra.mxu3 %vm332_vm14, %v3819_v20 }
  0x4a   :  { %251 = vperm.xlu0 %3875, %v206_v23  }
  0x56   :  { %3514 = vmatmul.msk.bf16.gmra.mxu3 %vm332_vm14, %v3820_v21 }
  0x7c   :  { %v4556_v24 = vpop.permute.xlu2 %224 }
  0x85   :  { %v4558_v25 = vpop.permute.xlu2 %227 }
  0x8d   :  { %v237_v28 = vpop.permute.xlu2 %236 }
  0x8e   :  { %vm267_vm2 = vcmp.eq.s32.totalorder %v237_v28, %v4560_v27 }
  0x8f   :  { %v3451_v30 = vsel %vm267_vm2, 1.0, %v4392_v29  ;;  %vm263_vm2 = vcmp.eq.s32.totalorder %v4556_v24, %v4560_v27 }
  0x90   :  { %v3447_v10 = vsel %vm263_vm2, 1.0, %v4392_v29  ;;  %vm1339_vm2 = vcmask 1045509  }
  0x93   :  { %v4564_v31 = vpop.permute.xlu1 %218 }
  0x94   :  { %v213_v32 = vpop.permute.xlu0 %212  ;;  %vm261_vm15 = vcmp.eq.s32.totalorder %v4564_v31, %v4560_v27 }
  0x95   :  { %v246_v33 = vpop.permute.xlu2 %245  ;;  %vm259_vm9 = vcmp.eq.s32.totalorder %v213_v32, %v4560_v27  ;;  %v3445_v7 = vsel %vm261_vm15, 1.0, %v4392_v29  ;;  %vm1336_vm15 = vcmask 1044484  }
  0x96   :  { %vm270_vm3 = vcmp.eq.s32.totalorder %v246_v33, %v4560_v27  ;;  %v3443_v57 = vsel %vm259_vm9, 1.0, %v4392_v29  ;;  %v3823_v33 = vld [vmem:[%s5722_s2 + $0x28] sm:$0xff] }
  0x97   :  { %v3454_v34 = vsel %vm270_vm3, 1.0, %v4392_v29  ;;  %vm264_vm3 = vcmp.eq.s32.totalorder %v4558_v25, %v4560_v27  ;;  %v3821_v25 = vld [vmem:[%s5722_s2 + $0x18] sm:$0xff] }
  0x98   :  { %v3448_v11 = vsel %vm264_vm3, 1.0, %v4392_v29  ;;  %3515 = vmatmul.msk.bf16.gmra.mxu3 %vm332_vm14, %v3821_v25  ;;  %vm1342_vm3 = vcmask 1046534  }
  0x99   :  { %v4641_v12 = vpack.c.bf16 %v3448_v11, %v3447_v10 }
  0x9b   :  { %v222_v35 = vpop.permute.xlu1 %221 }
  0x9c   :  { %v216_v36 = vpop.permute.xlu0 %215  ;;  %vm262_vm0 = vcmp.eq.s32.totalorder %v222_v35, %v4560_v27 }
  0x9d   :  { %v249_v37 = vpop.permute.xlu2 %248  ;;  %vm260_vm10 = vcmp.eq.s32.totalorder %v216_v36, %v4560_v27  ;;  %v3446_v8 = vsel %vm262_vm0, 1.0, %v4392_v29 }
  0x9e   :  { %vm271_vm4 = vcmp.eq.s32.totalorder %v249_v37, %v4560_v27  ;;  %v3444_v59 = vsel %vm260_vm10, 1.0, %v4392_v29  ;;  %v4630_v9 = vpack.c.bf16 %v3446_v8, %v3445_v7  ;;  %vm1330_vm10 = vcmask 1042434  }
  0x9f   :  { %v3455_v38 = vsel %vm271_vm4, 1.0, %v4392_v29  ;;  %v4606_v1 = vpack.c.bf16 %v3444_v59, %v3443_v57 }
  0xa3   :  { %v234_v39 = vpop.permute.xlu1 %233 }
  0xa4   :  { %v231_v40 = vpop.permute.xlu0 %230  ;;  %vm266_vm5 = vcmp.eq.s32.totalorder %v234_v39, %v4560_v27  ;;  %v3824_v39 = vld [vmem:[%s5722_s2 + $0x30] sm:$0xff] }
  0xa5   :  { %vm265_vm6 = vcmp.eq.s32.totalorder %v231_v40, %v4560_v27  ;;  %v3450_v41 = vsel %vm266_vm5, 1.0, %v4392_v29 }
  0xa6   :  { %v3449_v42 = vsel %vm265_vm6, 1.0, %v4392_v29 }
  0xa7   :  { %v4574_v43 = vpack.c.bf16 %v3450_v41, %v3449_v42 }
  0xab   :  { %v243_v44 = vpop.permute.xlu1 %242 }
  0xac   :  { %v240_v45 = vpop.permute.xlu0 %239  ;;  %vm269_vm7 = vcmp.eq.s32.totalorder %v243_v44, %v4560_v27 }
  0xad   :  { %vm268_vm8 = vcmp.eq.s32.totalorder %v240_v45, %v4560_v27  ;;  %v3453_v46 = vsel %vm269_vm7, 1.0, %v4392_v29  ;;  %v3825_v45 = vld [vmem:[%s5722_s2 + $0x38] sm:$0xff] }
  0xae   :  { %v3452_v47 = vsel %vm268_vm8, 1.0, %v4392_v29  ;;  %v4582_v49 = vpack.c.bf16 %v3454_v34, %v3453_v46  ;;  %vm1327_vm8 = vcmask 1041409  }
  0xaf   :  { %v4580_v48 = vpack.c.bf16 %v3452_v47, %v3451_v30 }
  0xb0   :  { %v188_v50 = vpop.f32.mrf.mxu2 }
  0xb1   :  { %v4591_v55 = vadd.f32 %v3878_v52, %v188_v50 }
  0xb3   :  { %v258_v53 = vpop.permute.xlu1 %257 }
  0xb4   :  { %v255_v51 = vpop.permute.xlu0 %254  ;;  %vm274_vm11 = vcmp.eq.s32.totalorder %v258_v53, %v4560_v27 }
  0xb5   :  { %vm273_vm12 = vcmp.eq.s32.totalorder %v255_v51, %v4560_v27  ;;  %v3458_v60 = vsel %vm274_vm11, 1.0, %v4392_v29 }
  0xb6   :  { %v3457_v61 = vsel %vm273_vm12, 1.0, %v4392_v29  ;;  %vm1333_vm12 = vcmask 1043459  }
  0xb7   :  { %v4608_v2 = vpack.c.bf16 %v3458_v60, %v3457_v61 }
  0xb8   :  { %v190_v54 = vpop.f32.mrf.mxu2 }
  0xb9   :  { %v4593_v56 = vadd.f32 %v3878_v52, %v190_v54  ;;  %v537_v60 = vpop.f32.mrf.mxu3 }
  0xbb   :  { %v331_v62 = vpack.c.bf16 %v4593_v56, %v4591_v55 }
  0xbc   :  { %v252_v63 = vpop.permute.xlu0 %251 }
  0xbd   :  { %vm272_vm13 = vcmp.eq.s32.totalorder %v252_v63, %v4560_v27  ;;  %364 = vmatpush.bf16.msra.mxu1 %v331_v62  ;;  %3862 = vmatpush.bf16.msrb.mxu2 %v331_v62 }
  0xbe   :  { %v3456_v0 = vsel %vm272_vm13, 1.0, %v4392_v29  ;;  %v3822_v29 = vld [vmem:[%s5722_s2 + $0x20] sm:$0xff] }
  0xbf   :  { %v4610_v3 = vpack.c.bf16 %v3456_v0, %v3455_v38  ;;  %3516 = vmatmul.msk.bf16.gmra.mxu3 %vm332_vm14, %v3822_v29 }
  0xc0   :  { %3459 = vmatmul.msk.bf16.vlgmr.msra.gmra.mxu1 %vm332_vm14, %v4606_v1  ;;  %3466 = vmatmul.msk.bf16.vlgmr.msrb.gmra.mxu2 %vm332_vm14, %v4608_v2 }
  0xc1   :  { %444 = vmatpush.bf16.msra.mxu2 %v3827_v58  ;;  %923 = vmatpush.bf16.msrb.mxu1 %v3834_v17 }
  0xc5   :  { %445 = vmatpush.bf16.msra.mxu2 %v3826_v4  ;;  %924 = vmatpush.bf16.msrb.mxu1 %v3833_v19 }
  0xc9   :  { %818 = vmatpush.bf16.msrb.mxu2 %v3832_v5  ;;  %v4732_v5 = vld [vmem:[#allocation7] ss:$0 sm:$0xff] }
  0xcd   :  { %819 = vmatpush.bf16.msrb.mxu2 %v3831_v6  ;;  %v4734_v6 = vld [vmem:[#allocation7 + $0x1] ss:$0 sm:$0xff] }
  0xcf   :  { %3517 = vmatmul.msk.bf16.gmra.mxu3 %vm332_vm14, %v3823_v33 }
  0xd0   :  { %3460 = vmatmul.msk.bf16.gmra.mxu1 %vm332_vm14, %v4630_v9  ;;  %3475 = vmatmul.msk.bf16.vlgmr.msra.gmra.mxu2 %vm434_vm1, %v331_v62 }
  0xd1   :  { %847 = vmatpush.bf16.msra.mxu2 %v3835_v13 }
  0xdf   :  { %3518 = vmatmul.msk.bf16.gmra.mxu3 %vm332_vm14, %v3824_v39 }
  0xe0   :  { %3461 = vmatmul.msk.bf16.gmra.mxu1 %vm332_vm14, %v4641_v12  ;;  %3548 = vmatmul.msk.bf16.vlgmr.msrb.gmra.mxu2 %vm434_vm1, %v331_v62  ;;  %v539_v62 = vpop.f32.mrf.mxu3 }
  0xe8   :  { %v542_v4 = vpop.f32.mrf.mxu3 }
  0xef   :  { %3519 = vmatmul.msk.bf16.gmra.mxu3 %vm332_vm14, %v3825_v45 }
  0xf0   :  { %3462 = vmatmul.msk.bf16.gmra.mxu1 %vm332_vm14, %v4574_v43  ;;  %3559 = vmatmul.msk.bf16.vlgmr.msra.gmra.mxu2 %vm332_vm14, %v3818_v14  ;;  %v544_v11 = vpop.f32.mrf.mxu3 }
 0x100   :  { %3463 = vmatmul.msk.bf16.gmra.mxu1 %vm332_vm14, %v4580_v48  ;;  %3560 = vmatmul.msk.bf16.gmra.mxu2 %vm332_vm14, %v3819_v20 }
 0x110   :  { %3464 = vmatmul.msk.bf16.gmra.mxu1 %vm332_vm14, %v4582_v49  ;;  %3561 = vmatmul.msk.bf16.gmra.mxu2 %vm332_vm14, %v3820_v21 }
 0x120   :  { %3465 = vmatmul.msk.bf16.gmra.mxu1 %vm332_vm14, %v4610_v3  ;;  %3562 = vmatmul.msk.bf16.gmra.mxu2 %vm332_vm14, %v3821_v25 }
 0x130   :  { %3563 = vmatmul.msk.bf16.gmra.mxu2 %vm332_vm14, %v3822_v29 }
 0x13d   :  { %v366_v22 = vpop.f32.mrf.mxu1 }
 0x140   :  { %3564 = vmatmul.msk.bf16.gmra.mxu2 %vm332_vm14, %v3823_v33 }
 0x143   :  { %v401_v34 = vpop.f32.mrf.mxu2 }
 0x145   :  { %v368_v23 = vpop.f32.mrf.mxu1 }
 0x146   :  { %v406_v24 = vpack.c.bf16 %v368_v23, %v366_v22 }
 0x148   :  { %3528 = vmatmul.msk.bf16.vlgmr.msra.gmra.mxu0 %vm434_vm1, %v406_v24  ;;  %3575 = vmatmul.msk.bf16.vlgmr.msrb.gmra.mxu1 %vm434_vm1, %v406_v24 }
 0x14b   :  { %v403_v37 = vpop.f32.mrf.mxu2 }
 0x14c   :  { %v413_v63 = vpack.c.bf16 %v403_v37, %v401_v34 }
 0x14d   :  { %v371_v26 = vpop.f32.mrf.mxu1 }
 0x150   :  { %3565 = vmatmul.msk.bf16.gmra.mxu2 %vm332_vm14, %v3824_v39 }
 0x153   :  { %v447_v41 = vpop.f32.mrf.mxu2 }
 0x154   :  { %v4737_v7 = vadd.f32 %v4732_v5, %v447_v41 }
 0x155   :  { %v373_v27 = vpop.f32.mrf.mxu1 }
 0x156   :  { %v407_v28 = vpack.c.bf16 %v373_v27, %v371_v26  ;;  %v678_v16 = vperm.slane %v4737_v7, 0  ;;  %v579_v24 = vrot.slane %v4737_v7, 1 }
 0x158   :  { %3529 = vmatmul.msk.bf16.gmra.mxu0 %vm434_vm1, %v407_v28  ;;  %3576 = vmatmul.msk.bf16.gmra.mxu1 %vm434_vm1, %v407_v28  ;;  %v679_v33 = vperm.slane %v579_v24, 0 }
 0x15b   :  { %v4720_v46 = vpop.f32.mrf.mxu2 }
 0x15d   :  { %v376_v30 = vpop.f32.mrf.mxu1 }
 0x160   :  { %3566 = vmatmul.msk.bf16.gmra.mxu2 %vm332_vm14, %v3825_v45 }
 0x163   :  { %v821_v50 = vpop.f32.mrf.mxu2 }
 0x164   :  { %v4740_v8 = vadd.f32 %v4734_v6, %v821_v50 }
 0x165   :  { %v378_v31 = vpop.f32.mrf.mxu1 }
 0x166   :  { %v408_v32 = vpack.c.bf16 %v378_v31, %v376_v30  ;;  %v966_v18 = vperm.slane %v4740_v8, 0  ;;  %v891_v21 = vrot.slane %v4740_v8, 1 }
 0x168   :  { %3530 = vmatmul.msk.bf16.gmra.mxu0 %vm434_vm1, %v408_v32  ;;  %3577 = vmatmul.msk.bf16.gmra.mxu1 %vm434_vm1, %v408_v32  ;;  %v967_v27 = vperm.slane %v891_v21, 0  ;;  %v4750_v32 = vpop.f32.mrf.mxu3 }
 0x16b   :  { %v4726_v54 = vpop.f32.mrf.mxu2 }
 0x16d   :  { %v381_v35 = vpop.f32.mrf.mxu1 }
 0x173   :  { %v849_v59 = vpop.f32.mrf.mxu2 }
 0x175   :  { %v383_v36 = vpop.f32.mrf.mxu1 }
 0x176   :  { %v409_v38 = vpack.c.bf16 %v383_v36, %v381_v35  ;;  %v580_v35 = vrot.slane %v4737_v7, 2  ;;  %v892_v36 = vrot.slane %v4740_v8, 2 }
 0x178   :  { %3531 = vmatmul.msk.bf16.gmra.mxu0 %vm434_vm1, %v409_v38  ;;  %3578 = vmatmul.msk.bf16.gmra.mxu1 %vm434_vm1, %v409_v38 }
 0x17b   :  { %v851_v61 = vpop.f32.mrf.mxu2 }
 0x17d   :  { %v386_v40 = vpop.f32.mrf.mxu1 }
 0x183   :  { %v854_v0 = vpop.f32.mrf.mxu2 }
 0x185   :  { %v388_v42 = vpop.f32.mrf.mxu1 }
 0x186   :  { %v410_v44 = vpack.c.bf16 %v388_v42, %v386_v40 }
 0x188   :  { %3532 = vmatmul.msk.bf16.gmra.mxu0 %vm434_vm1, %v410_v44  ;;  %3579 = vmatmul.msk.bf16.gmra.mxu1 %vm434_vm1, %v410_v44  ;;  %v680_v44 = vperm.slane %v580_v35, 0  ;;  %v894_v35 = vrot.slane %v4740_v8, 4 }
 0x18b   :  { %v4742_v10 = vpop.f32.mrf.mxu2 }
 0x18d   :  { %v391_v47 = vpop.f32.mrf.mxu1 }
 0x193   :  { %v4748_v31 = vpop.f32.mrf.mxu2 }
 0x195   :  { %v393_v51 = vpop.f32.mrf.mxu1 }
 0x196   :  { %v411_v52 = vpack.c.bf16 %v393_v51, %v391_v47  ;;  %v968_v47 = vperm.slane %v892_v36, 0 }
 0x198   :  { %3533 = vmatmul.msk.bf16.gmra.mxu0 %vm434_vm1, %v411_v52  ;;  %3580 = vmatmul.msk.bf16.gmra.mxu1 %vm434_vm1, %v411_v52 }
 0x19d   :  { %v396_v53 = vpop.f32.mrf.mxu1 }
 0x1a5   :  { %v398_v57 = vpop.f32.mrf.mxu1 }
 0x1a6   :  { %v412_v58 = vpack.c.bf16 %v398_v57, %v396_v53 }
 0x1a8   :  { %3534 = vmatmul.msk.bf16.gmra.mxu0 %vm434_vm1, %v412_v58  ;;  %3581 = vmatmul.msk.bf16.gmra.mxu1 %vm434_vm1, %v412_v58 }
 0x1b8   :  { %3535 = vmatmul.msk.bf16.gmra.mxu0 %vm434_vm1, %v413_v63  ;;  %3582 = vmatmul.msk.bf16.gmra.mxu1 %vm434_vm1, %v413_v63 }
 0x1c5   :  { %v638_v13 = vpop.f32.mrf.mxu0  ;;  %v926_v14 = vpop.f32.mrf.mxu1 }
 0x1c6   :  { %v639_v15 = vadd.f32 %v638_v13, %v537_v60  ;;  %v927_v17 = vadd.f32 %v926_v14, %v849_v59  ;;  %v4759_v59 = vpop.f32.mrf.mxu2  ;;  %v4761_v60 = vpop.f32.mrf.mxu3 }
 0x1c8   :  { %v710_v19 = vadd.f32 %v678_v16, %v639_v15  ;;  %v998_v20 = vadd.f32 %v966_v18, %v927_v17 }
 0x1ca   :  { %v1030_v22 = vmin.f32 %v998_v20, 20.0  ;;  %v726_v28 = vmul.f32 0.5, %v710_v19  ;;  %vm1014_vm4 = vcmp.gt.f32.partialorder %v998_v20, 20.0 }
 0x1cc   :  { %v1046_v23 = vmul.f32 1.442695, %v1030_v22 }
 0x1cd   :  { %v640_v25 = vpop.f32.mrf.mxu0  ;;  %v928_v26 = vpop.f32.mrf.mxu1 }
 0x1ce   :  { %3893 = vpow2.f32 %v1046_v23  ;;  %v641_v29 = vadd.f32 %v640_v25, %v539_v62  ;;  %v929_v30 = vadd.f32 %v928_v26, %v851_v61  ;;  %v581_v61 = vrot.slane %v4737_v7, 3 }
 0x1cf   :  { %3895 = vtanh.f32 %v726_v28  ;;  %v893_v62 = vrot.slane %v4740_v8, 3 }
 0x1d0   :  { %v4752_v34 = vadd.f32 %v967_v27, %v929_v30  ;;  %v711_v37 = vadd.f32 %v679_v33, %v641_v29  ;;  %v681_v18 = vperm.slane %v581_v61, 0  ;;  %v582_v33 = vrot.slane %v4737_v7, 4 }
 0x1d1   :  { %v969_v21 = vperm.slane %v893_v62, 0 }
 0x1d2   :  { %v1031_v38 = vmin.f32 %v4752_v34, 20.0  ;;  %v727_v50 = vmul.f32 0.5, %v711_v37  ;;  %v4772_v37 = vpop.f32.mrf.mxu2  ;;  %vm1015_vm5 = vcmp.gt.f32.partialorder %v4752_v34, 20.0 }
 0x1d4   :  { %v3894_v39 = vpop.eup %3893  ;;  %v1048_v40 = vmul.f32 1.442695, %v1031_v38 }
 0x1d5   :  { %v1078_v41 = vadd.f32 1.0, %v3894_v39  ;;  %v643_v42 = vpop.f32.mrf.mxu0  ;;  %v931_v45 = vpop.f32.mrf.mxu1 }
 0x1d6   :  { %3897 = vpow2.f32 %v1048_v40  ;;  %v644_v51 = vadd.f32 %v643_v42, %v542_v4  ;;  %v932_v52 = vadd.f32 %v931_v45, %v854_v0  ;;  %v3896_v53 = vpop.eup %3895 }
 0x1d7   :  { %3899 = vlog2.f32 %v1078_v41  ;;  %v758_v13 = vmul.f32 0.5, %v3896_v53 }
 0x1d8   :  { %v712_v57 = vadd.f32 %v680_v44, %v644_v51  ;;  %v4757_v58 = vadd.f32 %v968_v47, %v932_v52  ;;  %3901 = vtanh.f32 %v727_v50  ;;  %v682_v47 = vperm.slane %v582_v33, 0 }
 0x1d9   :  { %v774_v25 = vadd.f32 0.5, %v758_v13  ;;  %v970_v51 = vperm.slane %v894_v35, 0  ;;  %v583_v52 = vrot.slane %v4737_v7, 5 }
 0x1da   :  { %v1032_v63 = vmin.f32 %v4757_v58, 20.0  ;;  %v728_v16 = vmul.f32 0.5, %v712_v57  ;;  %vm1016_vm6 = vcmp.gt.f32.partialorder %v4757_v58, 20.0 }
 0x1dc   :  { %v3898_v14 = vpop.eup %3897  ;;  %v1050_v4 = vmul.f32 1.442695, %v1032_v63 }
 0x1dd   :  { %v3900_v0 = vpop.eup %3899  ;;  %v1079_v15 = vadd.f32 1.0, %v3898_v14  ;;  %v645_v17 = vpop.f32.mrf.mxu0 }
 0x1de   :  { %v933_v19 = vpop.f32.mrf.mxu1  ;;  %v1095_v22 = vmul.f32 0.6931472, %v3900_v0  ;;  %3903 = vpow2.f32 %v1050_v4  ;;  %v646_v23 = vadd.f32 %v645_v17, %v544_v11  ;;  %v3902_v26 = vpop.eup %3901 }
 0x1df   :  { %v934_v24 = vadd.f32 %v933_v19, %v4742_v10  ;;  %3905 = vlog2.f32 %v1079_v15  ;;  %v4774_v11 = vpop.f32.mrf.mxu3  ;;  %v759_v38 = vmul.f32 0.5, %v3902_v26 }
 0x1e0   :  { %v1126_v27 = vsel %vm1014_vm4, %v998_v20, %v1095_v22  ;;  %v713_v28 = vadd.f32 %v681_v18, %v646_v23  ;;  %3907 = vtanh.f32 %v728_v16  ;;  %v895_v18 = vrot.slane %v4740_v8, 5 }
 0x1e1   :  { %v4767_v29 = vadd.f32 %v969_v21, %v934_v24  ;;  %v1142_v30 = vmul.f32 %v1126_v27, %v774_v25  ;;  %v775_v62 = vadd.f32 0.5, %v759_v38  ;;  %v584_v24 = vrot.slane %v4737_v7, 6  ;;  %v4788_v25 = vpop.f32.mrf.mxu2 }
 0x1e2   :  { %v729_v40 = vmul.f32 0.5, %v713_v28  ;;  %vm1345_vm4 = vcmask 1047559  }
 0x1e3   :  { %v1033_v36 = vmin.f32 %v4767_v29, 20.0  ;;  %v1158_v10 = vsel %vm434_vm1, %v1142_v30, 0.0  ;;  %vm1017_vm7 = vcmp.gt.f32.partialorder %v4767_v29, 20.0 }
 0x1e4   :  { %v3904_v39 = vpop.eup %3903  ;;  %v1159_v20 = vrot.slane %v1158_v10, 4 }
 0x1e5   :  { %v1052_v41 = vmul.f32 1.442695, %v1033_v36  ;;  %v3906_v42 = vpop.eup %3905  ;;  %v1080_v44 = vadd.f32 1.0, %v3904_v39  ;;  %v648_v45 = vpop.f32.mrf.mxu0  ;;  %v896_v36 = vrot.slane %v4740_v8, 6 }
 0x1e6   :  { %v936_v50 = vpop.f32.mrf.mxu1  ;;  %v1160_v53 = vadd.f32 %v1159_v20, %v1158_v10  ;;  %v1097_v57 = vmul.f32 0.6931472, %v3906_v42  ;;  %v649_v61 = vadd.f32 %v648_v45, %v4750_v32  ;;  %v3908_v13 = vpop.eup %3907  ;;  %v971_v20 = vperm.slane %v895_v18, 0 }
 0x1e7   :  { %3909 = vpow2.f32 %v1052_v41  ;;  %v937_v63 = vadd.f32 %v936_v50, %v4748_v31  ;;  %v760_v19 = vmul.f32 0.5, %v3908_v13  ;;  %v683_v31 = vperm.slane %v583_v52, 0 }
 0x1e8   :  { %3911 = vlog2.f32 %v1080_v44  ;;  %v1161_v14 = vrot.slane %v1160_v53, 2  ;;  %v1127_v4 = vsel %vm1015_vm5, %v4752_v34, %v1097_v57  ;;  %v714_v0 = vadd.f32 %v682_v47, %v649_v61  ;;  %v4790_v34 = vpop.f32.mrf.mxu3 }
 0x1e9   :  { %3913 = vtanh.f32 %v729_v40  ;;  %v1143_v15 = vmul.f32 %v1127_v4, %v775_v62  ;;  %v4782_v16 = vadd.f32 %v970_v51, %v937_v63  ;;  %v776_v40 = vadd.f32 0.5, %v760_v19  ;;  %v4797_v51 = vld [vmem:[#allocation8] ss:$0 sm:$0xff] }
 0x1ea   :  { %v1162_v17 = vadd.f32 %v1161_v14, %v1160_v53  ;;  %v730_v47 = vmul.f32 0.5, %v714_v0  ;;  %v684_v13 = vperm.slane %v584_v24, 0 }
 0x1eb   :  { %v1165_v32 = vsel %vm434_vm1, %v1143_v15, 0.0  ;;  %v1034_v21 = vmin.f32 %v4782_v16, 20.0  ;;  %vm1018_vm9 = vcmp.gt.f32.partialorder %v4782_v16, 20.0 }
 0x1ec   :  { %v1166_v23 = vrot.slane %v1165_v32, 4  ;;  %v1163_v27 = vrot.slane %v1162_v17, 1 }
 0x1ed   :  { %v3910_v22 = vpop.eup %3909  ;;  %v1054_v30 = vmul.f32 1.442695, %v1034_v21  ;;  %v650_v33 = vpop.f32.mrf.mxu0 }
 0x1ee   :  { %v3912_v26 = vpop.eup %3911  ;;  %v1081_v28 = vadd.f32 1.0, %v3910_v22  ;;  %v938_v35 = vpop.f32.mrf.mxu1  ;;  %v1167_v38 = vadd.f32 %v1166_v23, %v1165_v32  ;;  %v651_v41 = vadd.f32 %v650_v33, %v4761_v60  ;;  %v1164_v50 = vadd.f32 %v1163_v27, %v1162_v17  ;;  %v4815_v33 = vld [vmem:[%s5730_s10] ss:$0 sm:$0xff] }
 0x1ef   :  { %v3914_v10 = vpop.eup %3913  ;;  %v1099_v39 = vmul.f32 0.6931472, %v3912_v26  ;;  %v939_v42 = vadd.f32 %v938_v35, %v4759_v59  ;;  %v585_v60 = vrot.slane %v4737_v7, 7  ;;  %v972_v32 = vperm.slane %v896_v36, 0  ;;  %v4806_v7 = vpop.f32.mrf.mxu2 }
 0x1f0   :  { %3915 = vlog2.f32 %v1081_v28  ;;  %v1168_v44 = vrot.slane %v1167_v38, 2  ;;  %v761_v53 = vmul.f32 0.5, %v3914_v10  ;;  %v715_v63 = vadd.f32 %v683_v31, %v651_v41  ;;  %v4808_v24 = vpop.f32.mrf.mxu3 }
 0x1f1   :  { %v1128_v45 = vsel %vm1016_vm6, %v4757_v58, %v1099_v39  ;;  %3917 = vpow2.f32 %v1054_v30  ;;  %v4799_v57 = vadd.f32 %v971_v20, %v939_v42  ;;  %v1274_v0 = vmul.f32 %v4797_v51, %v1164_v50 }
 0x1f2   :  { %v1144_v52 = vmul.f32 %v1128_v45, %v776_v40  ;;  %v1169_v61 = vadd.f32 %v1168_v44, %v1167_v38  ;;  %3919 = vtanh.f32 %v730_v47  ;;  %v777_v15 = vadd.f32 0.5, %v761_v53 }
 0x1f3   :  { %v1035_v58 = vmin.f32 %v4799_v57, 20.0  ;;  %v731_v27 = vmul.f32 0.5, %v715_v63  ;;  %v897_v41 = vrot.slane %v4740_v8, 7  ;;  %v685_v63 = vperm.slane %v585_v60, 0 }
 0x1f4   :  { %v1172_v62 = vsel %vm434_vm1, %v1144_v52, 0.0  ;;  %v1170_v59 = vrot.slane %v1169_v61, 1  ;;  %v1294_v52 = vadd.f32 %v4815_v33, %v1274_v0  ;;  %vm1019_vm11 = vcmp.gt.f32.partialorder %v4799_v57, 20.0 }
 0x1f5   :  { %v1173_v14 = vrot.slane %v1172_v62, 4  ;;  %v653_v17 = vpop.f32.mrf.mxu0  ;;  %v1056_v31 = vmul.f32 1.442695, %v1035_v58 }
 0x1f6   :  { %v3916_v4 = vpop.eup %3915  ;;  %v941_v18 = vpop.f32.mrf.mxu1  ;;  %v1171_v21 = vadd.f32 %v1170_v59, %v1169_v61  ;;  %v654_v28 = vadd.f32 %v653_v17, %v4774_v11 }
 0x1f7   :  { %v3918_v19 = vpop.eup %3917  ;;  %v1174_v22 = vadd.f32 %v1173_v14, %v1172_v62  ;;  %v1101_v23 = vmul.f32 0.6931472, %v3916_v4  ;;  %v942_v30 = vadd.f32 %v941_v18, %v4772_v37  ;;  %3921 = vpow2.f32 %v1056_v31  ;;  %v4832_v60 = vpop.f32.mrf.mxu2 }
 0x1f8   :  { %v1082_v26 = vadd.f32 1.0, %v3918_v19  ;;  %v1275_v35 = vmul.f32 %v4797_v51, %v1171_v21  ;;  %v716_v39 = vadd.f32 %v684_v13, %v654_v28  ;;  %v3920_v11 = vpop.eup %3919  ;;  %v973_v4 = vperm.slane %v897_v41, 0 }
 0x1f9   :  { %v1175_v36 = vrot.slane %v1174_v22, 2  ;;  %v1129_v10 = vsel %vm1017_vm7, %v4767_v29, %v1101_v23  ;;  %v4821_v20 = vadd.f32 %v972_v32, %v942_v30  ;;  %v762_v53 = vmul.f32 0.5, %v3920_v11 }
 0x1fa   :  { %v1145_v38 = vmul.f32 %v1129_v10, %v777_v15  ;;  %3923 = vlog2.f32 %v1082_v26  ;;  %v1295_v37 = vadd.f32 %v4815_v33, %v1275_v35  ;;  %v732_v50 = vmul.f32 0.5, %v716_v39 }
 0x1fb   :  { %v1176_v40 = vadd.f32 %v1175_v36, %v1174_v22  ;;  %3925 = vtanh.f32 %v731_v27  ;;  %v1036_v44 = vmin.f32 %v4821_v20, 20.0  ;;  %v4834_v22 = vpop.f32.mrf.mxu3  ;;  %v778_v31 = vadd.f32 0.5, %v762_v53 }
 0x1fc   :  { %v1179_v42 = vsel %vm434_vm1, %v1145_v38, 0.0  ;;  %v1326_v45 = vrot.slane %v1295_v37, 7  ;;  %vm1020_vm13 = vcmp.gt.f32.partialorder %v4821_v20, 20.0 }
 0x1fd   :  { %v1177_v29 = vrot.slane %v1176_v40, 1  ;;  %v1180_v47 = vrot.slane %v1179_v42, 4  ;;  %v1058_v61 = vmul.f32 1.442695, %v1036_v44  ;;  %v655_v62 = vpop.f32.mrf.mxu0  ;;  %v3922_v59 = vpop.eup %3921 }
 0x1fe   :  { %v943_v13 = vpop.f32.mrf.mxu1  ;;  %v656_v58 = vadd.f32 %v655_v62, %v4790_v34  ;;  %v1083_v17 = vadd.f32 1.0, %v3922_v59  ;;  %v1328_v32 = vsel %vm1327_vm8, %v1326_v45, %v1294_v52  ;;  %v4849_v62 = vadd.f32 %v4734_v6, %v4726_v54 }
 0x1ff   :  { %v1178_v14 = vadd.f32 %v1177_v29, %v1176_v40  ;;  %v1181_v8 = vadd.f32 %v1180_v47, %v1179_v42  ;;  %3927 = vpow2.f32 %v1058_v61  ;;  %v944_v18 = vadd.f32 %v943_v13, %v4788_v25 }
 0x200   :  { %v3924_v15 = vpop.eup %3923  ;;  %3929 = vtanh.f32 %v732_v50  ;;  %v717_v28 = vadd.f32 %v685_v63, %v656_v58 }
 0x201   :  { %v1276_v0 = vmul.f32 %v4797_v51, %v1178_v14  ;;  %v1182_v19 = vrot.slane %v1181_v8, 2  ;;  %v1103_v21 = vmul.f32 0.6931472, %v3924_v15  ;;  %v3926_v23 = vpop.eup %3925  ;;  %3931 = vlog2.f32 %v1083_v17 }
 0x202   :  { %v4837_v34 = vadd.f32 %v973_v4, %v944_v18  ;;  %v763_v11 = vmul.f32 0.5, %v3926_v23 }
 0x203   :  { %v1296_v25 = vadd.f32 %v4815_v33, %v1276_v0  ;;  %v1183_v26 = vadd.f32 %v1182_v19, %v1181_v8  ;;  %v1130_v27 = vsel %vm1018_vm9, %v4782_v16, %v1103_v21  ;;  %v733_v16 = vmul.f32 0.5, %v717_v28  ;;  %v874_v8 = vpop.f32.mrf.mxu2  ;;  %v4854_v58 = vpop.f32.mrf.mxu3 }
 0x204   :  { %v1146_v30 = vmul.f32 %v1130_v27, %v778_v31  ;;  %v1037_v35 = vmin.f32 %v4837_v34, 20.0  ;;  %v779_v63 = vadd.f32 0.5, %v763_v11  ;;  %vm1021_vm0 = vcmp.gt.f32.partialorder %v4837_v34, 20.0 }
 0x205   :  { %v1329_v36 = vrot.slane %v1296_v25, 6  ;;  %v1184_v10 = vrot.slane %v1183_v26, 1  ;;  %v3928_v38 = vpop.eup %3927  ;;  %v4843_v40 = vpop.f32.mrf.mxu0 }
 0x206   :  { %v1186_v39 = vsel %vm434_vm1, %v1146_v30, 0.0  ;;  %v1060_v37 = vmul.f32 1.442695, %v1037_v35  ;;  %v946_v41 = vpop.f32.mrf.mxu1  ;;  %v3930_v42 = vpop.eup %3929  ;;  %v1084_v29 = vadd.f32 1.0, %v3928_v38  ;;  %v899_v38 = vrot.slane %v4849_v62, 2 }
 0x207   :  { %v1185_v44 = vadd.f32 %v1184_v10, %v1183_v26  ;;  %v1187_v45 = vrot.slane %v1186_v39, 4  ;;  %v3932_v47 = vpop.eup %3931  ;;  %v1331_v50 = vsel %vm1330_vm10, %v1329_v36, %v1328_v32  ;;  %v764_v15 = vmul.f32 0.5, %v3930_v42 }
 0x208   :  { %3933 = vpow2.f32 %v1060_v37  ;;  %v1105_v61 = vmul.f32 0.6931472, %v3932_v47 }
 0x209   :  { %v1277_v52 = vmul.f32 %v4797_v51, %v1185_v44  ;;  %v1188_v53 = vadd.f32 %v1187_v45, %v1186_v39  ;;  %3935 = vlog2.f32 %v1084_v29  ;;  %v780_v25 = vadd.f32 0.5, %v764_v15 }
 0x20a   :  { %v1131_v14 = vsel %vm1019_vm11, %v4799_v57, %v1105_v61  ;;  %3937 = vtanh.f32 %v733_v16  ;;  %v898_v57 = vrot.slane %v4849_v62, 1  ;;  %v4868_v44 = vadd.f32 %v4732_v5, %v4720_v46 }
 0x20b   :  { %v1297_v13 = vadd.f32 %v4815_v33, %v1277_v52  ;;  %v1189_v59 = vrot.slane %v1188_v53, 2  ;;  %v1147_v4 = vmul.f32 %v1131_v14, %v779_v63  ;;  %v974_v61 = vperm.slane %v4849_v62, 0 }
 0x20c   :  { %v975_v42 = vperm.slane %v898_v57, 0  ;;  %v976_v14 = vperm.slane %v899_v38, 0 }
 0x20d   :  { %v1332_v17 = vrot.slane %v1297_v13, 5  ;;  %v1190_v18 = vadd.f32 %v1189_v59, %v1188_v53  ;;  %v1193_v54 = vsel %vm434_vm1, %v1147_v4, 0.0  ;;  %v4857_v6 = vpop.f32.mrf.mxu0  ;;  %v947_v53 = vadd.f32 %v946_v41, %v4806_v7 }
 0x20e   :  { %v3934_v32 = vpop.eup %3933  ;;  %v948_v0 = vpop.f32.mrf.mxu1  ;;  %v1194_v23 = vrot.slane %v1193_v54, 4  ;;  %v900_v4 = vrot.slane %v4849_v62, 3 }
 0x20f   :  { %v3936_v19 = vpop.eup %3935  ;;  %v1191_v21 = vrot.slane %v1190_v18, 1  ;;  %v1085_v31 = vadd.f32 1.0, %v3934_v32  ;;  %v1334_v27 = vsel %vm1333_vm12, %v1332_v17, %v1331_v50  ;;  %v949_v36 = vadd.f32 %v948_v0, %v4832_v60  ;;  %v4874_v50 = vpop.f32.mrf.mxu3 }
 0x210   :  { %v1107_v26 = vmul.f32 0.6931472, %v3936_v19  ;;  %v3938_v28 = vpop.eup %3937  ;;  %v1195_v35 = vadd.f32 %v1194_v23, %v1193_v54 }
 0x211   :  { %v1192_v30 = vadd.f32 %v1191_v21, %v1190_v18  ;;  %3939 = vlog2.f32 %v1085_v31  ;;  %v765_v45 = vmul.f32 0.5, %v3938_v28  ;;  %v4872_v60 = vadd.f32 %v975_v42, %v949_v36 }
 0x212   :  { %v1132_v10 = vsel %vm1020_vm13, %v4821_v20, %v1107_v26  ;;  %v1196_v11 = vrot.slane %v1195_v35, 2  ;;  %v876_v20 = vpop.f32.mrf.mxu2  ;;  %v4883_v21 = vadd.f32 %v974_v61, %v947_v53  ;;  %v587_v28 = vrot.slane %v4868_v44, 2 }
 0x213   :  { %v1278_v39 = vmul.f32 %v4797_v51, %v1192_v30  ;;  %v1148_v37 = vmul.f32 %v1132_v10, %v780_v25  ;;  %v781_v54 = vadd.f32 0.5, %v765_v45  ;;  %v1039_v7 = vmin.f32 %v4872_v60, 20.0 }
 0x214   :  { %v1197_v16 = vadd.f32 %v1196_v11, %v1195_v35  ;;  %v686_v25 = vperm.slane %v4868_v44, 0  ;;  %v977_v42 = vperm.slane %v900_v4, 0  ;;  %v659_v45 = vadd.f32 %v4843_v40, %v4808_v24 }
 0x215   :  { %v1298_v29 = vadd.f32 %v4815_v33, %v1278_v39  ;;  %v1200_v47 = vsel %vm434_vm1, %v1148_v37, 0.0  ;;  %v663_v63 = vpop.f32.mrf.mxu0  ;;  %v1064_v35 = vmul.f32 1.442695, %v1039_v7  ;;  %v1038_v39 = vmin.f32 %v4883_v21, 20.0 }
 0x216   :  { %v1201_v52 = vrot.slane %v1200_v47, 4  ;;  %v951_v13 = vpop.f32.mrf.mxu1  ;;  %v1198_v59 = vrot.slane %v1197_v16, 1  ;;  %vm1023_vm5 = vcmp.gt.f32.partialorder %v4872_v60, 20.0  ;;  %vm1022_vm9 = vcmp.gt.f32.partialorder %v4883_v21, 20.0 }
 0x217   :  { %v3940_v46 = vpop.eup %3939  ;;  %v1335_v5 = vrot.slane %v1298_v29, 4  ;;  %v952_v18 = vadd.f32 %v951_v13, %v874_v8  ;;  %v586_v8 = vrot.slane %v4868_v44, 1  ;;  %v661_v13 = vadd.f32 %v4857_v6, %v4834_v22 }
 0x218   :  { %v1202_v15 = vadd.f32 %v1201_v52, %v1200_v47  ;;  %v1109_v17 = vmul.f32 0.6931472, %v3940_v46  ;;  %v1199_v32 = vadd.f32 %v1198_v59, %v1197_v16  ;;  %v567_v52 = vpop.f32.mrf.mxu3  ;;  %3941 = vpow2.f32 %v1064_v35 }
 0x219   :  { %v1337_v41 = vsel %vm1336_vm15, %v1335_v5, %v1334_v27  ;;  %v4885_v23 = vadd.f32 %v976_v14, %v952_v18  ;;  %v687_v5 = vperm.slane %v586_v8, 0  ;;  %v664_v59 = vadd.f32 %v663_v63, %v4854_v58 }
 0x21a   :  { %v1203_v0 = vrot.slane %v1202_v15, 2  ;;  %v1133_v19 = vsel %vm1021_vm0, %v4837_v34, %v1109_v17  ;;  %v1279_v31 = vmul.f32 %v4797_v51, %v1199_v32  ;;  %v588_v34 = vrot.slane %v4868_v44, 3  ;;  %v879_v16 = vpop.f32.mrf.mxu2 }
 0x21b   :  { %v1149_v57 = vmul.f32 %v1133_v19, %v781_v54  ;;  %v1040_v30 = vmin.f32 %v4885_v23, 20.0  ;;  %v1062_v40 = vmul.f32 1.442695, %v1038_v39  ;;  %v688_v17 = vperm.slane %v587_v28, 0 }
 0x21c   :  { %v1204_v26 = vadd.f32 %v1203_v0, %v1202_v15  ;;  %v1299_v36 = vadd.f32 %v4815_v33, %v1279_v31  ;;  %v718_v15 = vadd.f32 %v686_v25, %v659_v45  ;;  %v719_v22 = vadd.f32 %v687_v5, %v661_v13 }
 0x21d   :  { %v1207_v27 = vsel %vm434_vm1, %v1149_v57, 0.0  ;;  %v665_v11 = vpop.f32.mrf.mxu0  ;;  %v1066_v29 = vmul.f32 1.442695, %v1040_v30  ;;  %v901_v6 = vrot.slane %v4849_v62, 4  ;;  %v720_v58 = vadd.f32 %v688_v17, %v664_v59 }
 0x21e   :  { %v1205_v10 = vrot.slane %v1204_v26, 1  ;;  %v1208_v38 = vrot.slane %v1207_v27, 4  ;;  %v953_v37 = vpop.f32.mrf.mxu1  ;;  %v1338_v46 = vrot.slane %v1299_v36, 3  ;;  %v666_v0 = vadd.f32 %v665_v11, %v4874_v50  ;;  %v3942_v57 = vpop.eup %3941 }
 0x21f   :  { %v954_v47 = vadd.f32 %v953_v37, %v876_v20  ;;  %3943 = vpow2.f32 %v1066_v29  ;;  %v734_v25 = vmul.f32 0.5, %v718_v15  ;;  %v589_v8 = vrot.slane %v4868_v44, 4 }
 0x220   :  { %v1206_v53 = vadd.f32 %v1205_v10, %v1204_v26  ;;  %v1209_v61 = vadd.f32 %v1208_v38, %v1207_v27  ;;  %v1340_v20 = vsel %vm1339_vm2, %v1338_v46, %v1337_v41  ;;  %3945 = vpow2.f32 %v1062_v40  ;;  %v569_v37 = vpop.f32.mrf.mxu3 }
 0x221   :  { %v4901_v14 = vadd.f32 %v977_v42, %v954_v47  ;;  %v689_v26 = vperm.slane %v588_v34, 0  ;;  %v735_v30 = vmul.f32 0.5, %v719_v22  ;;  %v978_v35 = vperm.slane %v901_v6, 0 }
 0x222   :  { %v1280_v4 = vmul.f32 %v4797_v51, %v1206_v53  ;;  %v1210_v24 = vrot.slane %v1209_v61, 2  ;;  %v736_v10 = vmul.f32 0.5, %v720_v58  ;;  %v881_v39 = vpop.f32.mrf.mxu2  ;;  %v902_v50 = vrot.slane %v4849_v62, 5 }
 0x223   :  { %v1041_v18 = vmin.f32 %v4901_v14, 20.0  ;;  %v1087_v42 = vadd.f32 1.0, %v3942_v57  ;;  %v721_v45 = vadd.f32 %v689_v26, %v666_v0  ;;  %v690_v47 = vperm.slane %v589_v8, 0 }
 0x224   :  { %v1211_v32 = vadd.f32 %v1210_v24, %v1209_v61  ;;  %v1300_v54 = vadd.f32 %v4815_v33, %v1280_v4  ;;  %v979_v5 = vperm.slane %v902_v50, 0  ;;  %vm1024_vm6 = vcmp.gt.f32.partialorder %v4885_v23, 20.0 }
 0x225   :  { %v1068_v63 = vmul.f32 1.442695, %v1041_v18  ;;  %v668_v19 = vpop.f32.mrf.mxu0  ;;  %v3944_v36 = vpop.eup %3943  ;;  %v737_v4 = vmul.f32 0.5, %v721_v45  ;;  %vm1025_vm7 = vcmp.gt.f32.partialorder %v4901_v14, 20.0 }
 0x226   :  { %v1212_v7 = vrot.slane %v1211_v32, 1  ;;  %v956_v41 = vpop.f32.mrf.mxu1  ;;  %v1341_v31 = vrot.slane %v1300_v54, 2  ;;  %v669_v38 = vadd.f32 %v668_v19, %v567_v52  ;;  %v3946_v53 = vpop.eup %3945  ;;  %v590_v52 = vrot.slane %v4868_v44, 5 }
 0x227   :  { %3947 = vpow2.f32 %v1068_v63  ;;  %v957_v27 = vadd.f32 %v956_v41, %v879_v16  ;;  %v1088_v16 = vadd.f32 1.0, %v3944_v36  ;;  %v1086_v22 = vadd.f32 1.0, %v3946_v53 }
 0x228   :  { %v1213_v28 = vadd.f32 %v1212_v7, %v1211_v32  ;;  %v1343_v11 = vsel %vm1342_vm3, %v1341_v31, %v1340_v20  ;;  %3949 = vtanh.f32 %v734_v25  ;;  %v722_v46 = vadd.f32 %v690_v47, %v669_v38  ;;  %v572_v26 = vpop.f32.mrf.mxu3 }
 0x229   :  { %v4912_v29 = vadd.f32 %v978_v35, %v957_v27  ;;  %3951 = vtanh.f32 %v735_v30  ;;  %v691_v6 = vperm.slane %v590_v52, 0  ;;  %v903_v19 = vrot.slane %v4849_v62, 6 }
 0x22a   :  { %v1281_v34 = vmul.f32 %v4797_v51, %v1213_v28  ;;  %3953 = vtanh.f32 %v736_v10  ;;  %v738_v58 = vmul.f32 0.5, %v722_v46  ;;  %v884_v57 = vpop.f32.mrf.mxu2  ;;  %v591_v30 = vrot.slane %v4868_v44, 6 }
 0x22b   :  { %v1042_v61 = vmin.f32 %v4912_v29, 20.0  ;;  %3955 = vlog2.f32 %v1087_v42  ;;  %v904_v27 = vrot.slane %v4849_v62, 7  ;;  %v980_v38 = vperm.slane %v903_v19, 0 }
 0x22c   :  { %v1301_v59 = vadd.f32 %v4815_v33, %v1281_v34  ;;  %3957 = vlog2.f32 %v1088_v16  ;;  %v592_v47 = vrot.slane %v4868_v44, 7  ;;  %vm1026_vm11 = vcmp.gt.f32.partialorder %v4912_v29, 20.0 }
 0x22d   :  { %v3948_v13 = vpop.eup %3947  ;;  %v670_v40 = vpop.f32.mrf.mxu0  ;;  %v1070_v15 = vmul.f32 1.442695, %v1042_v61  ;;  %v692_v61 = vperm.slane %v591_v30, 0  ;;  %v981_v62 = vperm.slane %v904_v27, 0 }
 0x22e   :  { %v1089_v24 = vadd.f32 1.0, %v3948_v13  ;;  %v958_v20 = vpop.f32.mrf.mxu1  ;;  %v671_v17 = vadd.f32 %v670_v40, %v569_v37  ;;  %v1344_v32 = vrot.slane %v1301_v59, 1  ;;  %v3950_v54 = vpop.eup %3949  ;;  %v693_v27 = vperm.slane %v592_v47, 0 }
 0x22f   :  { %v959_v18 = vadd.f32 %v958_v20, %v881_v39  ;;  %3959 = vpow2.f32 %v1070_v15  ;;  %v3952_v0 = vpop.eup %3951  ;;  %v766_v20 = vmul.f32 0.5, %v3950_v54 }
 0x230   :  { %v4921_v7 = vsel %vm1345_vm4, %v1344_v32, %v1343_v11  ;;  %3961 = vlog2.f32 %v1089_v24  ;;  %v3954_v41 = vpop.eup %3953  ;;  %v723_v31 = vadd.f32 %v691_v6, %v671_v17  ;;  %v767_v45 = vmul.f32 0.5, %v3952_v0 }
 0x231   :  { %v4918_v63 = vadd.f32 %v979_v5, %v959_v18  ;;  %3963 = vtanh.f32 %v737_v4  ;;  %v3956_v8 = vpop.eup %3955  ;;  %v768_v46 = vmul.f32 0.5, %v3954_v41 }
 0x232   :  { %3965 = vlog2.f32 %v1086_v22  ;;  %v3958_v35 = vpop.eup %3957  ;;  %v739_v37 = vmul.f32 0.5, %v723_v31  ;;  %v1113_v16 = vmul.f32 0.6931472, %v3956_v8  ;;  %v783_v44 = vadd.f32 0.5, %v767_v45  ;;  %v886_v22 = vpop.f32.mrf.mxu2 }
 0x233   :  { %v1043_v25 = vmin.f32 %v4918_v63, 20.0  ;;  %3967 = vtanh.f32 %v738_v58  ;;  %v1115_v5 = vmul.f32 0.6931472, %v3958_v35  ;;  %v574_v58 = vpop.f32.mrf.mxu3  ;;  %v784_v0 = vadd.f32 0.5, %v768_v46 }
 0x234   :  { %v1135_v32 = vsel %vm1023_vm5, %v4872_v60, %v1113_v16  ;;  %vm1027_vm13 = vcmp.gt.f32.partialorder %v4918_v63, 20.0 }
 0x235   :  { %v1072_v28 = vmul.f32 1.442695, %v1043_v25  ;;  %v673_v36 = vpop.f32.mrf.mxu0  ;;  %v3960_v39 = vpop.eup %3959  ;;  %v1136_v19 = vsel %vm1024_vm6, %v4885_v23, %v1115_v5  ;;  %v1151_v30 = vmul.f32 %v1135_v32, %v783_v44 }
 0x236   :  { %v961_v10 = vpop.f32.mrf.mxu1  ;;  %v674_v50 = vadd.f32 %v673_v36, %v572_v26  ;;  %v3962_v42 = vpop.eup %3961  ;;  %v1090_v34 = vadd.f32 1.0, %v3960_v39  ;;  %v1152_v36 = vmul.f32 %v1136_v19, %v784_v0  ;;  %v3841_v0 = vld [vmem:[%s5725_s5 + $0x30] sm:$0xff] }
 0x237   :  { %3969 = vpow2.f32 %v1072_v28  ;;  %v962_v11 = vadd.f32 %v961_v10, %v884_v57  ;;  %v3964_v53 = vpop.eup %3963  ;;  %v1117_v4 = vmul.f32 0.6931472, %v3962_v42  ;;  %v1221_v42 = vsel %vm434_vm1, %v1151_v30, 0.0 }
 0x238   :  { %v3966_v13 = vpop.eup %3965  ;;  %3971 = vlog2.f32 %v1090_v34  ;;  %v724_v24 = vadd.f32 %v692_v61, %v674_v50  ;;  %v769_v15 = vmul.f32 0.5, %v3964_v53  ;;  %v1228_v16 = vsel %vm434_vm1, %v1152_v36, 0.0 }
 0x239   :  { %v4928_v52 = vadd.f32 %v980_v38, %v962_v11  ;;  %v3968_v59 = vpop.eup %3967  ;;  %3973 = vtanh.f32 %v739_v37  ;;  %v1111_v18 = vmul.f32 0.6931472, %v3966_v13  ;;  %v1137_v25 = vsel %vm1025_vm7, %v4901_v14, %v1117_v4 }
 0x23a   :  { %v770_v41 = vmul.f32 0.5, %v3968_v59  ;;  %v740_v26 = vmul.f32 0.5, %v724_v24  ;;  %v785_v60 = vadd.f32 0.5, %v769_v15  ;;  %v782_v14 = vadd.f32 0.5, %v766_v20 }
 0x23b   :  { %v1044_v40 = vmin.f32 %v4928_v52, 20.0  ;;  %v1134_v50 = vsel %vm1022_vm9, %v4883_v21, %v1111_v18  ;;  %v1222_v59 = vrot.slane %v1221_v42, 4  ;;  %v1229_v24 = vrot.slane %v1228_v16, 4  ;;  %v3842_v18 = vld [vmem:[%s5725_s5 + $0x38] sm:$0xff] }
 0x23c   :  { %v1153_v23 = vmul.f32 %v1137_v25, %v785_v60  ;;  %v786_v37 = vadd.f32 0.5, %v770_v41  ;;  %v1150_v13 = vmul.f32 %v1134_v50, %v782_v14  ;;  %1782 = vmatpush.bf16.msra.mxu1 %v3842_v18  ;;  %vm1028_vm0 = vcmp.gt.f32.partialorder %v4928_v52, 20.0 }
 0x23d   :  { %v3970_v17 = vpop.eup %3969  ;;  %v1074_v6 = vmul.f32 1.442695, %v1044_v40  ;;  %v675_v57 = vpop.f32.mrf.mxu0  ;;  %v1230_v19 = vadd.f32 %v1229_v24, %v1228_v16 }
 0x23e   :  { %v1091_v31 = vadd.f32 1.0, %v3970_v17  ;;  %v963_v54 = vpop.f32.mrf.mxu1  ;;  %v3972_v28 = vpop.eup %3971  ;;  %v676_v38 = vadd.f32 %v675_v57, %v574_v58  ;;  %v1235_v46 = vsel %vm434_vm1, %v1153_v23, 0.0  ;;  %v1214_v32 = vsel %vm434_vm1, %v1150_v13, 0.0 }
 0x23f   :  { %3975 = vpow2.f32 %v1074_v6  ;;  %v964_v8 = vadd.f32 %v963_v54, %v886_v22  ;;  %v3974_v35 = vpop.eup %3973  ;;  %v1119_v10 = vmul.f32 0.6931472, %v3972_v28  ;;  %v1236_v44 = vrot.slane %v1235_v46, 4 }
 0x240   :  { %3977 = vlog2.f32 %v1091_v31  ;;  %v771_v34 = vmul.f32 0.5, %v3974_v35  ;;  %v725_v61 = vadd.f32 %v693_v27, %v676_v38  ;;  %v1223_v58 = vadd.f32 %v1222_v59, %v1221_v42  ;;  %1783 = vmatpush.bf16.msra.mxu1 %v3841_v0 }
 0x241   :  { %v4937_v39 = vadd.f32 %v981_v62, %v964_v8  ;;  %v1138_v11 = vsel %vm1026_vm11, %v4912_v29, %v1119_v10  ;;  %3979 = vtanh.f32 %v740_v26  ;;  %v1215_v31 = vrot.slane %v1214_v32, 4 }
 0x242   :  { %v1154_v45 = vmul.f32 %v1138_v11, %v786_v37  ;;  %v787_v40 = vadd.f32 0.5, %v771_v34  ;;  %v741_v17 = vmul.f32 0.5, %v725_v61  ;;  %v1237_v57 = vadd.f32 %v1236_v44, %v1235_v46 }
 0x243   :  { %v1045_v47 = vmin.f32 %v4937_v39, 20.0  ;;  %v1224_v28 = vrot.slane %v1223_v58, 2  ;;  %v1231_v27 = vrot.slane %v1230_v19, 2  ;;  %v1216_v10 = vadd.f32 %v1215_v31, %v1214_v32 }
 0x244   :  { %v1242_v21 = vsel %vm434_vm1, %v1154_v45, 0.0  ;;  %v1238_v38 = vrot.slane %v1237_v57, 2  ;;  %vm1029_vm5 = vcmp.gt.f32.partialorder %v4937_v39, 20.0 }
 0x245   :  { %v3976_v53 = vpop.eup %3975  ;;  %v1076_v4 = vmul.f32 1.442695, %v1045_v47  ;;  %v1243_v22 = vrot.slane %v1242_v21, 4  ;;  %v1225_v11 = vadd.f32 %v1224_v28, %v1223_v58  ;;  %v1232_v45 = vadd.f32 %v1231_v27, %v1230_v19 }
 0x246   :  { %v3978_v62 = vpop.eup %3977  ;;  %v1092_v5 = vadd.f32 1.0, %v3976_v53  ;;  %v1217_v47 = vrot.slane %v1216_v10, 2  ;;  %v1239_v53 = vadd.f32 %v1238_v38, %v1237_v57 }
 0x247   :  { %v1121_v29 = vmul.f32 0.6931472, %v3978_v62  ;;  %v3980_v20 = vpop.eup %3979  ;;  %v1244_v26 = vadd.f32 %v1243_v22, %v1242_v21  ;;  %v1226_v13 = vrot.slane %v1225_v11, 1  ;;  %v1233_v21 = vrot.slane %v1232_v45, 1 }
 0x248   :  { %3981 = vlog2.f32 %v1092_v5 }
 0x249   :  { %v1139_v15 = vsel %vm1027_vm13, %v4918_v63, %v1121_v29  ;;  %3983 = vpow2.f32 %v1076_v4  ;;  %v772_v63 = vmul.f32 0.5, %v3980_v20  ;;  %v1245_v37 = vrot.slane %v1244_v26, 2 }
 0x24a   :  { %v1155_v6 = vmul.f32 %v1139_v15, %v787_v40  ;;  %3985 = vtanh.f32 %v741_v17  ;;  %v1240_v29 = vrot.slane %v1239_v53, 1  ;;  %v1227_v44 = vadd.f32 %v1226_v13, %v1225_v11 }
 0x24b   :  { %v788_v35 = vadd.f32 0.5, %v772_v63  ;;  %v1246_v61 = vadd.f32 %v1245_v37, %v1244_v26  ;;  %v1234_v32 = vadd.f32 %v1233_v21, %v1232_v45 }
 0x24c   :  { %v1249_v41 = vsel %vm434_vm1, %v1155_v6, 0.0  ;;  %v1241_v58 = vadd.f32 %v1240_v29, %v1239_v53  ;;  %v1283_v63 = vmul.f32 %v4797_v51, %v1227_v44 }
 0x24d   :  { %v1250_v54 = vrot.slane %v1249_v41, 4  ;;  %v1247_v40 = vrot.slane %v1246_v61, 1 }
 0x24e   :  { %v3982_v25 = vpop.eup %3981 }
 0x24f   :  { %v3984_v8 = vpop.eup %3983  ;;  %v1251_v30 = vadd.f32 %v1250_v54, %v1249_v41  ;;  %v1123_v60 = vmul.f32 0.6931472, %v3982_v25  ;;  %v1248_v19 = vadd.f32 %v1247_v40, %v1246_v61  ;;  %v1284_v54 = vmul.f32 %v4797_v51, %v1234_v32 }
 0x250   :  { %v1093_v36 = vadd.f32 1.0, %v3984_v8  ;;  %v3986_v50 = vpop.eup %3985  ;;  %v1285_v8 = vmul.f32 %v4797_v51, %v1241_v58 }
 0x251   :  { %v1140_v23 = vsel %vm1028_vm0, %v4928_v52, %v1123_v60  ;;  %v1252_v42 = vrot.slane %v1251_v30, 2  ;;  %v773_v62 = vmul.f32 0.5, %v3986_v50  ;;  %v1218_v52 = vadd.f32 %v1217_v47, %v1216_v10 }
 0x252   :  { %v1156_v14 = vmul.f32 %v1140_v23, %v788_v35  ;;  %3987 = vlog2.f32 %v1093_v36  ;;  %v1304_v35 = vadd.f32 %v4815_v33, %v1284_v54  ;;  %v1363_v10 = vadd.f32 %v4921_v7, %v4591_v55  ;;  %v3844_v54 = vld [vmem:[%s5726_s6 + $0x38] sm:$0xff] }
 0x253   :  { %v1253_v46 = vadd.f32 %v1252_v42, %v1251_v30  ;;  %v789_v20 = vadd.f32 0.5, %v773_v62  ;;  %v1219_v6 = vrot.slane %v1218_v52, 1  ;;  %v1303_v30 = vadd.f32 %v4815_v33, %v1283_v63  ;;  %v3837_v63 = vld [vmem:[%s5725_s5 + $0x28] sm:$0xff]  ;;  %1887 = vmatpush.bf16.msrb.mxu1 %v3844_v54 }
 0x254   :  { %v1256_v34 = vsel %vm434_vm1, %v1156_v14, 0.0  ;;  %v1305_v23 = vadd.f32 %v4815_v33, %v1285_v8  ;;  %v1349_v45 = vrot.slane %v1304_v35, 6  ;;  %v1367_v47 = vmin.f32 %v1363_v10, 20.0  ;;  %v3845_v8 = vld [vmem:[%s5727_s7 + $0x18] sm:$0xff] }
 0x255   :  { %v1257_v16 = vrot.slane %v1256_v34, 4  ;;  %v1254_v15 = vrot.slane %v1253_v46, 1  ;;  %v1220_v26 = vadd.f32 %v1219_v6, %v1218_v52  ;;  %v1347_v50 = vrot.slane %v1303_v30, 7 }
 0x256   :  { %vm1365_vm6 = vcmp.gt.f32.partialorder %v1363_v10, 20.0 }
 0x257   :  { %v1258_v5 = vadd.f32 %v1257_v16, %v1256_v34  ;;  %v1255_v31 = vadd.f32 %v1254_v15, %v1253_v46  ;;  %v1282_v38 = vmul.f32 %v4797_v51, %v1220_v26  ;;  %v1351_v16 = vrot.slane %v1305_v23, 5  ;;  %v3843_v26 = vld [vmem:[%s5726_s6 + $0x30] sm:$0xff] }
 0x258   :  { %v3988_v59 = vpop.eup %3987  ;;  %1888 = vmatpush.bf16.msrb.mxu1 %v3843_v26 }
 0x259   :  { %v1259_v4 = vrot.slane %v1258_v5, 2  ;;  %v1125_v24 = vmul.f32 0.6931472, %v3988_v59  ;;  %v1287_v60 = vmul.f32 %v4797_v51, %v1255_v31  ;;  %v1302_v53 = vadd.f32 %v4815_v33, %v1282_v38  ;;  %v3836_v31 = vld [vmem:[%s5725_s5 + $0x20] sm:$0xff] }
 0x25a   :  { %v1369_v59 = vmul.f32 1.442695, %v1367_v47 }
 0x25b   :  { %v1260_v17 = vadd.f32 %v1259_v4, %v1258_v5  ;;  %v1141_v18 = vsel %vm1029_vm5, %v4937_v39, %v1125_v24  ;;  %v1286_v39 = vmul.f32 %v4797_v51, %v1248_v19  ;;  %v1307_v42 = vadd.f32 %v4815_v33, %v1287_v60  ;;  %v4214_v60 = vld [vmem:[%s5722_s2 + $0x8] sm:$0xff] }
 0x25c   :  { %v1157_v22 = vmul.f32 %v1141_v18, %v789_v20  ;;  %v1348_v62 = vsel %vm1327_vm8, %v1347_v50, %v1302_v53  ;;  %3989 = vpow2.f32 %v1369_v59  ;;  %v4220_v59 = vld [vmem:[%s5722_s2 + $0x38] sm:$0xff] }
 0x25d   :  { %v1261_v0 = vrot.slane %v1260_v17, 1  ;;  %v1306_v14 = vadd.f32 %v4815_v33, %v1286_v39  ;;  %v1355_v13 = vrot.slane %v1307_v42, 3  ;;  %v1350_v46 = vsel %vm1330_vm10, %v1349_v45, %v1348_v62  ;;  %v4213_v39 = vld [vmem:[%s5722_s2] sm:$0xff]  ;;  %v4219_v62 = vld [vmem:[%s5722_s2 + $0x30] sm:$0xff] }
 0x25e   :  { %v1263_v41 = vsel %vm434_vm1, %v1157_v22, 0.0  ;;  %v1352_v52 = vsel %vm1333_vm12, %v1351_v16, %v1350_v46  ;;  %v4217_v45 = vld [vmem:[%s5722_s2 + $0x20] sm:$0xff]  ;;  %v4218_v16 = vld [vmem:[%s5722_s2 + $0x28] sm:$0xff] }
 0x25f   :  { %v1264_v57 = vrot.slane %v1263_v41, 4  ;;  %v1262_v25 = vadd.f32 %v1261_v0, %v1260_v17  ;;  %v1353_v55 = vrot.slane %v1306_v14, 4  ;;  %v4216_v14 = vld [vmem:[%s5722_s2 + $0x18] sm:$0xff] }
 0x261   :  { %v1265_v28 = vadd.f32 %v1264_v57, %v1263_v41  ;;  %v1288_v36 = vmul.f32 %v4797_v51, %v1262_v25  ;;  %v1354_v29 = vsel %vm1336_vm15, %v1353_v55, %v1352_v52  ;;  %v3839_v57 = vld [vmem:[%s5726_s6 + $0x28] sm:$0xff]  ;;  %v3838_v25 = vld [vmem:[%s5726_s6 + $0x20] sm:$0xff] }
 0x262   :  { %v1356_v4 = vsel %vm1339_vm2, %v1355_v13, %v1354_v29  ;;  %v3990_v15 = vpop.eup %3989  ;;  %1599 = vmatpush.bf16.msrb.mxu2 %v3839_v57 }
 0x263   :  { %v1266_v27 = vrot.slane %v1265_v28, 2  ;;  %v1308_v34 = vadd.f32 %v4815_v33, %v1288_v36  ;;  %v1373_v18 = vadd.f32 1.0, %v3990_v15 }
 0x265   :  { %v1267_v37 = vadd.f32 %v1266_v27, %v1265_v28  ;;  %v1357_v5 = vrot.slane %v1308_v34, 2  ;;  %v3840_v28 = vld [vmem:[%s5727_s7 + $0x10] sm:$0xff] }
 0x266   :  { %1600 = vmatpush.bf16.msrb.mxu2 %v3838_v25  ;;  %1499 = vmatpush.bf16.msrb.mxu0 %v3840_v28 }
 0x267   :  { %v1268_v11 = vrot.slane %v1267_v37, 1  ;;  %v1358_v40 = vsel %vm1342_vm3, %v1357_v5, %v1356_v4 }
 0x269   :  { %v1269_v61 = vadd.f32 %v1268_v11, %v1267_v37  ;;  %3614 = vmatmul.msk.bf16.vlgmr.msrb.gmra.mxu0 %vm332_vm14, %v4213_v39 }
 0x26b   :  { %v1289_v7 = vmul.f32 %v4797_v51, %v1269_v61 }
 0x26d   :  { %v1309_v21 = vadd.f32 %v4815_v33, %v1289_v7 }
 0x26f   :  { %v1359_v24 = vrot.slane %v1309_v21, 1 }
 0x271   :  { %v1360_v51 = vsel %vm1345_vm4, %v1359_v24, %v1358_v40 }
 0x272   :  { %v1364_v20 = vadd.f32 %v1360_v51, %v4593_v56 }
 0x274   :  { %v1368_v44 = vmin.f32 %v1364_v20, 20.0  ;;  %vm1366_vm7 = vcmp.gt.f32.partialorder %v1364_v20, 20.0 }
 0x276   :  { %v1371_v17 = vmul.f32 1.442695, %v1368_v44 }
 0x278   :  { %3991 = vpow2.f32 %v1371_v17  ;;  %v5096_v17 = vld [vmem:[#allocation7 + $0x2] ss:$0 sm:$0xff] }
 0x279   :  { %3993 = vlog2.f32 %v1373_v18  ;;  %3615 = vmatmul.msk.bf16.gmra.mxu0 %vm332_vm14, %v4214_v60 }
 0x27e   :  { %v3992_v33 = vpop.eup %3991 }
 0x27f   :  { %v1374_v32 = vadd.f32 1.0, %v3992_v33  ;;  %v3994_v22 = vpop.eup %3993 }
 0x280   :  { %v1376_v6 = vmul.f32 0.6931472, %v3994_v22  ;;  %v5100_v22 = vld [vmem:[#allocation7 + $0x3] ss:$0 sm:$0xff] }
 0x281   :  { %3995 = vlog2.f32 %v1374_v32 }
 0x282   :  { %v4990_v19 = vsel %vm1365_vm6, %v1363_v10, %v1376_v6  ;;  %v4215_v10 = vld [vmem:[%s5722_s2 + $0x10] sm:$0xff] }
 0x287   :  { %v3996_v58 = vpop.eup %3995 }
 0x288   :  { %v1378_v0 = vmul.f32 0.6931472, %v3996_v58 }
 0x289   :  { %3616 = vmatmul.msk.bf16.gmra.mxu0 %vm332_vm14, %v4215_v10 }
 0x28a   :  { %v4992_v41 = vsel %vm1366_vm7, %v1364_v20, %v1378_v0 }
 0x28b   :  { %v1381_v56 = vpack.c.bf16 %v4992_v41, %v4990_v19 }
 0x28d   :  { %1389 = vmatpush.bf16.msrb.mxu3 %v1381_v56  ;;  %3650 = vmatmul.msk.bf16.vlgmr.msra.gmra.mxu1 %vm434_vm1, %v1381_v56 }
 0x290   :  { %3583 = vmatmul.msk.bf16.vlgmr.msrb.gmra.mxu3 %vm332_vm14, %v4606_v1 }
 0x291   :  { %1470 = vmatpush.bf16.msra.mxu3 %v3837_v63 }
 0x295   :  { %1471 = vmatpush.bf16.msra.mxu3 %v3836_v31 }
 0x299   :  { %1811 = vmatpush.bf16.msrb.mxu3 %v3845_v8  ;;  %3617 = vmatmul.msk.bf16.gmra.mxu0 %vm332_vm14, %v4216_v14 }
 0x2a0   :  { %3584 = vmatmul.msk.bf16.gmra.mxu3 %vm332_vm14, %v4630_v9 }
 0x2a9   :  { %3618 = vmatmul.msk.bf16.gmra.mxu0 %vm332_vm14, %v4217_v45 }
 0x2b0   :  { %3585 = vmatmul.msk.bf16.gmra.mxu3 %vm332_vm14, %v4641_v12 }
 0x2b9   :  { %3619 = vmatmul.msk.bf16.gmra.mxu0 %vm332_vm14, %v4218_v16 }
 0x2c0   :  { %3586 = vmatmul.msk.bf16.gmra.mxu3 %vm332_vm14, %v4574_v43 }
 0x2c9   :  { %3620 = vmatmul.msk.bf16.gmra.mxu0 %vm332_vm14, %v4219_v62 }
 0x2d0   :  { %3587 = vmatmul.msk.bf16.gmra.mxu3 %vm332_vm14, %v4580_v48 }
 0x2d9   :  { %3621 = vmatmul.msk.bf16.gmra.mxu0 %vm332_vm14, %v4220_v59 }
 0x2e0   :  { %3588 = vmatmul.msk.bf16.gmra.mxu3 %vm332_vm14, %v4582_v49 }
 0x2e6   :  { %v1501_v4 = vpop.f32.mrf.mxu0 }
 0x2ee   :  { %v1503_v20 = vpop.f32.mrf.mxu0 }
 0x2f0   :  { %3589 = vmatmul.msk.bf16.gmra.mxu3 %vm332_vm14, %v4610_v3 }
 0x2f6   :  { %v1506_v18 = vpop.f32.mrf.mxu0 }
 0x2fe   :  { %v1508_v31 = vpop.f32.mrf.mxu0 }
 0x300   :  { %3590 = vmatmul.msk.bf16.gmra.mxu3 %vm332_vm14, %v4608_v2 }
 0x30a   :  { %v1785_v24 = vpop.f32.mrf.mxu1 }
 0x30b   :  { %v5106_v58 = vadd.f32 %v5100_v22, %v1785_v24 }
 0x30d   :  { %v1930_v8 = vperm.slane %v5106_v58, 0 }
 0x310   :  { %3603 = vmatmul.msk.bf16.vlgmr.msra.gmra.mxu3 %vm434_vm1, %v1381_v56 }
 0x312   :  { %v5094_v44 = vpop.f32.mrf.mxu1 }
 0x313   :  { %v1391_v30 = vpop.f32.mrf.mxu3 }
 0x31b   :  { %v1393_v27 = vpop.f32.mrf.mxu3 }
 0x31c   :  { %v1431_v35 = vpack.c.bf16 %v1393_v27, %v1391_v30 }
 0x31e   :  { %3630 = vmatmul.msk.bf16.vlgmr.msrb.gmra.mxu2 %vm434_vm1, %v1431_v35  ;;  %3677 = vmatmul.msk.bf16.vlgmr.msrb.gmra.mxu1 %vm434_vm1, %v1431_v35 }
 0x320   :  { %3661 = vmatmul.msk.bf16.vlgmr.msrb.gmra.mxu3 %vm332_vm14, %v4213_v39  ;;  %v1855_v39 = vrot.slane %v5106_v58, 1 }
 0x323   :  { %v1396_v36 = vpop.f32.mrf.mxu3 }
 0x32b   :  { %v1398_v38 = vpop.f32.mrf.mxu3 }
 0x32c   :  { %v1432_v23 = vpack.c.bf16 %v1398_v38, %v1396_v36  ;;  %v5115_v36 = vpop.f32.mrf.mxu0  ;;  %v1931_v38 = vperm.slane %v1855_v39, 0 }
 0x32e   :  { %3631 = vmatmul.msk.bf16.gmra.mxu2 %vm434_vm1, %v1432_v23  ;;  %3678 = vmatmul.msk.bf16.gmra.mxu1 %vm434_vm1, %v1432_v23 }
 0x330   :  { %3662 = vmatmul.msk.bf16.gmra.mxu3 %vm332_vm14, %v4214_v60 }
 0x333   :  { %v1401_v37 = vpop.f32.mrf.mxu3 }
 0x33b   :  { %v1403_v50 = vpop.f32.mrf.mxu3 }
 0x33c   :  { %v1433_v11 = vpack.c.bf16 %v1403_v50, %v1401_v37 }
 0x33e   :  { %3632 = vmatmul.msk.bf16.gmra.mxu2 %vm434_vm1, %v1433_v11  ;;  %3679 = vmatmul.msk.bf16.gmra.mxu1 %vm434_vm1, %v1433_v11 }
 0x340   :  { %3663 = vmatmul.msk.bf16.gmra.mxu3 %vm332_vm14, %v4215_v10 }
 0x343   :  { %v1406_v42 = vpop.f32.mrf.mxu3 }
 0x34b   :  { %v1408_v34 = vpop.f32.mrf.mxu3 }
 0x34c   :  { %v1434_v47 = vpack.c.bf16 %v1408_v34, %v1406_v42  ;;  %v1856_v34 = vrot.slane %v5106_v58, 2 }
 0x34e   :  { %3633 = vmatmul.msk.bf16.gmra.mxu2 %vm434_vm1, %v1434_v47  ;;  %3680 = vmatmul.msk.bf16.gmra.mxu1 %vm434_vm1, %v1434_v47 }
 0x350   :  { %3664 = vmatmul.msk.bf16.gmra.mxu3 %vm332_vm14, %v4216_v14 }
 0x353   :  { %v1411_v53 = vpop.f32.mrf.mxu3 }
 0x35b   :  { %v1413_v61 = vpop.f32.mrf.mxu3 }
 0x35c   :  { %v1435_v55 = vpack.c.bf16 %v1413_v61, %v1411_v53 }
 0x35e   :  { %3634 = vmatmul.msk.bf16.gmra.mxu2 %vm434_vm1, %v1435_v55  ;;  %3681 = vmatmul.msk.bf16.gmra.mxu1 %vm434_vm1, %v1435_v55 }
 0x360   :  { %3665 = vmatmul.msk.bf16.gmra.mxu3 %vm332_vm14, %v4217_v45 }
 0x363   :  { %v1416_v7 = vpop.f32.mrf.mxu3 }
 0x36b   :  { %v1418_v13 = vpop.f32.mrf.mxu3 }
 0x36c   :  { %v1436_v46 = vpack.c.bf16 %v1418_v13, %v1416_v7 }
 0x36e   :  { %3635 = vmatmul.msk.bf16.gmra.mxu2 %vm434_vm1, %v1436_v46  ;;  %3682 = vmatmul.msk.bf16.gmra.mxu1 %vm434_vm1, %v1436_v46 }
 0x370   :  { %3666 = vmatmul.msk.bf16.gmra.mxu3 %vm332_vm14, %v4218_v16 }
 0x373   :  { %v1421_v5 = vpop.f32.mrf.mxu3 }
 0x37b   :  { %v1423_v21 = vpop.f32.mrf.mxu3 }
 0x37c   :  { %v1437_v52 = vpack.c.bf16 %v1423_v21, %v1421_v5  ;;  %v1932_v5 = vperm.slane %v1856_v34, 0 }
 0x37e   :  { %3636 = vmatmul.msk.bf16.gmra.mxu2 %vm434_vm1, %v1437_v52  ;;  %3683 = vmatmul.msk.bf16.gmra.mxu1 %vm434_vm1, %v1437_v52 }
 0x380   :  { %3667 = vmatmul.msk.bf16.gmra.mxu3 %vm332_vm14, %v4219_v62 }
 0x383   :  { %v1426_v29 = vpop.f32.mrf.mxu3 }
 0x38b   :  { %v1428_v40 = vpop.f32.mrf.mxu3 }
 0x38c   :  { %v1438_v51 = vpack.c.bf16 %v1428_v40, %v1426_v29 }
 0x38e   :  { %3637 = vmatmul.msk.bf16.gmra.mxu2 %vm434_vm1, %v1438_v51  ;;  %3684 = vmatmul.msk.bf16.gmra.mxu1 %vm434_vm1, %v1438_v51  ;;  %v1857_v51 = vrot.slane %v5106_v58, 3 }
 0x390   :  { %3668 = vmatmul.msk.bf16.gmra.mxu3 %vm332_vm14, %v4220_v59 }
 0x393   :  { %v1473_v15 = vpop.f32.mrf.mxu3 }
 0x394   :  { %v5103_v6 = vadd.f32 %v5096_v17, %v1473_v15 }
 0x396   :  { %v1642_v63 = vperm.slane %v5103_v6, 0  ;;  %v1543_v35 = vrot.slane %v5103_v6, 1  ;;  %v1544_v45 = vrot.slane %v5103_v6, 2  ;;  %v1545_v15 = vrot.slane %v5103_v6, 3 }
 0x398   :  { %v1643_v11 = vperm.slane %v1543_v35, 0  ;;  %v1644_v62 = vperm.slane %v1544_v45, 0 }
 0x39b   :  { %v5098_v33 = vpop.f32.mrf.mxu3  ;;  %v1890_v32 = vpop.f32.mrf.mxu1 }
 0x3a1   :  { %v1602_v0 = vpop.f32.mrf.mxu2 }
 0x3a2   :  { %v1603_v56 = vadd.f32 %v1602_v0, %v1501_v4  ;;  %v5122_v4 = vpop.f32.mrf.mxu0 }
 0x3a3   :  { %v1813_v57 = vpop.f32.mrf.mxu3  ;;  %v1892_v54 = vpop.f32.mrf.mxu1 }
 0x3a4   :  { %v1674_v25 = vadd.f32 %v1642_v63, %v1603_v56  ;;  %v1891_v26 = vadd.f32 %v1890_v32, %v1813_v57 }
 0x3a6   :  { %v5110_v28 = vadd.f32 %v1930_v8, %v1891_v26  ;;  %v1690_v37 = vmul.f32 0.5, %v1674_v25  ;;  %v1933_v8 = vperm.slane %v1857_v51, 0 }
 0x3a8   :  { %v1994_v30 = vmin.f32 %v5110_v28, 20.0  ;;  %vm1978_vm9 = vcmp.gt.f32.partialorder %v5110_v28, 20.0 }
 0x3a9   :  { %v1604_v60 = vpop.f32.mrf.mxu2 }
 0x3aa   :  { %v2010_v27 = vmul.f32 1.442695, %v1994_v30  ;;  %v1605_v14 = vadd.f32 %v1604_v60, %v1503_v20  ;;  %v1645_v60 = vperm.slane %v1545_v15, 0 }
 0x3ab   :  { %v1815_v10 = vpop.f32.mrf.mxu3  ;;  %v1895_v23 = vpop.f32.mrf.mxu1 }
 0x3ac   :  { %3997 = vpow2.f32 %v2010_v27  ;;  %v1893_v50 = vadd.f32 %v1892_v54, %v1815_v10  ;;  %v1675_v47 = vadd.f32 %v1643_v11, %v1605_v14  ;;  %v1546_v10 = vrot.slane %v5103_v6, 4  ;;  %v5134_v14 = vpop.f32.mrf.mxu0 }
 0x3ad   :  { %3999 = vtanh.f32 %v1690_v37  ;;  %v1858_v11 = vrot.slane %v5106_v58, 4 }
 0x3ae   :  { %v5117_v42 = vadd.f32 %v1931_v38, %v1893_v50  ;;  %v1691_v21 = vmul.f32 0.5, %v1675_v47 }
 0x3b0   :  { %v1995_v53 = vmin.f32 %v5117_v42, 20.0  ;;  %vm1979_vm11 = vcmp.gt.f32.partialorder %v5117_v42, 20.0 }
 0x3b1   :  { %v1607_v16 = vpop.f32.mrf.mxu2 }
 0x3b2   :  { %v3998_v61 = vpop.eup %3997  ;;  %v2012_v55 = vmul.f32 1.442695, %v1995_v53  ;;  %v1608_v7 = vadd.f32 %v1607_v16, %v1506_v18  ;;  %v1646_v16 = vperm.slane %v1546_v10, 0 }
 0x3b3   :  { %v2042_v13 = vadd.f32 1.0, %v3998_v61  ;;  %v1818_v46 = vpop.f32.mrf.mxu3  ;;  %v1897_v59 = vpop.f32.mrf.mxu1 }
 0x3b4   :  { %4001 = vpow2.f32 %v2012_v55  ;;  %v1676_v52 = vadd.f32 %v1644_v62, %v1608_v7  ;;  %v1896_v29 = vadd.f32 %v1895_v23, %v1818_v46  ;;  %v4000_v24 = vpop.eup %3999 }
 0x3b5   :  { %4003 = vlog2.f32 %v2042_v13  ;;  %v1722_v18 = vmul.f32 0.5, %v4000_v24 }
 0x3b6   :  { %v5124_v40 = vadd.f32 %v1932_v5, %v1896_v29  ;;  %4005 = vtanh.f32 %v1691_v21  ;;  %v1692_v25 = vmul.f32 0.5, %v1676_v52 }
 0x3b7   :  { %v1738_v35 = vadd.f32 0.5, %v1722_v18 }
 0x3b8   :  { %v1996_v20 = vmin.f32 %v5124_v40, 20.0  ;;  %vm1980_vm13 = vcmp.gt.f32.partialorder %v5124_v40, 20.0 }
 0x3b9   :  { %v1609_v32 = vpop.f32.mrf.mxu2 }
 0x3ba   :  { %v4002_v0 = vpop.eup %4001  ;;  %v2014_v56 = vmul.f32 1.442695, %v1996_v20  ;;  %v1610_v63 = vadd.f32 %v1609_v32, %v1508_v31 }
 0x3bb   :  { %v4004_v57 = vpop.eup %4003  ;;  %v2043_v54 = vadd.f32 1.0, %v4002_v0  ;;  %v1820_v26 = vpop.f32.mrf.mxu3 }
 0x3bc   :  { %v1900_v39 = vpop.f32.mrf.mxu1  ;;  %v2059_v30 = vmul.f32 0.6931472, %v4004_v57  ;;  %4007 = vpow2.f32 %v2014_v56  ;;  %v1898_v27 = vadd.f32 %v1897_v59, %v1820_v26  ;;  %v4006_v38 = vpop.eup %4005  ;;  %v1677_v31 = vadd.f32 %v1645_v60, %v1610_v63 }
 0x3bd   :  { %4009 = vlog2.f32 %v2043_v54  ;;  %v1723_v47 = vmul.f32 0.5, %v4006_v38  ;;  %v1934_v59 = vperm.slane %v1858_v11, 0  ;;  %v5145_v54 = vpop.f32.mrf.mxu0  ;;  %v1547_v60 = vrot.slane %v5103_v6, 5 }
 0x3be   :  { %v2090_v23 = vsel %vm1978_vm9, %v5110_v28, %v2059_v30  ;;  %v5132_v37 = vadd.f32 %v1933_v8, %v1898_v27  ;;  %4011 = vtanh.f32 %v1692_v25  ;;  %v1693_v7 = vmul.f32 0.5, %v1677_v31 }
 0x3bf   :  { %v2106_v50 = vmul.f32 %v2090_v23, %v1738_v35  ;;  %v1739_v20 = vadd.f32 0.5, %v1723_v47  ;;  %v1860_v27 = vrot.slane %v5106_v58, 6  ;;  %v1548_v11 = vrot.slane %v5103_v6, 6 }
 0x3c0   :  { %v1997_v45 = vmin.f32 %v5132_v37, 20.0  ;;  %vm1981_vm0 = vcmp.gt.f32.partialorder %v5132_v37, 20.0 }
 0x3c1   :  { %v2122_v34 = vsel %vm434_vm1, %v2106_v50, 0.0  ;;  %v1612_v53 = vpop.f32.mrf.mxu2 }
 0x3c2   :  { %v4008_v61 = vpop.eup %4007  ;;  %v2123_v55 = vrot.slane %v2122_v34, 4  ;;  %v2016_v28 = vmul.f32 1.442695, %v1997_v45  ;;  %v1613_v62 = vadd.f32 %v1612_v53, %v5115_v36  ;;  %v1859_v36 = vrot.slane %v5106_v58, 5 }
 0x3c3   :  { %v4010_v13 = vpop.eup %4009  ;;  %v2044_v46 = vadd.f32 1.0, %v4008_v61  ;;  %v1823_v5 = vpop.f32.mrf.mxu3 }
 0x3c4   :  { %v1902_v21 = vpop.f32.mrf.mxu1  ;;  %v2124_v52 = vadd.f32 %v2123_v55, %v2122_v34  ;;  %v2061_v29 = vmul.f32 0.6931472, %v4010_v13  ;;  %4013 = vpow2.f32 %v2016_v28  ;;  %v1678_v24 = vadd.f32 %v1646_v16, %v1613_v62  ;;  %v4012_v51 = vpop.eup %4011 }
 0x3c5   :  { %4015 = vlog2.f32 %v2044_v46  ;;  %v1901_v15 = vadd.f32 %v1900_v39, %v1823_v5  ;;  %v1724_v57 = vmul.f32 0.5, %v4012_v51  ;;  %v1647_v62 = vperm.slane %v1547_v60, 0  ;;  %v5155_v46 = vld [vmem:[#allocation8 + $0x1] ss:$0 sm:$0xff] }
 0x3c6   :  { %v2125_v18 = vrot.slane %v2124_v52, 2  ;;  %v2091_v32 = vsel %vm1979_vm11, %v5117_v42, %v2061_v29  ;;  %4017 = vtanh.f32 %v1693_v7  ;;  %v1935_v42 = vperm.slane %v1859_v36, 0 }
 0x3c7   :  { %v2107_v0 = vmul.f32 %v2091_v32, %v1739_v20  ;;  %v5143_v56 = vadd.f32 %v1934_v59, %v1901_v15  ;;  %v1740_v47 = vadd.f32 0.5, %v1724_v57  ;;  %v1694_v16 = vmul.f32 0.5, %v1678_v24  ;;  %v5162_v32 = vpop.f32.mrf.mxu0 }
 0x3c8   :  { %v2126_v63 = vadd.f32 %v2125_v18, %v2124_v52  ;;  %v1648_v57 = vperm.slane %v1548_v11, 0 }
 0x3c9   :  { %v2129_v25 = vsel %vm434_vm1, %v2107_v0, 0.0  ;;  %v1998_v26 = vmin.f32 %v5143_v56, 20.0  ;;  %v1614_v8 = vpop.f32.mrf.mxu2  ;;  %vm1982_vm5 = vcmp.gt.f32.partialorder %v5143_v56, 20.0 }
 0x3ca   :  { %v4014_v30 = vpop.eup %4013  ;;  %v2130_v39 = vrot.slane %v2129_v25, 4  ;;  %v2127_v10 = vrot.slane %v2126_v63, 1  ;;  %v1615_v61 = vadd.f32 %v1614_v8, %v5122_v4  ;;  %v1936_v4 = vperm.slane %v1860_v27, 0 }
 0x3cb   :  { %v4016_v35 = vpop.eup %4015  ;;  %v2045_v38 = vadd.f32 1.0, %v4014_v30  ;;  %v2018_v23 = vmul.f32 1.442695, %v1998_v26  ;;  %v1825_v31 = vpop.f32.mrf.mxu3 }
 0x3cc   :  { %v1905_v50 = vpop.f32.mrf.mxu1  ;;  %v4018_v45 = vpop.eup %4017  ;;  %v2131_v34 = vadd.f32 %v2130_v39, %v2129_v25  ;;  %v2063_v53 = vmul.f32 0.6931472, %v4016_v35  ;;  %v1903_v55 = vadd.f32 %v1902_v21, %v1825_v31  ;;  %v2128_v13 = vadd.f32 %v2127_v10, %v2126_v63 }
 0x3cd   :  { %4019 = vlog2.f32 %v2045_v38  ;;  %v1725_v59 = vmul.f32 0.5, %v4018_v45  ;;  %v1679_v24 = vadd.f32 %v1647_v62, %v1615_v61 }
 0x3ce   :  { %v2132_v7 = vrot.slane %v2131_v34, 2  ;;  %v2092_v28 = vsel %vm1980_vm13, %v5124_v40, %v2063_v53  ;;  %4021 = vpow2.f32 %v2018_v23  ;;  %v5157_v52 = vadd.f32 %v1935_v42, %v1903_v55 }
 0x3cf   :  { %v2108_v5 = vmul.f32 %v2092_v28, %v1740_v47  ;;  %4023 = vtanh.f32 %v1694_v16  ;;  %v2239_v0 = vmul.f32 %v5155_v46, %v2128_v13  ;;  %v1741_v63 = vadd.f32 0.5, %v1725_v59 }
 0x3d0   :  { %v2133_v29 = vadd.f32 %v2132_v7, %v2131_v34  ;;  %v1999_v40 = vmin.f32 %v5157_v52, 20.0  ;;  %v1695_v35 = vmul.f32 0.5, %v1679_v24  ;;  %v1861_v53 = vrot.slane %v5106_v58, 7 }
 0x3d1   :  { %v2136_v51 = vsel %vm434_vm1, %v2108_v5, 0.0  ;;  %v1617_v20 = vpop.f32.mrf.mxu2  ;;  %vm1983_vm6 = vcmp.gt.f32.partialorder %v5157_v52, 20.0 }
 0x3d2   :  { %v2134_v21 = vrot.slane %v2133_v29, 1  ;;  %v2137_v15 = vrot.slane %v2136_v51, 4  ;;  %v1618_v18 = vadd.f32 %v1617_v20, %v5134_v14  ;;  %v2020_v42 = vmul.f32 1.442695, %v1999_v40  ;;  %v5169_v14 = vld [vmem:[%s5730_s10 + $0x1] ss:$0 sm:$0xff] }
 0x3d3   :  { %v4020_v36 = vpop.eup %4019  ;;  %v1828_v25 = vpop.f32.mrf.mxu3  ;;  %v1937_v58 = vperm.slane %v1861_v53, 0 }
 0x3d4   :  { %v1907_v26 = vpop.f32.mrf.mxu1  ;;  %v4022_v8 = vpop.eup %4021  ;;  %v2135_v30 = vadd.f32 %v2134_v21, %v2133_v29  ;;  %v2138_v39 = vadd.f32 %v2137_v15, %v2136_v51  ;;  %v2065_v60 = vmul.f32 0.6931472, %v4020_v36  ;;  %v1680_v10 = vadd.f32 %v1648_v57, %v1618_v18 }
 0x3d5   :  { %v2046_v27 = vadd.f32 1.0, %v4022_v8  ;;  %v1906_v38 = vadd.f32 %v1905_v50, %v1828_v25  ;;  %4025 = vpow2.f32 %v2020_v42  ;;  %v4024_v45 = vpop.eup %4023  ;;  %v2260_v50 = vadd.f32 %v5169_v14, %v2239_v0  ;;  %v5187_v57 = vpop.f32.mrf.mxu0 }
 0x3d6   :  { %v2240_v23 = vmul.f32 %v5155_v46, %v2135_v30  ;;  %v2139_v31 = vrot.slane %v2138_v39, 2  ;;  %v2093_v11 = vsel %vm1981_vm0, %v5132_v37, %v2065_v60  ;;  %v1726_v5 = vmul.f32 0.5, %v4024_v45 }
 0x3d7   :  { %v2109_v34 = vmul.f32 %v2093_v11, %v1741_v63  ;;  %4027 = vlog2.f32 %v2046_v27  ;;  %v5175_v47 = vadd.f32 %v1936_v4, %v1906_v38  ;;  %v1549_v29 = vrot.slane %v5103_v6, 7 }
 0x3d8   :  { %v2261_v16 = vadd.f32 %v5169_v14, %v2240_v23  ;;  %v2140_v61 = vadd.f32 %v2139_v31, %v2138_v39  ;;  %4029 = vtanh.f32 %v1695_v35  ;;  %v1696_v0 = vmul.f32 0.5, %v1680_v10 }
 0x3d9   :  { %v2143_v55 = vsel %vm434_vm1, %v2109_v34, 0.0  ;;  %v2000_v7 = vmin.f32 %v5175_v47, 20.0  ;;  %v1619_v28 = vpop.f32.mrf.mxu2  ;;  %v1742_v39 = vadd.f32 0.5, %v1726_v5  ;;  %v1649_v60 = vperm.slane %v1549_v29, 0 }
 0x3da   :  { %v2292_v62 = vrot.slane %v2261_v16, 7  ;;  %v2141_v37 = vrot.slane %v2140_v61, 1  ;;  %v2144_v13 = vrot.slane %v2143_v55, 4  ;;  %v1620_v63 = vadd.f32 %v1619_v28, %v5145_v54 }
 0x3db   :  { %v2022_v59 = vmul.f32 1.442695, %v2000_v7  ;;  %v1830_v51 = vpop.f32.mrf.mxu3  ;;  %v4026_v20 = vpop.eup %4025  ;;  %vm1984_vm7 = vcmp.gt.f32.partialorder %v5175_v47, 20.0 }
 0x3dc   :  { %v5183_v24 = vpop.f32.mrf.mxu1  ;;  %v2293_v4 = vsel %vm1327_vm8, %v2292_v62, %v2260_v50  ;;  %v2142_v21 = vadd.f32 %v2141_v37, %v2140_v61  ;;  %v2145_v15 = vadd.f32 %v2144_v13, %v2143_v55  ;;  %v1908_v40 = vadd.f32 %v1907_v26, %v1830_v51 }
 0x3dd   :  { %v4028_v18 = vpop.eup %4027  ;;  %v2047_v36 = vadd.f32 1.0, %v4026_v20  ;;  %4031 = vpow2.f32 %v2022_v59  ;;  %v1681_v10 = vadd.f32 %v1649_v60, %v1620_v63  ;;  %v5203_v51 = vadd.f32 %v5100_v22, %v5094_v44  ;;  %v5206_v20 = vpop.f32.mrf.mxu0 }
 0x3de   :  { %v2241_v6 = vmul.f32 %v5155_v46, %v2142_v21  ;;  %v2146_v25 = vrot.slane %v2145_v15, 2  ;;  %v2067_v8 = vmul.f32 0.6931472, %v4028_v18  ;;  %v5190_v30 = vadd.f32 %v1937_v58, %v1908_v40  ;;  %v4030_v26 = vpop.eup %4029 }
 0x3df   :  { %4033 = vlog2.f32 %v2047_v36  ;;  %v1727_v53 = vmul.f32 0.5, %v4030_v26  ;;  %v1697_v37 = vmul.f32 0.5, %v1681_v10 }
 0x3e0   :  { %v2262_v42 = vadd.f32 %v5169_v14, %v2241_v6  ;;  %v2147_v27 = vadd.f32 %v2146_v25, %v2145_v15  ;;  %v2094_v35 = vsel %vm1982_vm5, %v5143_v56, %v2067_v8  ;;  %4035 = vtanh.f32 %v1696_v0 }
 0x3e1   :  { %v2110_v54 = vmul.f32 %v2094_v35, %v1742_v39  ;;  %v2001_v38 = vmin.f32 %v5190_v30, 20.0  ;;  %v5196_v23 = vpop.f32.mrf.mxu2  ;;  %v1743_v58 = vadd.f32 0.5, %v1727_v53  ;;  %v1938_v25 = vperm.slane %v5203_v51, 0 }
 0x3e2   :  { %v2294_v31 = vrot.slane %v2262_v42, 6  ;;  %v2148_v11 = vrot.slane %v2147_v27, 1  ;;  %v1862_v39 = vrot.slane %v5203_v51, 1  ;;  %v1863_v35 = vrot.slane %v5203_v51, 2 }
 0x3e3   :  { %v4032_v45 = vpop.eup %4031  ;;  %v2150_v34 = vsel %vm434_vm1, %v2110_v54, 0.0  ;;  %v2024_v16 = vmul.f32 1.442695, %v2001_v38  ;;  %v1833_v61 = vpop.f32.mrf.mxu3  ;;  %vm1985_vm9 = vcmp.gt.f32.partialorder %v5190_v30, 20.0 }
 0x3e4   :  { %v1912_v50 = vpop.f32.mrf.mxu1  ;;  %v2295_v55 = vsel %vm1330_vm10, %v2294_v31, %v2293_v4  ;;  %v2149_v7 = vadd.f32 %v2148_v11, %v2147_v27  ;;  %v2151_v56 = vrot.slane %v2150_v34, 4  ;;  %v2048_v28 = vadd.f32 1.0, %v4032_v45 }
 0x3e5   :  { %v4034_v62 = vpop.eup %4033  ;;  %4037 = vpow2.f32 %v2024_v16  ;;  %v1911_v22 = vadd.f32 %v5183_v24, %v1833_v61  ;;  %v1939_v16 = vperm.slane %v1862_v39, 0  ;;  %v1864_v61 = vrot.slane %v5203_v51, 3 }
 0x3e6   :  { %v2242_v13 = vmul.f32 %v5155_v46, %v2149_v7  ;;  %v2152_v5 = vadd.f32 %v2151_v56, %v2150_v34  ;;  %v2069_v59 = vmul.f32 0.6931472, %v4034_v62  ;;  %4039 = vlog2.f32 %v2048_v28  ;;  %v4036_v29 = vpop.eup %4035 }
 0x3e7   :  { %4041 = vtanh.f32 %v1697_v37  ;;  %v1728_v63 = vmul.f32 0.5, %v4036_v29  ;;  %v5220_v53 = vadd.f32 %v1938_v25, %v1911_v22  ;;  %v5225_v7 = vadd.f32 %v5096_v17, %v5098_v33  ;;  %v5230_v37 = vpop.f32.mrf.mxu0 }
 0x3e8   :  { %v2263_v4 = vadd.f32 %v5169_v14, %v2242_v13  ;;  %v2153_v21 = vrot.slane %v2152_v5, 2  ;;  %v2095_v15 = vsel %vm1983_vm6, %v5157_v52, %v2069_v59  ;;  %v1940_v33 = vperm.slane %v1863_v35, 0 }
 0x3e9   :  { %v2111_v40 = vmul.f32 %v2095_v15, %v1743_v58  ;;  %v5210_v18 = vpop.f32.mrf.mxu2  ;;  %v1744_v11 = vadd.f32 0.5, %v1728_v63  ;;  %v2002_v58 = vmin.f32 %v5220_v53, 20.0  ;;  %vm1986_vm11 = vcmp.gt.f32.partialorder %v5220_v53, 20.0 }
 0x3ea   :  { %v2296_v36 = vrot.slane %v2263_v4, 5  ;;  %v2154_v0 = vadd.f32 %v2153_v21, %v2152_v5  ;;  %v1941_v21 = vperm.slane %v1864_v61, 0  ;;  %v1625_v61 = vadd.f32 %v5210_v18, %v5187_v57 }
 0x3eb   :  { %v4038_v6 = vpop.eup %4037  ;;  %v2157_v44 = vsel %vm434_vm1, %v2111_v40, 0.0  ;;  %v1835_v8 = vpop.f32.mrf.mxu3  ;;  %v2026_v35 = vmul.f32 1.442695, %v2002_v58 }
 0x3ec   :  { %v1915_v60 = vpop.f32.mrf.mxu1  ;;  %v4040_v26 = vpop.eup %4039  ;;  %v2155_v52 = vrot.slane %v2154_v0, 1  ;;  %v2158_v42 = vrot.slane %v2157_v44, 4  ;;  %v2049_v27 = vadd.f32 1.0, %v4038_v6  ;;  %v1913_v10 = vadd.f32 %v1912_v50, %v1835_v8 }
 0x3ed   :  { %v2071_v54 = vmul.f32 0.6931472, %v4040_v26  ;;  %v2297_v38 = vsel %vm1333_vm12, %v2296_v36, %v2295_v55  ;;  %v4042_v45 = vpop.eup %4041 }
 0x3ee   :  { %v2156_v31 = vadd.f32 %v2155_v52, %v2154_v0  ;;  %v2159_v24 = vadd.f32 %v2158_v42, %v2157_v44  ;;  %4043 = vlog2.f32 %v2049_v27  ;;  %v5228_v28 = vadd.f32 %v1939_v16, %v1913_v10 }
 0x3ef   :  { %v2096_v34 = vsel %vm1984_vm7, %v5175_v47, %v2071_v54  ;;  %v1729_v59 = vmul.f32 0.5, %v4042_v45  ;;  %v1550_v0 = vrot.slane %v5225_v7, 1  ;;  %v1650_v27 = vperm.slane %v5225_v7, 0 }
 0x3f0   :  { %v2243_v50 = vmul.f32 %v5155_v46, %v2156_v31  ;;  %v2160_v56 = vrot.slane %v2159_v24, 2  ;;  %v2112_v55 = vmul.f32 %v2096_v34, %v1744_v11  ;;  %v2003_v22 = vmin.f32 %v5228_v28, 20.0 }
 0x3f1   :  { %v1627_v62 = vpop.f32.mrf.mxu2  ;;  %v1745_v8 = vadd.f32 0.5, %v1729_v59  ;;  %v1551_v10 = vrot.slane %v5225_v7, 2  ;;  %v1552_v31 = vrot.slane %v5225_v7, 3  ;;  %v1623_v11 = vadd.f32 %v5196_v23, %v5162_v32 }
 0x3f2   :  { %v2264_v47 = vadd.f32 %v5169_v14, %v2243_v50  ;;  %v2161_v13 = vadd.f32 %v2160_v56, %v2159_v24  ;;  %v2164_v5 = vsel %vm434_vm1, %v2112_v55, 0.0  ;;  %v2028_v45 = vmul.f32 1.442695, %v2003_v22 }
 0x3f3   :  { %v2165_v29 = vrot.slane %v2164_v5, 4  ;;  %v1838_v17 = vpop.f32.mrf.mxu3  ;;  %v1651_v50 = vperm.slane %v1550_v0, 0  ;;  %4045 = vpow2.f32 %v2026_v35  ;;  %v1628_v32 = vadd.f32 %v1627_v62, %v5206_v20 }
 0x3f4   :  { %v1917_v4 = vpop.f32.mrf.mxu1  ;;  %v4044_v15 = vpop.eup %4043  ;;  %v2298_v40 = vrot.slane %v2264_v47, 4  ;;  %v2162_v36 = vrot.slane %v2161_v13, 1  ;;  %v1916_v63 = vadd.f32 %v1915_v60, %v1838_v17  ;;  %v1652_v23 = vperm.slane %v1551_v10, 0 }
 0x3f5   :  { %v2166_v6 = vadd.f32 %v2165_v29, %v2164_v5  ;;  %v2073_v44 = vmul.f32 0.6931472, %v4044_v15  ;;  %v1531_v5 = vpop.f32.mrf.mxu0  ;;  %4047 = vpow2.f32 %v2028_v45  ;;  %v1865_v20 = vrot.slane %v5203_v51, 4 }
 0x3f6   :  { %v2163_v25 = vadd.f32 %v2162_v36, %v2161_v13  ;;  %v5238_v39 = vadd.f32 %v1940_v33, %v1916_v63  ;;  %v2299_v26 = vsel %vm1336_vm15, %v2298_v40, %v2297_v38  ;;  %v1682_v33 = vadd.f32 %v1650_v27, %v1623_v11 }
 0x3f7   :  { %v2167_v52 = vrot.slane %v2166_v6, 2  ;;  %v2097_v42 = vsel %vm1985_vm9, %v5190_v30, %v2073_v44  ;;  %v1683_v40 = vadd.f32 %v1651_v50, %v1625_v61  ;;  %v1684_v63 = vadd.f32 %v1652_v23, %v1628_v32 }
 0x3f8   :  { %v2244_v60 = vmul.f32 %v5155_v46, %v2163_v25  ;;  %v2113_v54 = vmul.f32 %v2097_v42, %v1745_v8  ;;  %v2004_v38 = vmin.f32 %v5238_v39, 20.0  ;;  %v1698_v8 = vmul.f32 0.5, %v1682_v33 }
 0x3f9   :  { %v2168_v24 = vadd.f32 %v2167_v52, %v2166_v6  ;;  %v1629_v34 = vpop.f32.mrf.mxu2  ;;  %v1553_v6 = vrot.slane %v5225_v7, 4  ;;  %v4046_v62 = vpop.eup %4045  ;;  %v1699_v52 = vmul.f32 0.5, %v1683_v40  ;;  %v1866_v42 = vrot.slane %v5203_v51, 5 }
 0x3fa   :  { %v2265_v30 = vadd.f32 %v5169_v14, %v2244_v60  ;;  %v2171_v16 = vsel %vm434_vm1, %v2113_v54, 0.0  ;;  %v2030_v47 = vmul.f32 1.442695, %v2004_v38  ;;  %v1630_v22 = vadd.f32 %v1629_v34, %v5230_v37 }
 0x3fb   :  { %v2169_v56 = vrot.slane %v2168_v24, 1  ;;  %v2172_v55 = vrot.slane %v2171_v16, 4  ;;  %v1840_v13 = vpop.f32.mrf.mxu3  ;;  %v4048_v27 = vpop.eup %4047  ;;  %v2050_v45 = vadd.f32 1.0, %v4046_v62  ;;  %v1654_v38 = vperm.slane %v1553_v6, 0 }
 0x3fc   :  { %v2300_v59 = vrot.slane %v2265_v30, 3  ;;  %v1918_v29 = vadd.f32 %v1917_v4, %v1840_v13  ;;  %v1920_v15 = vpop.f32.mrf.mxu1  ;;  %4049 = vpow2.f32 %v2030_v47  ;;  %v1700_v34 = vmul.f32 0.5, %v1684_v63 }
 0x3fd   :  { %v2170_v58 = vadd.f32 %v2169_v56, %v2168_v24  ;;  %v2173_v17 = vadd.f32 %v2172_v55, %v2171_v16  ;;  %v1942_v16 = vperm.slane %v1865_v20, 0  ;;  %v1533_v50 = vpop.f32.mrf.mxu0  ;;  %v1554_v33 = vrot.slane %v5225_v7, 5 }
 0x3fe   :  { %v5254_v57 = vadd.f32 %v1941_v21, %v1918_v29  ;;  %v2301_v18 = vsel %vm1339_vm2, %v2300_v59, %v2299_v26  ;;  %v1653_v26 = vperm.slane %v1552_v31, 0  ;;  %v2051_v31 = vadd.f32 1.0, %v4048_v27 }
 0x3ff   :  { %v2245_v36 = vmul.f32 %v5155_v46, %v2170_v58  ;;  %v2174_v0 = vrot.slane %v2173_v17, 2  ;;  %vm1987_vm13 = vcmp.gt.f32.partialorder %v5228_v28, 20.0  ;;  %vm1988_vm0 = vcmp.gt.f32.partialorder %v5238_v39, 20.0 }
 0x400   :  { %v2005_v25 = vmin.f32 %v5254_v57, 20.0  ;;  %v1685_v61 = vadd.f32 %v1653_v26, %v1630_v22  ;;  %v1868_v22 = vrot.slane %v5203_v51, 7  ;;  %v1555_v26 = vrot.slane %v5225_v7, 6 }
 0x401   :  { %v2266_v4 = vadd.f32 %v5169_v14, %v2245_v36  ;;  %v2175_v44 = vadd.f32 %v2174_v0, %v2173_v17  ;;  %v1632_v21 = vpop.f32.mrf.mxu2  ;;  %v1943_v36 = vperm.slane %v1866_v42, 0  ;;  %vm1989_vm5 = vcmp.gt.f32.partialorder %v5254_v57, 20.0 }
 0x402   :  { %v2032_v54 = vmul.f32 1.442695, %v2005_v25  ;;  %v1633_v10 = vadd.f32 %v1632_v21, %v1531_v5  ;;  %v4050_v11 = vpop.eup %4049  ;;  %v1701_v23 = vmul.f32 0.5, %v1685_v61 }
 0x403   :  { %v2302_v35 = vrot.slane %v2266_v4, 2  ;;  %v2176_v60 = vrot.slane %v2175_v44, 1  ;;  %v1843_v24 = vpop.f32.mrf.mxu3  ;;  %v2052_v13 = vadd.f32 1.0, %v4050_v11 }
 0x404   :  { %v1921_v30 = vadd.f32 %v1920_v15, %v1843_v24  ;;  %4051 = vpow2.f32 %v2032_v54  ;;  %v1686_v5 = vadd.f32 %v1654_v38, %v1633_v10  ;;  %v1922_v59 = vpop.f32.mrf.mxu1 }
 0x405   :  { %v2177_v37 = vadd.f32 %v2176_v60, %v2175_v44  ;;  %4053 = vtanh.f32 %v1698_v8  ;;  %v2303_v55 = vsel %vm1342_vm3, %v2302_v35, %v2301_v18  ;;  %v1867_v44 = vrot.slane %v5203_v51, 6  ;;  %v1536_v27 = vpop.f32.mrf.mxu0 }
 0x406   :  { %v5264_v56 = vadd.f32 %v1942_v16, %v1921_v30  ;;  %4055 = vtanh.f32 %v1699_v52  ;;  %v1702_v40 = vmul.f32 0.5, %v1686_v5  ;;  %v1655_v8 = vperm.slane %v1554_v33, 0 }
 0x407   :  { %v2246_v47 = vmul.f32 %v5155_v46, %v2177_v37  ;;  %4057 = vlog2.f32 %v2050_v45  ;;  %v1944_v11 = vperm.slane %v1867_v44, 0  ;;  %v1656_v30 = vperm.slane %v1555_v26, 0 }
 0x408   :  { %v2006_v32 = vmin.f32 %v5264_v56, 20.0  ;;  %4059 = vtanh.f32 %v1700_v34  ;;  %v1556_v16 = vrot.slane %v5225_v7, 7  ;;  %v1945_v37 = vperm.slane %v1868_v22, 0 }
 0x409   :  { %v1634_v29 = vpop.f32.mrf.mxu2  ;;  %v2267_v58 = vadd.f32 %v5169_v14, %v2246_v47  ;;  %4061 = vlog2.f32 %v2051_v31  ;;  %vm1990_vm6 = vcmp.gt.f32.partialorder %v5264_v56, 20.0 }
 0x40a   :  { %v2034_v17 = vmul.f32 1.442695, %v2006_v32  ;;  %v4052_v15 = vpop.eup %4051  ;;  %4063 = vlog2.f32 %v2052_v13  ;;  %v1635_v20 = vadd.f32 %v1634_v29, %v1533_v50 }
 0x40b   :  { %v1845_v18 = vpop.f32.mrf.mxu3  ;;  %v2304_v0 = vrot.slane %v2267_v58, 1  ;;  %v4054_v63 = vpop.eup %4053  ;;  %v2053_v6 = vadd.f32 1.0, %v4052_v15 }
 0x40c   :  { %4065 = vpow2.f32 %v2034_v17  ;;  %v1923_v62 = vadd.f32 %v1922_v59, %v1845_v18  ;;  %v4056_v4 = vpop.eup %4055  ;;  %v1687_v60 = vadd.f32 %v1655_v8, %v1635_v20  ;;  %v1925_v24 = vpop.f32.mrf.mxu1 }
 0x40d   :  { %4067 = vtanh.f32 %v1701_v23  ;;  %v5274_v25 = vsel %vm1345_vm4, %v2304_v0, %v2303_v55  ;;  %v4058_v21 = vpop.eup %4057  ;;  %v1731_v61 = vmul.f32 0.5, %v4056_v4  ;;  %v1730_v23 = vmul.f32 0.5, %v4054_v63  ;;  %v1538_v4 = vpop.f32.mrf.mxu0 }
 0x40e   :  { %4069 = vlog2.f32 %v2053_v6  ;;  %v5276_v52 = vadd.f32 %v1943_v36, %v1923_v62  ;;  %v4060_v42 = vpop.eup %4059  ;;  %v1703_v59 = vmul.f32 0.5, %v1687_v60  ;;  %v2075_v17 = vmul.f32 0.6931472, %v4058_v21 }
 0x40f   :  { %v4062_v35 = vpop.eup %4061  ;;  %4071 = vtanh.f32 %v1702_v40  ;;  %v1732_v29 = vmul.f32 0.5, %v4060_v42  ;;  %v1747_v36 = vadd.f32 0.5, %v1731_v61  ;;  %v1746_v6 = vadd.f32 0.5, %v1730_v23 }
 0x410   :  { %v2007_v54 = vmin.f32 %v5276_v52, 20.0  ;;  %v4064_v10 = vpop.eup %4063  ;;  %v2077_v50 = vmul.f32 0.6931472, %v4062_v35  ;;  %vm1991_vm7 = vcmp.gt.f32.partialorder %v5276_v52, 20.0 }
 0x411   :  { %v1637_v51 = vpop.f32.mrf.mxu2  ;;  %v2079_v5 = vmul.f32 0.6931472, %v4064_v10  ;;  %v1748_v20 = vadd.f32 0.5, %v1732_v29 }
 0x412   :  { %v4066_v45 = vpop.eup %4065  ;;  %v2036_v38 = vmul.f32 1.442695, %v2007_v54  ;;  %v1638_v55 = vadd.f32 %v1637_v51, %v1536_v27  ;;  %v2099_v15 = vsel %vm1987_vm13, %v5228_v28, %v2077_v50  ;;  %v2098_v28 = vsel %vm1986_vm11, %v5220_v53, %v2075_v17 }
 0x413   :  { %v4068_v34 = vpop.eup %4067  ;;  %v2054_v31 = vadd.f32 1.0, %v4066_v45  ;;  %v1848_v47 = vpop.f32.mrf.mxu3  ;;  %v2100_v0 = vsel %vm1988_vm0, %v5238_v39, %v2079_v5  ;;  %v2115_v21 = vmul.f32 %v2099_v15, %v1747_v36  ;;  %v2114_v61 = vmul.f32 %v2098_v28, %v1746_v6 }
 0x414   :  { %v4070_v13 = vpop.eup %4069  ;;  %4073 = vpow2.f32 %v2036_v38  ;;  %v1926_v32 = vadd.f32 %v1925_v24, %v1848_v47  ;;  %v1733_v40 = vmul.f32 0.5, %v4068_v34  ;;  %v1688_v18 = vadd.f32 %v1656_v30, %v1638_v55  ;;  %v1927_v54 = vpop.f32.mrf.mxu1 }
 0x415   :  { %4075 = vlog2.f32 %v2054_v31  ;;  %v4072_v58 = vpop.eup %4071  ;;  %v2081_v7 = vmul.f32 0.6931472, %v4070_v13  ;;  %v2116_v42 = vmul.f32 %v2100_v0, %v1748_v20  ;;  %v1657_v30 = vperm.slane %v1556_v16, 0  ;;  %v3847_v20 = vld [vmem:[%s5725_s5 + $0x48] sm:$0xff] }
 0x416   :  { %v5283_v33 = vadd.f32 %v1944_v11, %v1926_v32  ;;  %4077 = vtanh.f32 %v1703_v59  ;;  %v1734_v62 = vmul.f32 0.5, %v4072_v58  ;;  %v1749_v27 = vadd.f32 0.5, %v1733_v40  ;;  %2429 = vmatpush.bf16.msra.mxu2 %v3847_v20 }
 0x417   :  { %v2101_v8 = vsel %vm1989_vm5, %v5254_v57, %v2081_v7  ;;  %v1704_v60 = vmul.f32 0.5, %v1688_v18  ;;  %v2185_v50 = vsel %vm434_vm1, %v2115_v21, 0.0  ;;  %v2192_v55 = vsel %vm434_vm1, %v2116_v42, 0.0  ;;  %v3846_v21 = vld [vmem:[%s5725_s5 + $0x40] sm:$0xff] }
 0x418   :  { %v2008_v63 = vmin.f32 %v5283_v33, 20.0  ;;  %v2117_v45 = vmul.f32 %v2101_v8, %v1749_v27  ;;  %v1750_v38 = vadd.f32 0.5, %v1734_v62  ;;  %v2186_v23 = vrot.slane %v2185_v50, 4  ;;  %v3852_v62 = vld [vmem:[%s5725_s5 + $0x58] sm:$0xff] }
 0x419   :  { %v1639_v44 = vpop.f32.mrf.mxu2  ;;  %v2178_v29 = vsel %vm434_vm1, %v2114_v61, 0.0  ;;  %v2193_v58 = vrot.slane %v2192_v55, 4  ;;  %2741 = vmatpush.bf16.msra.mxu1 %v3852_v62  ;;  %vm1992_vm9 = vcmp.gt.f32.partialorder %v5283_v33, 20.0 }
 0x41a   :  { %v4074_v22 = vpop.eup %4073  ;;  %v2038_v26 = vmul.f32 1.442695, %v2008_v63  ;;  %v1640_v51 = vadd.f32 %v1639_v44, %v1538_v4  ;;  %v2199_v5 = vsel %vm434_vm1, %v2117_v45, 0.0  ;;  %v2187_v63 = vadd.f32 %v2186_v23, %v2185_v50  ;;  %2430 = vmatpush.bf16.msra.mxu2 %v3846_v21 }
 0x41b   :  { %v4076_v39 = vpop.eup %4075  ;;  %v2055_v35 = vadd.f32 1.0, %v4074_v22  ;;  %v1850_v10 = vpop.f32.mrf.mxu3  ;;  %v2200_v7 = vrot.slane %v2199_v5, 4  ;;  %v2194_v4 = vadd.f32 %v2193_v58, %v2192_v55  ;;  %v2179_v22 = vrot.slane %v2178_v29, 4 }
 0x41c   :  { %v2083_v24 = vmul.f32 0.6931472, %v4076_v39  ;;  %4079 = vpow2.f32 %v2038_v26  ;;  %v1928_v11 = vadd.f32 %v1927_v54, %v1850_v10  ;;  %v4078_v53 = vpop.eup %4077  ;;  %v1689_v47 = vadd.f32 %v1657_v30, %v1640_v51 }
 0x41d   :  { %4081 = vlog2.f32 %v2055_v35  ;;  %v1735_v59 = vmul.f32 0.5, %v4078_v53  ;;  %v2201_v28 = vadd.f32 %v2200_v7, %v2199_v5  ;;  %v2188_v27 = vrot.slane %v2187_v63, 2 }
 0x41e   :  { %v2102_v57 = vsel %vm1990_vm6, %v5264_v56, %v2083_v24  ;;  %v5296_v34 = vadd.f32 %v1945_v37, %v1928_v11  ;;  %4083 = vtanh.f32 %v1704_v60  ;;  %v1705_v40 = vmul.f32 0.5, %v1689_v47 }
 0x41f   :  { %v2118_v31 = vmul.f32 %v2102_v57, %v1750_v38  ;;  %v1751_v36 = vadd.f32 0.5, %v1735_v59  ;;  %v2195_v54 = vrot.slane %v2194_v4, 2  ;;  %v2180_v24 = vadd.f32 %v2179_v22, %v2178_v29 }
 0x420   :  { %v2009_v13 = vmin.f32 %v5296_v34, 20.0  ;;  %v2202_v51 = vrot.slane %v2201_v28, 2  ;;  %v2189_v30 = vadd.f32 %v2188_v27, %v2187_v63  ;;  %vm1993_vm11 = vcmp.gt.f32.partialorder %v5296_v34, 20.0 }
 0x421   :  { %v2206_v56 = vsel %vm434_vm1, %v2118_v31, 0.0  ;;  %v2196_v31 = vadd.f32 %v2195_v54, %v2194_v4  ;;  %v2181_v47 = vrot.slane %v2180_v24, 2 }
 0x422   :  { %v4080_v32 = vpop.eup %4079  ;;  %v2040_v16 = vmul.f32 1.442695, %v2009_v13  ;;  %v2207_v18 = vrot.slane %v2206_v56, 4  ;;  %v2203_v13 = vadd.f32 %v2202_v51, %v2201_v28  ;;  %v2190_v23 = vrot.slane %v2189_v30, 1 }
 0x423   :  { %v4082_v37 = vpop.eup %4081  ;;  %v2056_v17 = vadd.f32 1.0, %v4080_v32  ;;  %v2197_v29 = vrot.slane %v2196_v31, 1  ;;  %v2182_v58 = vadd.f32 %v2181_v47, %v2180_v24 }
 0x424   :  { %v2085_v15 = vmul.f32 0.6931472, %v4082_v37  ;;  %4085 = vpow2.f32 %v2040_v16  ;;  %v4084_v0 = vpop.eup %4083  ;;  %v2208_v8 = vadd.f32 %v2207_v18, %v2206_v56 }
 0x425   :  { %4087 = vlog2.f32 %v2056_v17  ;;  %v1736_v39 = vmul.f32 0.5, %v4084_v0  ;;  %v2204_v17 = vrot.slane %v2203_v13, 1  ;;  %v2183_v62 = vrot.slane %v2182_v58, 1 }
 0x426   :  { %v2103_v6 = vsel %vm1991_vm7, %v5276_v52, %v2085_v15  ;;  %4089 = vtanh.f32 %v1705_v40  ;;  %v3851_v52 = vld [vmem:[%s5725_s5 + $0x50] sm:$0xff]  ;;  %v2209_v38 = vrot.slane %v2208_v8, 2 }
 0x427   :  { %v2119_v44 = vmul.f32 %v2103_v6, %v1751_v36  ;;  %2742 = vmatpush.bf16.msra.mxu1 %v3851_v52  ;;  %v1752_v53 = vadd.f32 0.5, %v1736_v39  ;;  %v2198_v6 = vadd.f32 %v2197_v29, %v2196_v31  ;;  %v2205_v4 = vadd.f32 %v2204_v17, %v2203_v13 }
 0x428   :  { %v2210_v5 = vadd.f32 %v2209_v38, %v2208_v8 }
 0x429   :  { %v2213_v26 = vsel %vm434_vm1, %v2119_v44, 0.0  ;;  %v2249_v39 = vmul.f32 %v5155_v46, %v2198_v6  ;;  %v2250_v27 = vmul.f32 %v5155_v46, %v2205_v4 }
 0x42a   :  { %v4086_v42 = vpop.eup %4085  ;;  %v2214_v35 = vrot.slane %v2213_v26, 4  ;;  %v2211_v40 = vrot.slane %v2210_v5, 1 }
 0x42b   :  { %v4088_v60 = vpop.eup %4087  ;;  %v2057_v10 = vadd.f32 1.0, %v4086_v42  ;;  %v2184_v42 = vadd.f32 %v2183_v62, %v2182_v58  ;;  %v2270_v51 = vadd.f32 %v5169_v14, %v2249_v39 }
 0x42c   :  { %v2215_v11 = vadd.f32 %v2214_v35, %v2213_v26  ;;  %v2087_v45 = vmul.f32 0.6931472, %v4088_v60  ;;  %v4090_v57 = vpop.eup %4089  ;;  %v2212_v22 = vadd.f32 %v2211_v40, %v2210_v5 }
 0x42d   :  { %4091 = vlog2.f32 %v2057_v10  ;;  %v1737_v32 = vmul.f32 0.5, %v4090_v57  ;;  %v2247_v38 = vmul.f32 %v5155_v46, %v2184_v42 }
 0x42e   :  { %v2216_v61 = vrot.slane %v2215_v11, 2  ;;  %v2104_v50 = vsel %vm1992_vm9, %v5283_v33, %v2087_v45  ;;  %v2191_v33 = vadd.f32 %v2190_v23, %v2189_v30  ;;  %v2251_v60 = vmul.f32 %v5155_v46, %v2212_v22 }
 0x42f   :  { %v2120_v55 = vmul.f32 %v2104_v50, %v1752_v53  ;;  %v1753_v18 = vadd.f32 0.5, %v1737_v32  ;;  %v2322_v45 = vadd.f32 %v5274_v25, %v4990_v19  ;;  %v2271_v53 = vadd.f32 %v5169_v14, %v2250_v27  ;;  %v4224_v27 = vld [vmem:[%s5722_s2 + $0x18] sm:$0xff] }
 0x430   :  { %v2217_v56 = vadd.f32 %v2216_v61, %v2215_v11  ;;  %v2248_v21 = vmul.f32 %v5155_v46, %v2191_v33  ;;  %v2272_v30 = vadd.f32 %v5169_v14, %v2251_v60  ;;  %v2268_v5 = vadd.f32 %v5169_v14, %v2247_v38 }
 0x431   :  { %v2220_v59 = vsel %vm434_vm1, %v2120_v55, 0.0  ;;  %v2308_v55 = vrot.slane %v2270_v51, 6  ;;  %v2326_v13 = vmin.f32 %v2322_v45, 20.0  ;;  %vm2324_vm13 = vcmp.gt.f32.partialorder %v2322_v45, 20.0 }
 0x432   :  { %v2221_v16 = vrot.slane %v2220_v59, 4  ;;  %v2218_v36 = vrot.slane %v2217_v56, 1  ;;  %v2269_v54 = vadd.f32 %v5169_v14, %v2248_v21  ;;  %v2312_v19 = vrot.slane %v2272_v30, 4 }
 0x433   :  { %v4092_v37 = vpop.eup %4091  ;;  %v2328_v29 = vmul.f32 1.442695, %v2326_v13 }
 0x434   :  { %v2222_v7 = vadd.f32 %v2221_v16, %v2220_v59  ;;  %v2089_v15 = vmul.f32 0.6931472, %v4092_v37  ;;  %v2219_v52 = vadd.f32 %v2218_v36, %v2217_v56  ;;  %v2306_v61 = vrot.slane %v2269_v54, 7  ;;  %v4225_v54 = vld [vmem:[%s5722_s2 + $0x20] sm:$0xff] }
 0x435   :  { %v2310_v59 = vrot.slane %v2271_v53, 5  ;;  %4093 = vpow2.f32 %v2328_v29 }
 0x436   :  { %v2223_v0 = vrot.slane %v2222_v7, 2  ;;  %v2105_v63 = vsel %vm1993_vm11, %v5296_v34, %v2089_v15  ;;  %v2252_v10 = vmul.f32 %v5155_v46, %v2219_v52  ;;  %v2307_v25 = vsel %vm1327_vm8, %v2306_v61, %v2268_v5  ;;  %v3855_v52 = vld [vmem:[%s5727_s7 + $0x28] sm:$0xff] }
 0x437   :  { %v2121_v20 = vmul.f32 %v2105_v63, %v1753_v18  ;;  %v2309_v16 = vsel %vm1330_vm10, %v2308_v55, %v2307_v25  ;;  %2770 = vmatpush.bf16.msrb.mxu1 %v3855_v52 }
 0x438   :  { %v2224_v44 = vadd.f32 %v2223_v0, %v2222_v7  ;;  %v2273_v50 = vadd.f32 %v5169_v14, %v2252_v10  ;;  %v2311_v17 = vsel %vm1333_vm12, %v2310_v59, %v2309_v16 }
 0x439   :  { %v2227_v28 = vsel %vm434_vm1, %v2121_v20, 0.0  ;;  %v2313_v7 = vsel %vm1336_vm15, %v2312_v19, %v2311_v17 }
 0x43a   :  { %v2225_v8 = vrot.slane %v2224_v44, 1  ;;  %v2228_v26 = vrot.slane %v2227_v28, 4  ;;  %v2314_v23 = vrot.slane %v2273_v50, 3 }
 0x43b   :  { %v4094_v0 = vpop.eup %4093 }
 0x43c   :  { %v2226_v35 = vadd.f32 %v2225_v8, %v2224_v44  ;;  %v2229_v34 = vadd.f32 %v2228_v26, %v2227_v28  ;;  %v2315_v15 = vsel %vm1339_vm2, %v2314_v23, %v2313_v7  ;;  %v2332_v6 = vadd.f32 1.0, %v4094_v0  ;;  %v4223_v26 = vld [vmem:[%s5722_s2 + $0x10] sm:$0xff] }
 0x43e   :  { %v2230_v24 = vrot.slane %v2229_v34, 2  ;;  %v2253_v11 = vmul.f32 %v5155_v46, %v2226_v35 }
 0x440   :  { %v2231_v57 = vadd.f32 %v2230_v24, %v2229_v34  ;;  %v2274_v47 = vadd.f32 %v5169_v14, %v2253_v11  ;;  %v4226_v11 = vld [vmem:[%s5722_s2 + $0x28] sm:$0xff] }
 0x442   :  { %v2232_v31 = vrot.slane %v2231_v57, 1  ;;  %v2316_v37 = vrot.slane %v2274_v47, 2 }
 0x444   :  { %v2233_v32 = vadd.f32 %v2232_v31, %v2231_v57  ;;  %v2317_v18 = vsel %vm1342_vm3, %v2316_v37, %v2315_v15  ;;  %v4227_v57 = vld [vmem:[%s5722_s2 + $0x30] sm:$0xff]  ;;  %v4228_v31 = vld [vmem:[%s5722_s2 + $0x38] sm:$0xff] }
 0x446   :  { %v2254_v56 = vmul.f32 %v5155_v46, %v2233_v32 }
 0x448   :  { %v2275_v58 = vadd.f32 %v5169_v14, %v2254_v56 }
 0x44a   :  { %v2318_v40 = vrot.slane %v2275_v58, 1 }
 0x44c   :  { %v2319_v33 = vsel %vm1345_vm4, %v2318_v40, %v2317_v18  ;;  %v5453_v40 = vld [vmem:[#allocation7 + $0x5] ss:$0 sm:$0xff] }
 0x44d   :  { %v2323_v46 = vadd.f32 %v2319_v33, %v4992_v41 }
 0x44f   :  { %v2327_v36 = vmin.f32 %v2323_v46, 20.0  ;;  %vm2325_vm0 = vcmp.gt.f32.partialorder %v2323_v46, 20.0 }
 0x451   :  { %v2330_v63 = vmul.f32 1.442695, %v2327_v36 }
 0x453   :  { %4095 = vpow2.f32 %v2330_v63 }
 0x454   :  { %4097 = vlog2.f32 %v2332_v6 }
 0x459   :  { %v4096_v14 = vpop.eup %4095 }
 0x45a   :  { %v2333_v20 = vadd.f32 1.0, %v4096_v14  ;;  %v4098_v62 = vpop.eup %4097 }
 0x45b   :  { %v2335_v4 = vmul.f32 0.6931472, %v4098_v62 }
 0x45c   :  { %4099 = vlog2.f32 %v2333_v20 }
 0x45d   :  { %v5351_v28 = vsel %vm2324_vm13, %v2322_v45, %v2335_v4 }
 0x462   :  { %v4100_v44 = vpop.eup %4099 }
 0x463   :  { %v2337_v22 = vmul.f32 0.6931472, %v4100_v44 }
 0x465   :  { %v5353_v21 = vsel %vm2325_vm0, %v2323_v46, %v2337_v22  ;;  %v5458_v46 = vld [vmem:[#allocation7 + $0x4] ss:$0 sm:$0xff] }
 0x466   :  { %v2340_v41 = vpack.c.bf16 %v5353_v21, %v5351_v28 }
 0x468   :  { %2348 = vmatpush.bf16.msra.mxu0 %v2340_v41  ;;  %3706 = vmatmul.msk.bf16.vlgmr.msra.gmra.mxu2 %vm434_vm1, %v2340_v41 }
 0x469   :  { %3753 = vmatmul.msk.bf16.vlgmr.msra.gmra.mxu1 %vm434_vm1, %v2340_v41 }
 0x46b   :  { %3686 = vmatmul.msk.bf16.vlgmr.msra.gmra.mxu0 %vm332_vm14, %v4606_v1  ;;  %v3850_v1 = vld [vmem:[%s5727_s7 + $0x20] sm:$0xff] }
 0x46c   :  { %2458 = vmatpush.bf16.msrb.mxu2 %v3850_v1 }
 0x47b   :  { %3687 = vmatmul.msk.bf16.gmra.mxu0 %vm332_vm14, %v4630_v9  ;;  %v3853_v9 = vld [vmem:[%s5726_s6 + $0x50] sm:$0xff] }
 0x48b   :  { %3688 = vmatmul.msk.bf16.gmra.mxu0 %vm332_vm14, %v4641_v12  ;;  %v4222_v12 = vld [vmem:[%s5722_s2 + $0x8] sm:$0xff] }
 0x49b   :  { %3689 = vmatmul.msk.bf16.gmra.mxu0 %vm332_vm14, %v4574_v43  ;;  %v3849_v43 = vld [vmem:[%s5726_s6 + $0x48] sm:$0xff] }
 0x49c   :  { %2558 = vmatpush.bf16.msra.mxu3 %v3849_v43 }
 0x4ab   :  { %3690 = vmatmul.msk.bf16.gmra.mxu0 %vm332_vm14, %v4580_v48  ;;  %v3854_v48 = vld [vmem:[%s5726_s6 + $0x58] sm:$0xff] }
 0x4ac   :  { %2846 = vmatpush.bf16.msrb.mxu0 %v3854_v48 }
 0x4b0   :  { %2847 = vmatpush.bf16.msrb.mxu0 %v3853_v9 }
 0x4bb   :  { %3691 = vmatmul.msk.bf16.gmra.mxu0 %vm332_vm14, %v4582_v49  ;;  %v4221_v49 = vld [vmem:[%s5722_s2] sm:$0xff] }
 0x4bc   :  { %3764 = vmatmul.msk.bf16.vlgmr.msrb.gmra.mxu1 %vm332_vm14, %v4221_v49  ;;  %3717 = vmatmul.msk.bf16.vlgmr.msrb.gmra.mxu2 %vm332_vm14, %v4221_v49 }
 0x4cb   :  { %3692 = vmatmul.msk.bf16.gmra.mxu0 %vm332_vm14, %v4610_v3  ;;  %v3848_v3 = vld [vmem:[%s5726_s6 + $0x40] sm:$0xff] }
 0x4cc   :  { %2559 = vmatpush.bf16.msra.mxu3 %v3848_v3  ;;  %3765 = vmatmul.msk.bf16.gmra.mxu1 %vm332_vm14, %v4222_v12 }
 0x4cd   :  { %3718 = vmatmul.msk.bf16.gmra.mxu2 %vm332_vm14, %v4222_v12 }
 0x4db   :  { %3693 = vmatmul.msk.bf16.gmra.mxu0 %vm332_vm14, %v4608_v2 }
 0x4dc   :  { %3766 = vmatmul.msk.bf16.gmra.mxu1 %vm332_vm14, %v4223_v26 }
 0x4dd   :  { %3719 = vmatmul.msk.bf16.gmra.mxu2 %vm332_vm14, %v4223_v26 }
 0x4e6   :  { %v2744_v55 = vpop.f32.mrf.mxu1 }
 0x4e7   :  { %v5456_v33 = vadd.f32 %v5453_v40, %v2744_v55 }
 0x4e8   :  { %v2350_v8 = vpop.f32.mrf.mxu0 }
 0x4e9   :  { %v2889_v6 = vperm.slane %v5456_v33, 0  ;;  %v2814_v4 = vrot.slane %v5456_v33, 1 }
 0x4eb   :  { %v2432_v59 = vpop.f32.mrf.mxu2  ;;  %v2890_v3 = vperm.slane %v2814_v4, 0 }
 0x4ec   :  { %3767 = vmatmul.msk.bf16.gmra.mxu1 %vm332_vm14, %v4224_v27  ;;  %v5462_v14 = vadd.f32 %v5458_v46, %v2432_v59 }
 0x4ed   :  { %3720 = vmatmul.msk.bf16.gmra.mxu2 %vm332_vm14, %v4224_v27 }
 0x4ee   :  { %v5445_v32 = vpop.f32.mrf.mxu1  ;;  %v2601_v1 = vperm.slane %v5462_v14, 0  ;;  %v2502_v26 = vrot.slane %v5462_v14, 1 }
 0x4f0   :  { %v2352_v39 = vpop.f32.mrf.mxu0 }
 0x4f1   :  { %v2390_v42 = vpack.c.bf16 %v2352_v39, %v2350_v8 }
 0x4f3   :  { %3733 = vmatmul.msk.bf16.vlgmr.msra.gmra.mxu3 %vm434_vm1, %v2390_v42  ;;  %3780 = vmatmul.msk.bf16.vlgmr.msrb.gmra.mxu0 %vm434_vm1, %v2390_v42  ;;  %v5447_v56 = vpop.f32.mrf.mxu2  ;;  %v2815_v42 = vrot.slane %v5456_v33, 2 }
 0x4f8   :  { %v2355_v2 = vpop.f32.mrf.mxu0 }
 0x4fc   :  { %3768 = vmatmul.msk.bf16.gmra.mxu1 %vm332_vm14, %v4225_v54 }
 0x4fd   :  { %3721 = vmatmul.msk.bf16.gmra.mxu2 %vm332_vm14, %v4225_v54 }
 0x500   :  { %v2357_v35 = vpop.f32.mrf.mxu0 }
 0x501   :  { %v2391_v34 = vpack.c.bf16 %v2357_v35, %v2355_v2 }
 0x503   :  { %3734 = vmatmul.msk.bf16.gmra.mxu3 %vm434_vm1, %v2391_v34  ;;  %3781 = vmatmul.msk.bf16.gmra.mxu0 %vm434_vm1, %v2391_v34 }
 0x508   :  { %v2360_v60 = vpop.f32.mrf.mxu0 }
 0x50c   :  { %3769 = vmatmul.msk.bf16.gmra.mxu1 %vm332_vm14, %v4226_v11 }
 0x50d   :  { %3722 = vmatmul.msk.bf16.gmra.mxu2 %vm332_vm14, %v4226_v11 }
 0x510   :  { %v2362_v10 = vpop.f32.mrf.mxu0 }
 0x511   :  { %v2392_v24 = vpack.c.bf16 %v2362_v10, %v2360_v60  ;;  %v2602_v60 = vperm.slane %v2502_v26, 0 }
 0x513   :  { %3735 = vmatmul.msk.bf16.gmra.mxu3 %vm434_vm1, %v2392_v24  ;;  %3782 = vmatmul.msk.bf16.gmra.mxu0 %vm434_vm1, %v2392_v24 }
 0x518   :  { %v2365_v51 = vpop.f32.mrf.mxu0 }
 0x51c   :  { %3770 = vmatmul.msk.bf16.gmra.mxu1 %vm332_vm14, %v4227_v57 }
 0x51d   :  { %3723 = vmatmul.msk.bf16.gmra.mxu2 %vm332_vm14, %v4227_v57 }
 0x520   :  { %v2367_v45 = vpop.f32.mrf.mxu0 }
 0x521   :  { %v2393_v38 = vpack.c.bf16 %v2367_v45, %v2365_v51  ;;  %v2891_v45 = vperm.slane %v2815_v42, 0 }
 0x523   :  { %3736 = vmatmul.msk.bf16.gmra.mxu3 %vm434_vm1, %v2393_v38  ;;  %3783 = vmatmul.msk.bf16.gmra.mxu0 %vm434_vm1, %v2393_v38 }
 0x528   :  { %v2370_v53 = vpop.f32.mrf.mxu0 }
 0x52c   :  { %3771 = vmatmul.msk.bf16.gmra.mxu1 %vm332_vm14, %v4228_v31 }
 0x52d   :  { %3724 = vmatmul.msk.bf16.gmra.mxu2 %vm332_vm14, %v4228_v31 }
 0x530   :  { %v2372_v30 = vpop.f32.mrf.mxu0 }
 0x531   :  { %v2394_v61 = vpack.c.bf16 %v2372_v30, %v2370_v53  ;;  %v2503_v30 = vrot.slane %v5462_v14, 2 }
 0x533   :  { %3737 = vmatmul.msk.bf16.gmra.mxu3 %vm434_vm1, %v2394_v61  ;;  %3784 = vmatmul.msk.bf16.gmra.mxu0 %vm434_vm1, %v2394_v61  ;;  %v2816_v61 = vrot.slane %v5456_v33, 3 }
 0x538   :  { %v2375_v50 = vpop.f32.mrf.mxu0 }
 0x539   :  { %v2772_v23 = vpop.f32.mrf.mxu1 }
 0x53f   :  { %v2460_v37 = vpop.f32.mrf.mxu2 }
 0x540   :  { %v2377_v47 = vpop.f32.mrf.mxu0 }
 0x541   :  { %v2395_v13 = vpack.c.bf16 %v2377_v47, %v2375_v50  ;;  %v2774_v29 = vpop.f32.mrf.mxu1 }
 0x543   :  { %3738 = vmatmul.msk.bf16.gmra.mxu3 %vm434_vm1, %v2395_v13  ;;  %3785 = vmatmul.msk.bf16.gmra.mxu0 %vm434_vm1, %v2395_v13 }
 0x547   :  { %v2462_v7 = vpop.f32.mrf.mxu2 }
 0x548   :  { %v2380_v5 = vpop.f32.mrf.mxu0 }
 0x549   :  { %v2777_v15 = vpop.f32.mrf.mxu1 }
 0x550   :  { %v2382_v19 = vpop.f32.mrf.mxu0  ;;  %v2465_v18 = vpop.f32.mrf.mxu2 }
 0x551   :  { %v2396_v25 = vpack.c.bf16 %v2382_v19, %v2380_v5  ;;  %v2779_v0 = vpop.f32.mrf.mxu1  ;;  %v2603_v19 = vperm.slane %v2503_v30, 0 }
 0x553   :  { %3739 = vmatmul.msk.bf16.gmra.mxu3 %vm434_vm1, %v2396_v25  ;;  %3786 = vmatmul.msk.bf16.gmra.mxu0 %vm434_vm1, %v2396_v25 }
 0x558   :  { %v2385_v16 = vpop.f32.mrf.mxu0  ;;  %v5465_v22 = vpop.f32.mrf.mxu2 }
 0x559   :  { %v5468_v9 = vpop.f32.mrf.mxu1 }
 0x560   :  { %v2387_v58 = vpop.f32.mrf.mxu0  ;;  %v5475_v24 = vpop.f32.mrf.mxu2 }
 0x561   :  { %v2397_v17 = vpack.c.bf16 %v2387_v58, %v2385_v16  ;;  %v5481_v50 = vpop.f32.mrf.mxu1 }
 0x563   :  { %3740 = vmatmul.msk.bf16.gmra.mxu3 %vm434_vm1, %v2397_v17  ;;  %3787 = vmatmul.msk.bf16.gmra.mxu0 %vm434_vm1, %v2397_v17 }
 0x570   :  { %v2849_v36 = vpop.f32.mrf.mxu0 }
 0x571   :  { %v2850_v63 = vadd.f32 %v2849_v36, %v2772_v23 }
 0x573   :  { %v2921_v20 = vadd.f32 %v2889_v6, %v2850_v63 }
 0x575   :  { %v2953_v62 = vmin.f32 %v2921_v20, 20.0  ;;  %vm2937_vm5 = vcmp.gt.f32.partialorder %v2921_v20, 20.0 }
 0x576   :  { %v2561_v44 = vpop.f32.mrf.mxu3 }
 0x577   :  { %v2969_v41 = vmul.f32 1.442695, %v2953_v62  ;;  %v2562_v52 = vadd.f32 %v2561_v44, %v2460_v37  ;;  %v2892_v37 = vperm.slane %v2816_v61, 0  ;;  %v2817_v44 = vrot.slane %v5456_v33, 4 }
 0x578   :  { %v2851_v43 = vpop.f32.mrf.mxu0 }
 0x579   :  { %4101 = vpow2.f32 %v2969_v41  ;;  %v2633_v48 = vadd.f32 %v2601_v1, %v2562_v52  ;;  %v2852_v49 = vadd.f32 %v2851_v43, %v2774_v29  ;;  %v5492_v43 = vpop.f32.mrf.mxu1 }
 0x57b   :  { %v2649_v12 = vmul.f32 0.5, %v2633_v48  ;;  %v5470_v8 = vadd.f32 %v2890_v3, %v2852_v49 }
 0x57d   :  { %4103 = vtanh.f32 %v2649_v12  ;;  %v2954_v39 = vmin.f32 %v5470_v8, 20.0  ;;  %vm2938_vm6 = vcmp.gt.f32.partialorder %v5470_v8, 20.0 }
 0x57e   :  { %v2563_v2 = vpop.f32.mrf.mxu3 }
 0x57f   :  { %v4102_v27 = vpop.eup %4101  ;;  %v2971_v35 = vmul.f32 1.442695, %v2954_v39  ;;  %v2564_v34 = vadd.f32 %v2563_v2, %v2462_v7  ;;  %v2893_v2 = vperm.slane %v2817_v44, 0 }
 0x580   :  { %v3001_v54 = vadd.f32 1.0, %v4102_v27  ;;  %v2854_v10 = vpop.f32.mrf.mxu0 }
 0x581   :  { %4105 = vpow2.f32 %v2971_v35  ;;  %v2634_v51 = vadd.f32 %v2602_v60, %v2564_v34  ;;  %v2855_v11 = vadd.f32 %v2854_v10, %v2777_v15  ;;  %v5484_v15 = vpop.f32.mrf.mxu2 }
 0x582   :  { %4107 = vlog2.f32 %v3001_v54 }
 0x583   :  { %v4104_v38 = vpop.eup %4103  ;;  %v2650_v53 = vmul.f32 0.5, %v2634_v51  ;;  %v5477_v57 = vadd.f32 %v2891_v45, %v2855_v11  ;;  %v2505_v45 = vrot.slane %v5462_v14, 4 }
 0x584   :  { %v2681_v55 = vmul.f32 0.5, %v4104_v38 }
 0x585   :  { %4109 = vtanh.f32 %v2650_v53  ;;  %v2955_v31 = vmin.f32 %v5477_v57, 20.0  ;;  %vm2939_vm7 = vcmp.gt.f32.partialorder %v5477_v57, 20.0 }
 0x586   :  { %v2566_v47 = vpop.f32.mrf.mxu3  ;;  %v2697_v7 = vadd.f32 0.5, %v2681_v55 }
 0x587   :  { %v4106_v13 = vpop.eup %4105  ;;  %v2973_v5 = vmul.f32 1.442695, %v2955_v31  ;;  %v2567_v59 = vadd.f32 %v2566_v47, %v2465_v18  ;;  %v2504_v18 = vrot.slane %v5462_v14, 3  ;;  %v2818_v31 = vrot.slane %v5456_v33, 5 }
 0x588   :  { %v4108_v25 = vpop.eup %4107  ;;  %v3002_v23 = vadd.f32 1.0, %v4106_v13  ;;  %v2856_v16 = vpop.f32.mrf.mxu0 }
 0x589   :  { %v3018_v29 = vmul.f32 0.6931472, %v4108_v25  ;;  %4111 = vpow2.f32 %v2973_v5  ;;  %v2635_v58 = vadd.f32 %v2603_v19, %v2567_v59  ;;  %v2857_v17 = vadd.f32 %v2856_v16, %v2779_v0  ;;  %v5501_v30 = vpop.f32.mrf.mxu2 }
 0x58a   :  { %4113 = vlog2.f32 %v3002_v23  ;;  %v2604_v12 = vperm.slane %v2504_v18, 0  ;;  %v2605_v19 = vperm.slane %v2505_v45, 0 }
 0x58b   :  { %v4110_v36 = vpop.eup %4109  ;;  %v3049_v63 = vsel %vm2937_vm5, %v2921_v20, %v3018_v29  ;;  %v2651_v6 = vmul.f32 0.5, %v2635_v58  ;;  %v5486_v62 = vadd.f32 %v2892_v37, %v2857_v17  ;;  %v5507_v58 = vpop.f32.mrf.mxu1  ;;  %v2819_v17 = vrot.slane %v5456_v33, 6 }
 0x58c   :  { %v3065_v4 = vmul.f32 %v3049_v63, %v2697_v7  ;;  %v2682_v52 = vmul.f32 0.5, %v4110_v36 }
 0x58d   :  { %4115 = vtanh.f32 %v2651_v6  ;;  %v2956_v41 = vmin.f32 %v5486_v62, 20.0  ;;  %v2894_v6 = vperm.slane %v2818_v31, 0  ;;  %vm2940_vm9 = vcmp.gt.f32.partialorder %v5486_v62, 20.0  ;;  %v5530_v31 = vld [vmem:[%s5730_s10 + $0x2] ss:$0 sm:$0xff] }
 0x58e   :  { %v3081_v0 = vsel %vm434_vm1, %v3065_v4, 0.0  ;;  %v2568_v1 = vpop.f32.mrf.mxu3  ;;  %v2698_v60 = vadd.f32 0.5, %v2682_v52 }
 0x58f   :  { %v4112_v48 = vpop.eup %4111  ;;  %v3082_v49 = vrot.slane %v3081_v0, 4  ;;  %v2975_v20 = vmul.f32 1.442695, %v2956_v41  ;;  %v2569_v3 = vadd.f32 %v2568_v1, %v5465_v22  ;;  %v5514_v1 = vld [vmem:[#allocation8 + $0x2] ss:$0 sm:$0xff] }
 0x590   :  { %v4114_v26 = vpop.eup %4113  ;;  %v3003_v39 = vadd.f32 1.0, %v4112_v48  ;;  %v2859_v42 = vpop.f32.mrf.mxu0 }
 0x591   :  { %v3083_v27 = vadd.f32 %v3082_v49, %v3081_v0  ;;  %v3020_v35 = vmul.f32 0.6931472, %v4114_v26  ;;  %4117 = vpow2.f32 %v2975_v20  ;;  %v2636_v34 = vadd.f32 %v2604_v12, %v2569_v3 }
 0x592   :  { %4119 = vlog2.f32 %v3003_v39  ;;  %v2860_v54 = vadd.f32 %v2859_v42, %v5468_v9  ;;  %v2506_v0 = vrot.slane %v5462_v14, 5  ;;  %v2820_v12 = vrot.slane %v5456_v33, 7 }
 0x593   :  { %v4116_v10 = vpop.eup %4115  ;;  %v3084_v51 = vrot.slane %v3083_v27, 2  ;;  %v3050_v11 = vsel %vm2938_vm6, %v5470_v8, %v3020_v35  ;;  %v2652_v22 = vmul.f32 0.5, %v2636_v34  ;;  %v2895_v42 = vperm.slane %v2819_v17, 0 }
 0x594   :  { %v3066_v38 = vmul.f32 %v3050_v11, %v2698_v60  ;;  %v5499_v53 = vadd.f32 %v2893_v2, %v2860_v54  ;;  %v2683_v47 = vmul.f32 0.5, %v4116_v10  ;;  %v2606_v33 = vperm.slane %v2506_v0, 0 }
 0x595   :  { %v3085_v61 = vadd.f32 %v3084_v51, %v3083_v27  ;;  %4121 = vtanh.f32 %v2652_v22  ;;  %v2507_v51 = vrot.slane %v5462_v14, 6 }
 0x596   :  { %v3088_v55 = vsel %vm434_vm1, %v3066_v38, 0.0  ;;  %v2957_v9 = vmin.f32 %v5499_v53, 20.0  ;;  %v2571_v13 = vpop.f32.mrf.mxu3  ;;  %v2699_v18 = vadd.f32 0.5, %v2683_v47  ;;  %vm2941_vm11 = vcmp.gt.f32.partialorder %v5499_v53, 20.0 }
 0x597   :  { %v4118_v5 = vpop.eup %4117  ;;  %v3089_v8 = vrot.slane %v3088_v55, 4  ;;  %v2572_v59 = vadd.f32 %v2571_v13, %v5475_v24  ;;  %v3086_v23 = vrot.slane %v3085_v61, 1  ;;  %v5533_v13 = vpop.f32.mrf.mxu1 }
 0x598   :  { %v4120_v25 = vpop.eup %4119  ;;  %v3004_v16 = vadd.f32 1.0, %v4118_v5  ;;  %v2977_v37 = vmul.f32 1.442695, %v2957_v9  ;;  %v2861_v29 = vpop.f32.mrf.mxu0 }
 0x599   :  { %v3090_v7 = vadd.f32 %v3089_v8, %v3088_v55  ;;  %v3022_v36 = vmul.f32 0.6931472, %v4120_v25  ;;  %v2637_v63 = vadd.f32 %v2605_v19, %v2572_v59  ;;  %v2862_v24 = vadd.f32 %v2861_v29, %v5481_v50 }
 0x59a   :  { %4123 = vlog2.f32 %v3004_v16  ;;  %v3087_v52 = vadd.f32 %v3086_v23, %v3085_v61 }
 0x59b   :  { %v4122_v4 = vpop.eup %4121  ;;  %v3091_v44 = vrot.slane %v3090_v7, 2  ;;  %v3051_v41 = vsel %vm2939_vm7, %v5477_v57, %v3022_v36  ;;  %4125 = vpow2.f32 %v2977_v37  ;;  %v2653_v49 = vmul.f32 0.5, %v2637_v63  ;;  %v5520_v57 = vpop.f32.mrf.mxu2 }
 0x59c   :  { %v3067_v48 = vmul.f32 %v3051_v41, %v2699_v18  ;;  %v5516_v20 = vadd.f32 %v2894_v6, %v2862_v24  ;;  %v2684_v50 = vmul.f32 0.5, %v4122_v4  ;;  %v3198_v54 = vmul.f32 %v5514_v1, %v3087_v52 }
 0x59d   :  { %v3092_v3 = vadd.f32 %v3091_v44, %v3090_v7  ;;  %4127 = vtanh.f32 %v2653_v49  ;;  %v2896_v63 = vperm.slane %v2820_v12, 0  ;;  %v2607_v41 = vperm.slane %v2507_v51, 0 }
 0x59e   :  { %v3095_v26 = vsel %vm434_vm1, %v3067_v48, 0.0  ;;  %v2573_v39 = vpop.f32.mrf.mxu3  ;;  %v2958_v35 = vmin.f32 %v5516_v20, 20.0  ;;  %vm2942_vm13 = vcmp.gt.f32.partialorder %v5516_v20, 20.0 }
 0x59f   :  { %v3093_v2 = vrot.slane %v3092_v3, 1  ;;  %v3096_v27 = vrot.slane %v3095_v26, 4  ;;  %v2574_v34 = vadd.f32 %v2573_v39, %v5484_v15  ;;  %v2700_v15 = vadd.f32 0.5, %v2684_v50 }
 0x5a0   :  { %v4124_v60 = vpop.eup %4123  ;;  %v2864_v10 = vpop.f32.mrf.mxu0  ;;  %v2979_v61 = vmul.f32 1.442695, %v2958_v35 }
 0x5a1   :  { %v4126_v11 = vpop.eup %4125  ;;  %v3094_v22 = vadd.f32 %v3093_v2, %v3092_v3  ;;  %v3097_v45 = vadd.f32 %v3096_v27, %v3095_v26  ;;  %v3024_v38 = vmul.f32 0.6931472, %v4124_v60  ;;  %v2638_v47 = vadd.f32 %v2606_v33, %v2574_v34  ;;  %v2794_v33 = vpop.f32.mrf.mxu1 }
 0x5a2   :  { %v3005_v55 = vadd.f32 1.0, %v4126_v11  ;;  %v2865_v9 = vadd.f32 %v2864_v10, %v5492_v43  ;;  %4129 = vpow2.f32 %v2979_v61  ;;  %v3219_v43 = vadd.f32 %v5530_v31, %v3198_v54 }
 0x5a3   :  { %v3199_v5 = vmul.f32 %v5514_v1, %v3094_v22  ;;  %v3098_v8 = vrot.slane %v3097_v45, 2  ;;  %v3052_v59 = vsel %vm2940_vm9, %v5486_v62, %v3024_v38  ;;  %v4128_v19 = vpop.eup %4127  ;;  %v2654_v23 = vmul.f32 0.5, %v2638_v47  ;;  %v5546_v52 = vpop.f32.mrf.mxu2 }
 0x5a4   :  { %v3068_v25 = vmul.f32 %v3052_v59, %v2700_v15  ;;  %4131 = vlog2.f32 %v3005_v55  ;;  %v5539_v16 = vadd.f32 %v2895_v42, %v2865_v9  ;;  %v2685_v24 = vmul.f32 0.5, %v4128_v19 }
 0x5a5   :  { %v3220_v37 = vadd.f32 %v5530_v31, %v3199_v5  ;;  %v3099_v29 = vadd.f32 %v3098_v8, %v3097_v45  ;;  %4133 = vtanh.f32 %v2654_v23  ;;  %v2508_v2 = vrot.slane %v5462_v14, 7 }
 0x5a6   :  { %v3102_v17 = vsel %vm434_vm1, %v3068_v25, 0.0  ;;  %v2959_v7 = vmin.f32 %v5539_v16, 20.0  ;;  %v2576_v36 = vpop.f32.mrf.mxu3  ;;  %v2701_v60 = vadd.f32 0.5, %v2685_v24  ;;  %v5560_v38 = vadd.f32 %v5453_v40, %v5445_v32 }
 0x5a7   :  { %v3251_v6 = vrot.slane %v3220_v37, 7  ;;  %v3100_v62 = vrot.slane %v3099_v29, 1  ;;  %v3103_v18 = vrot.slane %v3102_v17, 4  ;;  %v2577_v44 = vadd.f32 %v2576_v36, %v5501_v30 }
 0x5a8   :  { %v2981_v4 = vmul.f32 1.442695, %v2959_v7  ;;  %v2866_v0 = vpop.f32.mrf.mxu0  ;;  %v4130_v48 = vpop.eup %4129  ;;  %v2608_v59 = vperm.slane %v2508_v2, 0  ;;  %vm2943_vm0 = vcmp.gt.f32.partialorder %v5539_v16, 20.0 }
 0x5a9   :  { %v3252_v49 = vsel %vm1327_vm8, %v3251_v6, %v3219_v43  ;;  %v3101_v3 = vadd.f32 %v3100_v62, %v3099_v29  ;;  %v3104_v26 = vadd.f32 %v3103_v18, %v3102_v17  ;;  %v2867_v50 = vadd.f32 %v2866_v0, %v5507_v58  ;;  %v2797_v0 = vpop.f32.mrf.mxu1 }
 0x5aa   :  { %v4132_v12 = vpop.eup %4131  ;;  %v3006_v39 = vadd.f32 1.0, %v4130_v48  ;;  %4135 = vpow2.f32 %v2981_v4  ;;  %v2639_v42 = vadd.f32 %v2607_v41, %v2577_v44  ;;  %v2821_v6 = vrot.slane %v5560_v38, 1 }
 0x5ab   :  { %v3200_v27 = vmul.f32 %v5514_v1, %v3101_v3  ;;  %v3105_v30 = vrot.slane %v3104_v26, 2  ;;  %v3026_v35 = vmul.f32 0.6931472, %v4132_v12  ;;  %v5552_v34 = vadd.f32 %v2896_v63, %v2867_v50  ;;  %v4134_v10 = vpop.eup %4133  ;;  %v5565_v40 = vpop.f32.mrf.mxu2 }
 0x5ac   :  { %4137 = vlog2.f32 %v3006_v39  ;;  %v2655_v54 = vmul.f32 0.5, %v2639_v42  ;;  %v2686_v5 = vmul.f32 0.5, %v4134_v10  ;;  %v2897_v12 = vperm.slane %v5560_v38, 0 }
 0x5ad   :  { %v3221_v58 = vadd.f32 %v5530_v31, %v3200_v27  ;;  %v3106_v51 = vadd.f32 %v3105_v30, %v3104_v26  ;;  %v3053_v11 = vsel %vm2941_vm11, %v5499_v53, %v3026_v35  ;;  %v2960_v14 = vmin.f32 %v5552_v34, 20.0 }
 0x5ae   :  { %v3069_v22 = vmul.f32 %v3053_v11, %v2701_v60  ;;  %4139 = vtanh.f32 %v2655_v54  ;;  %v2578_v45 = vpop.f32.mrf.mxu3  ;;  %v2702_v36 = vadd.f32 0.5, %v2686_v5  ;;  %v2898_v42 = vperm.slane %v2821_v6, 0 }
 0x5af   :  { %v3253_v61 = vrot.slane %v3221_v58, 6  ;;  %v3107_v15 = vrot.slane %v3106_v51, 1  ;;  %v2579_v55 = vadd.f32 %v2578_v45, %v5520_v57  ;;  %v2983_v8 = vmul.f32 1.442695, %v2960_v14 }
 0x5b0   :  { %v4136_v47 = vpop.eup %4135  ;;  %v3109_v9 = vsel %vm434_vm1, %v3069_v22, 0.0  ;;  %v2869_v53 = vpop.f32.mrf.mxu0  ;;  %v2822_v14 = vrot.slane %v5560_v38, 2  ;;  %vm2944_vm5 = vcmp.gt.f32.partialorder %v5552_v34, 20.0 }
 0x5b1   :  { %v3254_v19 = vsel %vm1330_vm10, %v3253_v61, %v3252_v49  ;;  %v3108_v25 = vadd.f32 %v3107_v15, %v3106_v51  ;;  %v3110_v23 = vrot.slane %v3109_v9, 4  ;;  %v3007_v37 = vadd.f32 1.0, %v4136_v47 }
 0x5b2   :  { %v4138_v29 = vpop.eup %4137  ;;  %4141 = vpow2.f32 %v2983_v8  ;;  %v2640_v32 = vadd.f32 %v2608_v59, %v2579_v55  ;;  %v2870_v44 = vadd.f32 %v2869_v53, %v5533_v13 }
 0x5b3   :  { %v3201_v43 = vmul.f32 %v5514_v1, %v3108_v25  ;;  %v3111_v57 = vadd.f32 %v3110_v23, %v3109_v9  ;;  %v3028_v17 = vmul.f32 0.6931472, %v4138_v29  ;;  %4143 = vlog2.f32 %v3007_v37  ;;  %v2485_v45 = vpop.f32.mrf.mxu2  ;;  %v2799_v25 = vpop.f32.mrf.mxu1 }
 0x5b4   :  { %v4140_v7 = vpop.eup %4139  ;;  %v2656_v63 = vmul.f32 0.5, %v2640_v32  ;;  %v5578_v35 = vadd.f32 %v2897_v12, %v2870_v44  ;;  %v2899_v37 = vperm.slane %v2822_v14, 0  ;;  %v2823_v29 = vrot.slane %v5560_v38, 3 }
 0x5b5   :  { %v3222_v62 = vadd.f32 %v5530_v31, %v3201_v43  ;;  %v3112_v18 = vrot.slane %v3111_v57, 2  ;;  %v3054_v24 = vsel %vm2942_vm13, %v5516_v20, %v3028_v17  ;;  %v2687_v3 = vmul.f32 0.5, %v4140_v7 }
 0x5b6   :  { %v3070_v4 = vmul.f32 %v3054_v24, %v2702_v36  ;;  %4145 = vtanh.f32 %v2656_v63  ;;  %v5573_v41 = vpop.f32.mrf.mxu3  ;;  %v2900_v44 = vperm.slane %v2823_v29, 0  ;;  %vm2945_vm6 = vcmp.gt.f32.partialorder %v5578_v35, 20.0 }
 0x5b7   :  { %v3255_v48 = vrot.slane %v3222_v62, 5  ;;  %v3113_v49 = vadd.f32 %v3112_v18, %v3111_v57  ;;  %v2703_v51 = vadd.f32 0.5, %v2687_v3 }
 0x5b8   :  { %v4142_v26 = vpop.eup %4141  ;;  %v3116_v50 = vsel %vm434_vm1, %v3070_v4, 0.0  ;;  %v2871_v39 = vpop.f32.mrf.mxu0 }
 0x5b9   :  { %v4144_v2 = vpop.eup %4143  ;;  %v3114_v27 = vrot.slane %v3113_v49, 1  ;;  %v3117_v20 = vrot.slane %v3116_v50, 4  ;;  %v3008_v30 = vadd.f32 1.0, %v4142_v26  ;;  %v2872_v60 = vadd.f32 %v2871_v39, %v2794_v33 }
 0x5ba   :  { %v3030_v13 = vmul.f32 0.6931472, %v4144_v2  ;;  %v3256_v54 = vsel %vm1333_vm12, %v3255_v48, %v3254_v19  ;;  %v2961_v33 = vmin.f32 %v5578_v35, 20.0 }
 0x5bb   :  { %v3115_v10 = vadd.f32 %v3114_v27, %v3113_v49  ;;  %v3118_v58 = vadd.f32 %v3117_v20, %v3116_v50  ;;  %4147 = vlog2.f32 %v3008_v30  ;;  %v5584_v47 = vadd.f32 %v2898_v42, %v2872_v60  ;;  %v2487_v2 = vpop.f32.mrf.mxu2 }
 0x5bc   :  { %v4146_v11 = vpop.eup %4145  ;;  %v3055_v22 = vsel %vm2943_vm0, %v5539_v16, %v3030_v13  ;;  %v5591_v16 = vadd.f32 %v5458_v46, %v5447_v56  ;;  %v2985_v6 = vmul.f32 1.442695, %v2961_v33  ;;  %v2582_v50 = vadd.f32 %v5573_v41, %v5546_v52 }
 0x5bd   :  { %v3202_v61 = vmul.f32 %v5514_v1, %v3115_v10  ;;  %v3119_v15 = vrot.slane %v3118_v58, 2  ;;  %v3071_v55 = vmul.f32 %v3055_v22, %v2703_v51  ;;  %v2688_v53 = vmul.f32 0.5, %v4146_v11 }
 0x5be   :  { %v2583_v9 = vpop.f32.mrf.mxu3  ;;  %v2962_v17 = vmin.f32 %v5584_v47, 20.0  ;;  %v2509_v12 = vrot.slane %v5591_v16, 1  ;;  %4149 = vpow2.f32 %v2985_v6  ;;  %v2510_v20 = vrot.slane %v5591_v16, 2 }
 0x5bf   :  { %v3223_v5 = vadd.f32 %v5530_v31, %v3202_v61  ;;  %v3120_v8 = vadd.f32 %v3119_v15, %v3118_v58  ;;  %v3123_v59 = vsel %vm434_vm1, %v3071_v55, 0.0  ;;  %v2704_v56 = vadd.f32 0.5, %v2688_v53  ;;  %v2802_v61 = vpop.f32.mrf.mxu1 }
 0x5c0   :  { %v3124_v19 = vrot.slane %v3123_v59, 4  ;;  %v2874_v23 = vpop.f32.mrf.mxu0  ;;  %v2987_v3 = vmul.f32 1.442695, %v2962_v17  ;;  %v2511_v10 = vrot.slane %v5591_v16, 3  ;;  %v2584_v41 = vadd.f32 %v2583_v9, %v5565_v40 }
 0x5c1   :  { %v4148_v32 = vpop.eup %4147  ;;  %v3257_v43 = vrot.slane %v3223_v5, 4  ;;  %v3121_v57 = vrot.slane %v3120_v8, 1  ;;  %v2875_v7 = vadd.f32 %v2874_v23, %v2797_v0  ;;  %v2609_v0 = vperm.slane %v5591_v16, 0 }
 0x5c2   :  { %v3125_v36 = vadd.f32 %v3124_v19, %v3123_v59  ;;  %v3032_v63 = vmul.f32 0.6931472, %v4148_v32  ;;  %4151 = vpow2.f32 %v2987_v3  ;;  %v2610_v14 = vperm.slane %v2509_v12, 0 }
 0x5c3   :  { %v3122_v62 = vadd.f32 %v3121_v57, %v3120_v8  ;;  %v5596_v46 = vadd.f32 %v2899_v37, %v2875_v7  ;;  %v3258_v18 = vsel %vm1336_vm15, %v3257_v43, %v3256_v54  ;;  %v2641_v22 = vadd.f32 %v2609_v0, %v2582_v50 }
 0x5c4   :  { %v3126_v24 = vrot.slane %v3125_v36, 2  ;;  %v3056_v4 = vsel %vm2944_vm5, %v5552_v34, %v3032_v63  ;;  %v4150_v59 = vpop.eup %4149  ;;  %v2642_v53 = vadd.f32 %v2610_v14, %v2584_v41  ;;  %v2611_v19 = vperm.slane %v2510_v20, 0 }
 0x5c5   :  { %v3203_v48 = vmul.f32 %v5514_v1, %v3122_v62  ;;  %v3072_v49 = vmul.f32 %v3056_v4, %v2704_v56  ;;  %v2963_v39 = vmin.f32 %v5596_v46, 20.0  ;;  %v2824_v40 = vrot.slane %v5560_v38, 4  ;;  %v2490_v62 = vpop.f32.mrf.mxu2 }
 0x5c6   :  { %v3127_v26 = vadd.f32 %v3126_v24, %v3125_v36  ;;  %v2586_v42 = vpop.f32.mrf.mxu3  ;;  %v2612_v57 = vperm.slane %v2511_v10, 0  ;;  %v3009_v36 = vadd.f32 1.0, %v4150_v59  ;;  %vm2946_vm7 = vcmp.gt.f32.partialorder %v5584_v47, 20.0 }
 0x5c7   :  { %v3224_v27 = vadd.f32 %v5530_v31, %v3203_v48  ;;  %v3130_v34 = vsel %vm434_vm1, %v3072_v49, 0.0  ;;  %v2989_v60 = vmul.f32 1.442695, %v2963_v39  ;;  %v2587_v15 = vadd.f32 %v2586_v42, %v2485_v45  ;;  %v2804_v42 = vpop.f32.mrf.mxu1 }
 0x5c8   :  { %v3128_v30 = vrot.slane %v3127_v26, 1  ;;  %v3131_v13 = vrot.slane %v3130_v34, 4  ;;  %v2876_v54 = vpop.f32.mrf.mxu0  ;;  %v4152_v29 = vpop.eup %4151  ;;  %v2657_v45 = vmul.f32 0.5, %v2641_v22  ;;  %v2901_v4 = vperm.slane %v2824_v40, 0 }
 0x5c9   :  { %v3259_v52 = vrot.slane %v3224_v27, 3  ;;  %v2877_v58 = vadd.f32 %v2876_v54, %v2799_v25  ;;  %4153 = vpow2.f32 %v2989_v60  ;;  %v2643_v32 = vadd.f32 %v2611_v19, %v2587_v15 }
 0x5ca   :  { %v3129_v51 = vadd.f32 %v3128_v30, %v3127_v26  ;;  %v3132_v11 = vadd.f32 %v3131_v13, %v3130_v34  ;;  %v3010_v49 = vadd.f32 1.0, %v4152_v29  ;;  %v2513_v40 = vrot.slane %v5591_v16, 5 }
 0x5cb   :  { %v5611_v55 = vadd.f32 %v2900_v44, %v2877_v58  ;;  %v3260_v33 = vsel %vm1339_vm2, %v3259_v52, %v3258_v18  ;;  %v2658_v18 = vmul.f32 0.5, %v2642_v53  ;;  %v2512_v44 = vrot.slane %v5591_v16, 4 }
 0x5cc   :  { %v3204_v5 = vmul.f32 %v5514_v1, %v3129_v51  ;;  %v3133_v8 = vrot.slane %v3132_v11, 2  ;;  %v2659_v3 = vmul.f32 0.5, %v2643_v32  ;;  %vm2947_vm9 = vcmp.gt.f32.partialorder %v5596_v46, 20.0 }
 0x5cd   :  { %v2964_v23 = vmin.f32 %v5611_v55, 20.0  ;;  %v2613_v54 = vperm.slane %v2512_v44, 0  ;;  %v2492_v15 = vpop.f32.mrf.mxu2  ;;  %vm2948_vm11 = vcmp.gt.f32.partialorder %v5611_v55, 20.0 }
 0x5ce   :  { %v3225_v9 = vadd.f32 %v5530_v31, %v3204_v5  ;;  %v3134_v25 = vadd.f32 %v3133_v8, %v3132_v11  ;;  %v2588_v37 = vpop.f32.mrf.mxu3  ;;  %v2827_v5 = vrot.slane %v5560_v38, 7 }
 0x5cf   :  { %v2589_v43 = vadd.f32 %v2588_v37, %v2487_v2  ;;  %v2991_v63 = vmul.f32 1.442695, %v2964_v23  ;;  %v4154_v56 = vpop.eup %4153  ;;  %v2825_v2 = vrot.slane %v5560_v38, 5 }
 0x5d0   :  { %v3261_v17 = vrot.slane %v3225_v9, 2  ;;  %v3135_v7 = vrot.slane %v3134_v25, 1  ;;  %v2879_v6 = vpop.f32.mrf.mxu0  ;;  %v3011_v39 = vadd.f32 1.0, %v4154_v56 }
 0x5d1   :  { %v2880_v24 = vadd.f32 %v2879_v6, %v2802_v61  ;;  %4155 = vpow2.f32 %v2991_v63  ;;  %v2644_v0 = vadd.f32 %v2612_v57, %v2589_v43  ;;  %v2902_v41 = vperm.slane %v2825_v2, 0 }
 0x5d2   :  { %v3136_v48 = vadd.f32 %v3135_v7, %v3134_v25  ;;  %4157 = vtanh.f32 %v2657_v45  ;;  %v3262_v50 = vsel %vm1342_vm3, %v3261_v17, %v3260_v33  ;;  %v2826_v33 = vrot.slane %v5560_v38, 6  ;;  %v2807_v45 = vpop.f32.mrf.mxu1 }
 0x5d3   :  { %v5619_v26 = vadd.f32 %v2901_v4, %v2880_v24  ;;  %4159 = vlog2.f32 %v3009_v36  ;;  %v2660_v20 = vmul.f32 0.5, %v2644_v0  ;;  %v2514_v25 = vrot.slane %v5591_v16, 6 }
 0x5d4   :  { %v3205_v12 = vmul.f32 %v5514_v1, %v3136_v48  ;;  %4161 = vtanh.f32 %v2658_v18  ;;  %v2903_v32 = vperm.slane %v2826_v33, 0  ;;  %v5636_v43 = vperm.slane %v2827_v5, 0 }
 0x5d5   :  { %v2965_v27 = vmin.f32 %v5619_v26, 20.0  ;;  %4163 = vlog2.f32 %v3010_v49  ;;  %v2614_v36 = vperm.slane %v2513_v40, 0  ;;  %v2515_v63 = vrot.slane %v5591_v16, 7 }
 0x5d6   :  { %v3226_v34 = vadd.f32 %v5530_v31, %v3205_v12  ;;  %v2591_v30 = vpop.f32.mrf.mxu3  ;;  %4165 = vtanh.f32 %v2659_v3  ;;  %v2615_v4 = vperm.slane %v2514_v25, 0  ;;  %vm2949_vm13 = vcmp.gt.f32.partialorder %v5619_v26, 20.0 }
 0x5d7   :  { %v2993_v13 = vmul.f32 1.442695, %v2965_v27  ;;  %v2592_v60 = vadd.f32 %v2591_v30, %v2490_v62  ;;  %v4156_v10 = vpop.eup %4155  ;;  %4167 = vlog2.f32 %v3011_v39  ;;  %v2495_v30 = vpop.f32.mrf.mxu2 }
 0x5d8   :  { %v2881_v52 = vpop.f32.mrf.mxu0  ;;  %v3263_v58 = vrot.slane %v3226_v34, 1  ;;  %v4158_v51 = vpop.eup %4157  ;;  %v3012_v11 = vadd.f32 1.0, %v4156_v10 }
 0x5d9   :  { %4169 = vpow2.f32 %v2993_v13  ;;  %v2645_v22 = vadd.f32 %v2613_v54, %v2592_v60  ;;  %v2882_v14 = vadd.f32 %v2881_v52, %v2804_v42  ;;  %v4160_v61 = vpop.eup %4159  ;;  %v2689_v62 = vmul.f32 0.5, %v4158_v51 }
 0x5da   :  { %4171 = vtanh.f32 %v2660_v20  ;;  %v5629_v8 = vsel %vm1345_vm4, %v3263_v58, %v3262_v50  ;;  %v4162_v59 = vpop.eup %4161  ;;  %v3034_v39 = vmul.f32 0.6931472, %v4160_v61 }
 0x5db   :  { %4173 = vlog2.f32 %v3012_v11  ;;  %v2661_v53 = vmul.f32 0.5, %v2645_v22  ;;  %v5631_v19 = vadd.f32 %v2902_v41, %v2882_v14  ;;  %v4164_v9 = vpop.eup %4163  ;;  %v2690_v3 = vmul.f32 0.5, %v4162_v59  ;;  %v2809_v59 = vpop.f32.mrf.mxu1 }
 0x5dc   :  { %v4166_v23 = vpop.eup %4165  ;;  %v3036_v56 = vmul.f32 0.6931472, %v4164_v9  ;;  %v2705_v34 = vadd.f32 0.5, %v2689_v62  ;;  %v3057_v11 = vsel %vm2945_vm6, %v5578_v35, %v3034_v39 }
 0x5dd   :  { %4175 = vtanh.f32 %v2661_v53  ;;  %v2966_v37 = vmin.f32 %v5631_v19, 20.0  ;;  %v4168_v29 = vpop.eup %4167  ;;  %v2691_v50 = vmul.f32 0.5, %v4166_v23  ;;  %v2706_v10 = vadd.f32 0.5, %v2690_v3 }
 0x5de   :  { %v2593_v38 = vpop.f32.mrf.mxu3  ;;  %v3038_v48 = vmul.f32 0.6931472, %v4168_v29  ;;  %v3058_v13 = vsel %vm2946_vm7, %v5584_v47, %v3036_v56  ;;  %vm2950_vm0 = vcmp.gt.f32.partialorder %v5631_v19, 20.0 }
 0x5df   :  { %v4170_v57 = vpop.eup %4169  ;;  %v2995_v17 = vmul.f32 1.442695, %v2966_v37  ;;  %v2594_v7 = vadd.f32 %v2593_v38, %v2492_v15  ;;  %v2707_v52 = vadd.f32 0.5, %v2691_v50  ;;  %v3073_v38 = vmul.f32 %v3057_v11, %v2705_v34  ;;  %v2497_v62 = vpop.f32.mrf.mxu2 }
 0x5e0   :  { %v4172_v6 = vpop.eup %4171  ;;  %v3013_v18 = vadd.f32 1.0, %v4170_v57  ;;  %v2884_v24 = vpop.f32.mrf.mxu0  ;;  %v3059_v60 = vsel %vm2947_vm9, %v5596_v46, %v3038_v48  ;;  %v3074_v46 = vmul.f32 %v3058_v13, %v2706_v10 }
 0x5e1   :  { %v4174_v44 = vpop.eup %4173  ;;  %4177 = vpow2.f32 %v2995_v17  ;;  %v2646_v49 = vadd.f32 %v2614_v36, %v2594_v7  ;;  %v2885_v0 = vadd.f32 %v2884_v24, %v2807_v45  ;;  %v2692_v20 = vmul.f32 0.5, %v4172_v6 }
 0x5e2   :  { %4179 = vlog2.f32 %v3013_v18  ;;  %v3040_v42 = vmul.f32 0.6931472, %v4174_v44  ;;  %v3075_v15 = vmul.f32 %v3059_v60, %v2707_v52 }
 0x5e3   :  { %v4176_v12 = vpop.eup %4175  ;;  %v2662_v2 = vmul.f32 0.5, %v2646_v49  ;;  %v5640_v27 = vadd.f32 %v2903_v32, %v2885_v0  ;;  %v2708_v33 = vadd.f32 0.5, %v2692_v20  ;;  %v3144_v32 = vsel %vm434_vm1, %v3074_v46, 0.0 }
 0x5e4   :  { %v2693_v41 = vmul.f32 0.5, %v4176_v12  ;;  %v3060_v22 = vsel %vm2948_vm11, %v5611_v55, %v3040_v42  ;;  %v3151_v17 = vsel %vm434_vm1, %v3075_v15, 0.0  ;;  %v3137_v49 = vsel %vm434_vm1, %v3073_v38, 0.0 }
 0x5e5   :  { %4181 = vtanh.f32 %v2662_v2  ;;  %v2967_v54 = vmin.f32 %v5640_v27, 20.0  ;;  %v3076_v23 = vmul.f32 %v3060_v22, %v2708_v33  ;;  %v3152_v0 = vrot.slane %v3151_v17, 4 }
 0x5e6   :  { %v2596_v58 = vpop.f32.mrf.mxu3  ;;  %v2709_v37 = vadd.f32 0.5, %v2693_v41  ;;  %v3138_v60 = vrot.slane %v3137_v49, 4  ;;  %vm2951_vm5 = vcmp.gt.f32.partialorder %v5640_v27, 20.0 }
 0x5e7   :  { %v4178_v51 = vpop.eup %4177  ;;  %v2997_v14 = vmul.f32 1.442695, %v2967_v54  ;;  %v2597_v47 = vadd.f32 %v2596_v58, %v2495_v30  ;;  %v3158_v36 = vsel %vm434_vm1, %v3076_v23, 0.0  ;;  %v3153_v30 = vadd.f32 %v3152_v0, %v3151_v17 }
 0x5e8   :  { %v4180_v61 = vpop.eup %4179  ;;  %v3014_v5 = vadd.f32 1.0, %v4178_v51  ;;  %v2886_v53 = vpop.f32.mrf.mxu0  ;;  %v3159_v50 = vrot.slane %v3158_v36, 4 }
 0x5e9   :  { %v3042_v40 = vmul.f32 0.6931472, %v4180_v61  ;;  %4183 = vpow2.f32 %v2997_v14  ;;  %v2647_v9 = vadd.f32 %v2615_v4, %v2597_v47  ;;  %v2887_v25 = vadd.f32 %v2886_v53, %v2809_v59 }
 0x5ea   :  { %4185 = vlog2.f32 %v3014_v5  ;;  %v3160_v54 = vadd.f32 %v3159_v50, %v3158_v36  ;;  %v3154_v14 = vrot.slane %v3153_v30, 2  ;;  %v3139_v61 = vadd.f32 %v3138_v60, %v3137_v49 }
 0x5eb   :  { %v4182_v35 = vpop.eup %4181  ;;  %v3061_v55 = vsel %vm2949_vm13, %v5619_v26, %v3042_v40  ;;  %v2663_v29 = vmul.f32 0.5, %v2647_v9  ;;  %v5655_v45 = vadd.f32 %v5636_v43, %v2887_v25  ;;  %v2616_v26 = vperm.slane %v2515_v63, 0 }
 0x5ec   :  { %v3077_v57 = vmul.f32 %v3061_v55, %v2709_v37  ;;  %v2694_v6 = vmul.f32 0.5, %v4182_v35  ;;  %v3145_v43 = vrot.slane %v3144_v32, 4  ;;  %v3161_v46 = vrot.slane %v3160_v54, 2 }
 0x5ed   :  { %4187 = vtanh.f32 %v2663_v29  ;;  %v2968_v7 = vmin.f32 %v5655_v45, 20.0  ;;  %v3155_v25 = vadd.f32 %v3154_v14, %v3153_v30  ;;  %v3140_v37 = vrot.slane %v3139_v61, 2 }
 0x5ee   :  { %v2598_v56 = vpop.f32.mrf.mxu3  ;;  %v3165_v24 = vsel %vm434_vm1, %v3077_v57, 0.0  ;;  %v2710_v16 = vadd.f32 0.5, %v2694_v6  ;;  %v3146_v2 = vadd.f32 %v3145_v43, %v3144_v32  ;;  %v3162_v35 = vadd.f32 %v3161_v46, %v3160_v54 }
 0x5ef   :  { %v4184_v18 = vpop.eup %4183  ;;  %v2999_v4 = vmul.f32 1.442695, %v2968_v7  ;;  %v2599_v44 = vadd.f32 %v2598_v56, %v2497_v62  ;;  %v3166_v42 = vrot.slane %v3165_v24, 4  ;;  %v3156_v36 = vrot.slane %v3155_v25, 1 }
 0x5f0   :  { %v4186_v48 = vpop.eup %4185  ;;  %v3015_v3 = vadd.f32 1.0, %v4184_v18  ;;  %v3147_v51 = vrot.slane %v3146_v2, 2  ;;  %v3141_v6 = vadd.f32 %v3140_v37, %v3139_v61  ;;  %v3163_v62 = vrot.slane %v3162_v35, 1 }
 0x5f1   :  { %v3044_v12 = vmul.f32 0.6931472, %v4186_v48  ;;  %4189 = vpow2.f32 %v2999_v4  ;;  %v2648_v39 = vadd.f32 %v2616_v26, %v2599_v44  ;;  %v3167_v10 = vadd.f32 %v3166_v42, %v3165_v24 }
 0x5f2   :  { %4191 = vlog2.f32 %v3015_v3  ;;  %v3148_v53 = vadd.f32 %v3147_v51, %v3146_v2  ;;  %vm2952_vm6 = vcmp.gt.f32.partialorder %v5655_v45, 20.0  ;;  %v3157_v48 = vadd.f32 %v3156_v36, %v3155_v25 }
 0x5f3   :  { %v4188_v63 = vpop.eup %4187  ;;  %v3062_v34 = vsel %vm2950_vm0, %v5631_v19, %v3044_v12  ;;  %v2664_v20 = vmul.f32 0.5, %v2648_v39  ;;  %v3168_v33 = vrot.slane %v3167_v10, 2  ;;  %v3142_v0 = vrot.slane %v3141_v6, 1 }
 0x5f4   :  { %v3078_v13 = vmul.f32 %v3062_v34, %v2710_v16  ;;  %v2695_v41 = vmul.f32 0.5, %v4188_v63  ;;  %v3149_v32 = vrot.slane %v3148_v53, 1  ;;  %v3164_v3 = vadd.f32 %v3163_v62, %v3162_v35 }
 0x5f5   :  { %4193 = vtanh.f32 %v2664_v20  ;;  %v3169_v55 = vadd.f32 %v3168_v33, %v3167_v10  ;;  %v3208_v34 = vmul.f32 %v5514_v1, %v3157_v48  ;;  %v3143_v20 = vadd.f32 %v3142_v0, %v3141_v6  ;;  %v3856_v0 = vld [vmem:[#allocation11] sm:$0xff] }
 0x5f6   :  { %v3172_v52 = vsel %vm434_vm1, %v3078_v13, 0.0  ;;  %v2711_v5 = vadd.f32 0.5, %v2695_v41  ;;  %v3150_v43 = vadd.f32 %v3149_v32, %v3148_v53  ;;  %v3209_v30 = vmul.f32 %v5514_v1, %v3164_v3 }
 0x5f7   :  { %v4190_v58 = vpop.eup %4189  ;;  %v3173_v11 = vrot.slane %v3172_v52, 4  ;;  %v3170_v18 = vrot.slane %v3169_v55, 1  ;;  %v3229_v41 = vadd.f32 %v5530_v31, %v3208_v34  ;;  %v3281_v51 = vadd.f32 %v5629_v8, %v5351_v28 }
 0x5f8   :  { %v4192_v22 = vpop.eup %4191  ;;  %v3016_v47 = vadd.f32 1.0, %v4190_v58  ;;  %v3207_v42 = vmul.f32 %v5514_v1, %v3150_v43 }
 0x5f9   :  { %v3174_v15 = vadd.f32 %v3173_v11, %v3172_v52  ;;  %v3046_v19 = vmul.f32 0.6931472, %v4192_v22  ;;  %v3171_v12 = vadd.f32 %v3170_v18, %v3169_v55  ;;  %v3206_v11 = vmul.f32 %v5514_v1, %v3143_v20 }
 0x5fa   :  { %4195 = vlog2.f32 %v3016_v47  ;;  %v3228_v54 = vadd.f32 %v5530_v31, %v3207_v42  ;;  %v3230_v22 = vadd.f32 %v5530_v31, %v3209_v30  ;;  %v3861_v30 = vld [vmem:[%s5734_s14 + $0x18] sm:$0xff] }
 0x5fb   :  { %v4194_v59 = vpop.eup %4193  ;;  %v3175_v40 = vrot.slane %v3174_v15, 2  ;;  %v3063_v9 = vsel %vm2951_vm5, %v5640_v27, %v3046_v19  ;;  %v3210_v60 = vmul.f32 %v5514_v1, %v3171_v12  ;;  %v3267_v19 = vrot.slane %v3229_v41, 6 }
 0x5fc   :  { %v3079_v23 = vmul.f32 %v3063_v9, %v2711_v5  ;;  %v2696_v38 = vmul.f32 0.5, %v4194_v59  ;;  %v3265_v61 = vrot.slane %v3228_v54, 7  ;;  %v3285_v5 = vmin.f32 %v3281_v51, 20.0  ;;  %v3858_v54 = vld [vmem:[%s5734_s14] sm:$0xff] }
 0x5fd   :  { %v3176_v57 = vadd.f32 %v3175_v40, %v3174_v15  ;;  %v3231_v47 = vadd.f32 %v5530_v31, %v3210_v60  ;;  %v3227_v59 = vadd.f32 %v5530_v31, %v3206_v11  ;;  %v3269_v53 = vrot.slane %v3230_v22, 5  ;;  %v3891_v60 = vld [vmem:[%s5733_s13] ss:$0 sm:$0xff] }
 0x5fe   :  { %v3179_v29 = vsel %vm434_vm1, %v3079_v23, 0.0  ;;  %v2712_v27 = vadd.f32 0.5, %v2696_v38  ;;  %v3287_v35 = vmul.f32 1.442695, %v3285_v5 }
 0x5ff   :  { %v3180_v17 = vrot.slane %v3179_v29, 4  ;;  %v3177_v24 = vrot.slane %v3176_v57, 1  ;;  %v3271_v28 = vrot.slane %v3231_v47, 4  ;;  %v3266_v8 = vsel %vm1327_vm8, %v3265_v61, %v3227_v59 }
 0x600   :  { %v4196_v7 = vpop.eup %4195  ;;  %v3268_v23 = vsel %vm1330_vm10, %v3267_v19, %v3266_v8  ;;  %4197 = vpow2.f32 %v3287_v35  ;;  %vm3283_vm8 = vcmp.gt.f32.partialorder %v3281_v51, 20.0 }
 0x601   :  { %v3181_v56 = vadd.f32 %v3180_v17, %v3179_v29  ;;  %v3048_v26 = vmul.f32 0.6931472, %v4196_v7  ;;  %v3178_v16 = vadd.f32 %v3177_v24, %v3176_v57  ;;  %v3270_v29 = vsel %vm1333_vm12, %v3269_v53, %v3268_v23 }
 0x602   :  { %v3272_v38 = vsel %vm1336_vm15, %v3271_v28, %v3270_v29  ;;  %vm3424_vm15 = vcmask 1024  }
 0x603   :  { %v3182_v4 = vrot.slane %v3181_v56, 2  ;;  %v3064_v44 = vsel %vm2952_vm6, %v5655_v45, %v3048_v26  ;;  %v3211_v10 = vmul.f32 %v5514_v1, %v3178_v16 }
 0x604   :  { %v3080_v49 = vmul.f32 %v3064_v44, %v2712_v27 }
 0x605   :  { %v3183_v50 = vadd.f32 %v3182_v4, %v3181_v56  ;;  %v3232_v46 = vadd.f32 %v5530_v31, %v3211_v10 }
 0x606   :  { %v3186_v39 = vsel %vm434_vm1, %v3080_v49, 0.0  ;;  %v4198_v6 = vpop.eup %4197  ;;  %v3857_v49 = vld [vmem:[#allocation11 + $0x8] sm:$0xff] }
 0x607   :  { %v3184_v63 = vrot.slane %v3183_v50, 1  ;;  %v3187_v2 = vrot.slane %v3186_v39, 4  ;;  %v3273_v9 = vrot.slane %v3232_v46, 3  ;;  %v3291_v56 = vadd.f32 1.0, %v4198_v6 }
 0x609   :  { %v3185_v13 = vadd.f32 %v3184_v63, %v3183_v50  ;;  %v3188_v45 = vadd.f32 %v3187_v2, %v3186_v39  ;;  %v3274_v32 = vsel %vm1339_vm2, %v3273_v9, %v3272_v38 }
 0x60b   :  { %v3189_v52 = vrot.slane %v3188_v45, 2  ;;  %v3212_v58 = vmul.f32 %v5514_v1, %v3185_v13  ;;  %v3860_v13 = vld [vmem:[%s5734_s14 + $0x10] sm:$0xff] }
 0x60d   :  { %v3190_v14 = vadd.f32 %v3189_v52, %v3188_v45  ;;  %v3233_v33 = vadd.f32 %v5530_v31, %v3212_v58  ;;  %v3859_v45 = vld [vmem:[%s5734_s14 + $0x8] sm:$0xff] }
 0x60f   :  { %v3191_v15 = vrot.slane %v3190_v14, 1  ;;  %v3275_v37 = vrot.slane %v3233_v33, 2 }
 0x611   :  { %v3192_v40 = vadd.f32 %v3191_v15, %v3190_v14  ;;  %v3276_v17 = vsel %vm1342_vm3, %v3275_v37, %v3274_v32  ;;  %v3892_v15 = vld [vmem:[#allocation2] ss:$0 sm:$0xff] }
 0x613   :  { %v3213_v25 = vmul.f32 %v5514_v1, %v3192_v40 }
 0x615   :  { %v3234_v55 = vadd.f32 %v5530_v31, %v3213_v25 }
 0x617   :  { %v3277_v57 = vrot.slane %v3234_v55, 1 }
 0x619   :  { %v3278_v7 = vsel %vm1345_vm4, %v3277_v57, %v3276_v17 }
 0x61a   :  { %v3282_v1 = vadd.f32 %v3278_v7, %v5353_v21  ;;  %v3299_v21 = vld [vmem:[#allocation10] sm:$0x1] }
 0x61c   :  { %v3286_v36 = vmin.f32 %v3282_v1, 20.0  ;;  %vm3284_vm10 = vcmp.gt.f32.partialorder %v3282_v1, 20.0 }
 0x61e   :  { %v3289_v62 = vmul.f32 1.442695, %v3286_v36 }
 0x620   :  { %4199 = vpow2.f32 %v3289_v62 }
 0x621   :  { %4201 = vlog2.f32 %v3291_v56 }
 0x626   :  { %v4200_v31 = vpop.eup %4199 }
 0x627   :  { %v3292_v26 = vadd.f32 1.0, %v4200_v31  ;;  %v4202_v18 = vpop.eup %4201 }
 0x628   :  { %v3294_v27 = vmul.f32 0.6931472, %v4202_v18 }
 0x629   :  { %4203 = vlog2.f32 %v3292_v26 }
 0x62a   :  { %v3297_v4 = vsel %vm3283_vm8, %v3281_v51, %v3294_v27 }
 0x62f   :  { %v4204_v43 = vpop.eup %4203 }
 0x630   :  { %v3296_v24 = vmul.f32 0.6931472, %v4204_v43 }
 0x632   :  { %v3298_v44 = vsel %vm3284_vm10, %v3282_v1, %v3296_v24 }
 0x633   :  { %v3300_v48 = vpack.c.bf16 %v3298_v44, %v3297_v4 }
 0x635   :  { %3311 = vmatpush.bf16.msra.mxu2 %v3300_v48 }
 0x638   :  { %3789 = vmatmul.msk.bf16.vlgmr.msra.gmra.mxu2 %vm332_vm14, %v3299_v21 }
 0x639   :  { %3355 = vmatpush.bf16.msrb.mxu2 %v3857_v49 }
 0x63d   :  { %3356 = vmatpush.bf16.msrb.mxu2 %v3856_v0 }
 0x641   :  { %3415 = vmatpush.bf16.msra.mxu2 %v3861_v30 }
 0x645   :  { %3416 = vmatpush.bf16.msra.mxu2 %v3860_v13 }
 0x649   :  { %3417 = vmatpush.bf16.msra.mxu2 %v3859_v45 }
 0x64d   :  { %3418 = vmatpush.bf16.msra.mxu2 %v3858_v54 }
 0x6bb   :  { %v3313_v3 = vpop.f32.mrf.mxu2 }
 0x6bc   :  { %v3318_v50 = vmin.f32 %v3313_v3, 20.0  ;;  %vm3317_vm12 = vcmp.gt.f32.partialorder %v3313_v3, 20.0 }
 0x6be   :  { %v3319_v12 = vmul.f32 1.442695, %v3318_v50 }
 0x6c0   :  { %4205 = vpow2.f32 %v3319_v12 }
 0x6c3   :  { %v3315_v39 = vpop.f32.mrf.mxu2 }
 0x6c6   :  { %v4206_v42 = vpop.eup %4205 }
 0x6c7   :  { %v3321_v16 = vadd.f32 1.0, %v4206_v42 }
 0x6c9   :  { %4207 = vlog2.f32 %v3321_v16 }
 0x6cf   :  { %v4208_v63 = vpop.eup %4207 }
 0x6d0   :  { %v3323_v2 = vmul.f32 0.6931472, %v4208_v63 }
 0x6d2   :  { %v3324_v34 = vsel %vm3317_vm12, %v3313_v3, %v3323_v2 }
 0x6d3   :  { %v3325_v20 = vpack.c.bf16 %v3324_v34, %v3324_v34 }
 0x6d5   :  { %3798 = vmatmul.msk.bf16.vlgmr.msrb.gmra.mxu2 %vm434_vm1, %v3325_v20  ;;  %vm3407_vm1 = vcmask 523264  }
 0x758   :  { %v3358_v10 = vpop.f32.mrf.mxu2 }
 0x759   :  { %v3359_v52 = vadd.f32 %v3891_v60, %v3358_v10 }
 0x75b   :  { %v3363_v41 = vmin.f32 %v3359_v52, 20.0  ;;  %vm3362_vm14 = vcmp.gt.f32.partialorder %v3359_v52, 20.0 }
 0x75d   :  { %v3364_v58 = vmul.f32 1.442695, %v3363_v41 }
 0x75f   :  { %4209 = vpow2.f32 %v3364_v58 }
 0x760   :  { %v3360_v51 = vpop.f32.mrf.mxu2 }
 0x765   :  { %v4210_v11 = vpop.eup %4209 }
 0x766   :  { %v3366_v22 = vadd.f32 1.0, %v4210_v11 }
 0x768   :  { %4211 = vlog2.f32 %v3366_v22 }
 0x76e   :  { %v4212_v14 = vpop.eup %4211 }
 0x76f   :  { %v3368_v47 = vmul.f32 0.6931472, %v4212_v14 }
 0x771   :  { %v3369_v61 = vsel %vm3362_vm14, %v3359_v52, %v3368_v47 }
 0x772   :  { %v3370_v46 = vpack.c.bf16 %v3369_v61, %v3369_v61 }
 0x774   :  { %3815 = vmatmul.msk.bf16.vlgmr.msra.gmra.mxu2 %vm3407_vm1, %v3370_v46 }
 0x7f7   :  { %v3420_v19 = vpop.f32.mrf.mxu2 }
 0x7f8   :  { %v3421_v33 = vadd.f32 %v3892_v15, %v3420_v19 }
 0x7fa   :  { %3425 = vst.msk [vmem:[%s5736_s16] sm:$0x3] %vm3424_vm15, %v3421_v33 }
 0x7ff   :  { %v3422_v5 = vpop.f32.mrf.mxu2 }
 0x800   :  { %3430 = vsyncpa [#allocation4], 1 }
 0x801   :  { %3431 = vsyncpa [#allocation6], 1 }
 0x802   :  { %3432 = vsyncpa [#allocation9], 1 }
 0x803   :  { %3433 = vsyncpa [#allocation12], 1 }

</bundles_post_ra>
